<compile_context>
chip_gen: v6e
topology: v6e:2x2x1
jax: 0.10.0
libtpu: 0.0.40
codegen_flags: <defaults>
</compile_context>

<pallas_src>
import functools

import jax
import jax.numpy as jnp
from jax.experimental import pallas as pl
from jax.experimental.pallas import tpu as pltpu


def cbam_kernel(x_ref, w1t_ref, w2_ref, wsa_ref, o_ref, *,
                C, CR, H, W, HW, K, P):
    inv_hw = 1.0 / float(HW)
    inv_c = 1.0 / float(C)

    x = x_ref[...].astype(jnp.float32)                       # (C, HW)

    # ---------------- channel attention ----------------
    # Global avg / max pool: one lane-reduce each over the (C, HW) tile.
    p_avg = jnp.sum(x, axis=1, keepdims=True) * inv_hw       # (C, 1)
    p_max = jnp.max(x, axis=1, keepdims=True)                # (C, 1)

    w1t = w1t_ref[...].astype(jnp.float32)                   # (C, CR) = fc1.weight^T
    w2 = w2_ref[...].astype(jnp.float32)                     # (C, CR) = fc2.weight

    # Shared 2-layer MLP (1x1 convs), fully vectorized:
    #   h = relu(fc1 @ pooled)      -> one sublane-reduce of (C,CR) to (1,CR)
    #   z = fc2 @ (h_avg + h_max)   -> one lane-reduce of (C,CR) to (C,1)
    # (fc2 is linear, so the avg/max branches are summed before fc2.)
    ha = jnp.maximum(jnp.sum(w1t * p_avg, axis=0, keepdims=True), 0.0)   # (1, CR)
    hm = jnp.maximum(jnp.sum(w1t * p_max, axis=0, keepdims=True), 0.0)   # (1, CR)
    z = jnp.sum(w2 * (ha + hm), axis=1, keepdims=True)                    # (C, 1)

    ca = 1.0 / (1.0 + jnp.exp(-z))                            # sigmoid, (C, 1)
    x1 = x * ca                                               # (C, HW), kept in f32

    # ---------------- spatial attention ----------------
    # Channel-wise mean / max maps in the flat lane-dense layout.
    sp_avg = jnp.sum(x1, axis=0, keepdims=True) * inv_c       # (1, HW)
    sp_max = jnp.max(x1, axis=0, keepdims=True)               # (1, HW)

    # Row / column indices of each flat position (no integer div/rem needed).
    pos = jax.lax.broadcasted_iota(jnp.int32, (1, HW), 1)
    row = jnp.zeros((1, HW), jnp.int32)
    for r in range(1, H):
        row = row + jnp.where(pos >= r * W, 1, 0).astype(jnp.int32)
    col = pos - row * W

    # Border-validity masks: rmask[di] depends only on the vertical offset
    # (applied at the destination), cmask[dj] only on the horizontal offset
    # (applied on the un-rolled source).
    rmasks = [jnp.where((pos >= (-di) * W) & (pos < (H - di) * W), 1.0, 0.0)
              for di in range(-P, P + 1)]
    cmasks = [jnp.where((col >= dj) & (col < W + dj), 1.0, 0.0)
              for dj in range(-P, P + 1)]

    # Column-shifted sources, shared across all row offsets (2*K rolls).
    src_a, src_m = [], []
    for jdx, dj in enumerate(range(-P, P + 1)):
        a = sp_avg * cmasks[jdx]
        m = sp_max * cmasks[jdx]
        sh = (-dj) % HW
        if sh:
            a = pltpu.roll(a, sh, axis=1)
            m = pltpu.roll(m, sh, axis=1)
        src_a.append(a)
        src_m.append(m)

    # Per-row partial sums, then one row roll each (K rolls).  Total rolls:
    # 3*K = 21 instead of the naive 2*K*K = 98.
    acc = jnp.zeros((1, HW), jnp.float32)
    for idx, di in enumerate(range(-P, P + 1)):
        t = jnp.zeros((1, HW), jnp.float32)
        for jdx in range(K):
            wa = wsa_ref[idx * K + jdx]                       # channel 0 (avg) weight
            wm = wsa_ref[K * K + idx * K + jdx]               # channel 1 (max) weight
            t = t + src_a[jdx] * wa + src_m[jdx] * wm
        sh = (-(di * W)) % HW
        if sh:
            t = pltpu.roll(t, sh, axis=1)
        acc = acc + rmasks[idx] * t

    sa = 1.0 / (1.0 + jnp.exp(-acc))                          # sigmoid, (1, HW)

    # Single fused lane-dense output store.
    o_ref[...] = (x1 * sa).astype(o_ref.dtype)


def cbam_block_pallas(x, w_fc1, w_fc2, w_sa):
    """x: (B, C, H, W); w_fc1: (C//r, C); w_fc2: (C, C//r); w_sa: (2, K, K)."""
    B, C, H, W = x.shape
    CR = w_fc1.shape[0]
    K = w_sa.shape[-1]
    P = (K - 1) // 2
    HW = H * W

    x_flat = x.reshape(B, C, HW)                  # lane-dense layout plumbing
    w1t = jnp.transpose(w_fc1)                    # (C, CR)
    w2 = w_fc2                                    # (C, CR)
    wsa_flat = w_sa.reshape(-1)                   # (2*K*K,) scalars in SMEM

    kernel = functools.partial(cbam_kernel, C=C, CR=CR, H=H, W=W, HW=HW, K=K, P=P)
    out_flat = pl.pallas_call(
        kernel,
        out_shape=jax.ShapeDtypeStruct((B, C, HW), x.dtype),
        grid=(B,),
        in_specs=[
            pl.BlockSpec((None, C, HW), lambda b: (b, 0, 0)),
            pl.BlockSpec((C, CR), lambda b: (0, 0)),
            pl.BlockSpec((C, CR), lambda b: (0, 0)),
            pl.BlockSpec(memory_space=pltpu.MemorySpace.SMEM),
        ],
        out_specs=pl.BlockSpec((None, C, HW), lambda b: (b, 0, 0)),
        compiler_params=pltpu.CompilerParams(
            dimension_semantics=("parallel",)),
    )(x_flat, w1t, w2, wsa_flat)
    return out_flat.reshape(B, C, H, W)


def cbam_reference(x, w_fc1, w_fc2, w_sa):
    """Plain-JAX reference mirroring the PyTorch module exactly (f32 math)."""
    B, C, H, W = x.shape
    avg = jnp.mean(x, axis=(2, 3))                # (B, C)
    mx = jnp.max(x, axis=(2, 3))                  # (B, C)

    def mlp(p):                                   # p: (B, C)
        h = jnp.maximum(jnp.sum(w_fc1[None, :, :] * p[:, None, :], axis=-1), 0.0)
        return jnp.sum(w_fc2[None, :, :] * h[:, None, :], axis=-1)

    ca = 1.0 / (1.0 + jnp.exp(-(mlp(avg) + mlp(mx))))          # (B, C)
    x1 = x * ca[:, :, None, None]

    sp_avg = jnp.mean(x1, axis=1)
    sp_max = jnp.max(x1, axis=1)
    sp = jnp.stack([sp_avg, sp_max], axis=1)                   # (B, 2, H, W)
    K = w_sa.shape[-1]
    P = (K - 1) // 2
    spp = jnp.pad(sp, ((0, 0), (0, 0), (P, P), (P, P)))
    sa = jnp.zeros((B, H, W), jnp.float32)
    for c in range(2):
        for ki in range(K):
            for kj in range(K):
                sa = sa + w_sa[c, ki, kj] * spp[:, c, ki:ki + H, kj:kj + W]
    sa = 1.0 / (1.0 + jnp.exp(-sa))
    return x1 * sa[:, None, :, :]


if __name__ == "__main__":
    B, C, H, W = 2, 16, 16, 16
    ratio, K = 8, 7
    CR = C // ratio

    key = jax.random.PRNGKey(0)
    kx, k1, k2, k3 = jax.random.split(key, 4)
    x = jax.random.normal(kx, (B, C, H, W), jnp.float32)
    # Synthetic weights matching the nn.Module parameter shapes:
    #   fc1.weight (C//r, C, 1, 1) -> (CR, C); fc2.weight (C, C//r, 1, 1) -> (C, CR)
    #   SpatialAttention conv1.weight (1, 2, 7, 7) -> (2, 7, 7)
    w_fc1 = 0.25 * jax.random.normal(k1, (CR, C), jnp.float32)
    w_fc2 = 0.25 * jax.random.normal(k2, (C, CR), jnp.float32)
    w_sa = 0.1 * jax.random.normal(k3, (2, K, K), jnp.float32)

    out = jax.block_until_ready(cbam_block_pallas(x, w_fc1, w_fc2, w_sa))

    ref = cbam_reference(x, w_fc1, w_fc2, w_sa)
    if not jnp.allclose(out, ref, atol=1e-4, rtol=1e-4):
        max_err = float(jnp.max(jnp.abs(out - ref)))
        raise RuntimeError(f"mismatch vs reference, max abs err = {max_err}")
    print("KERNEL_OK")
</pallas_src>

<mosaic_0001>
module attributes {stable_mosaic.version = 11 : i64} {
  func.func @cbam_kernel(%arg0: i32, %arg1: memref<1x16x256xf32, #tpu.memory_space<vmem>>, %arg2: memref<16x2xf32, #tpu.memory_space<vmem>>, %arg3: memref<16x2xf32, #tpu.memory_space<vmem>>, %arg4: memref<98xf32, #tpu.memory_space<smem>>, %arg5: memref<1x16x256xf32, #tpu.memory_space<vmem>>) attributes {dimension_semantics = [#tpu.dimension_semantics<parallel>], iteration_bounds = array<i64: 2>, scalar_prefetch = 0 : i64, scratch_operands = 0 : i64, tpu.core_type = #tpu.core_type<tc>, window_params = [{transform_indices = @transform_0, window_bounds = array<i64: 1, 16, 256>}, {pipeline_mode = #tpu.pipeline_mode<synchronous>, transform_indices = @transform_1, window_bounds = array<i64: 16, 2>}, {pipeline_mode = #tpu.pipeline_mode<synchronous>, transform_indices = @transform_2, window_bounds = array<i64: 16, 2>}, {transform_indices = @transform_3, window_bounds = array<i64: 98>}, {transform_indices = @transform_4, window_bounds = array<i64: 1, 16, 256>}]} {
    %c0 = arith.constant 0 : index
    %c0_0 = arith.constant 0 : index
    %c0_1 = arith.constant 0 : index
    %0 = vector.load %arg1[%c0, %c0_0, %c0_1] : memref<1x16x256xf32, #tpu.memory_space<vmem>>, vector<1x16x256xf32>
    %1 = vector.shape_cast %0 : vector<1x16x256xf32> to vector<16x256xf32>
    %cst = arith.constant dense<0.000000e+00> : vector<16xf32>
    %2 = vector.multi_reduction <add>, %1, %cst [1] : vector<16x256xf32> to vector<16xf32>
    %3 = vector.shape_cast %2 : vector<16xf32> to vector<16x1xf32>
    %cst_2 = arith.constant 3.906250e-03 : f32
    %4 = vector.broadcast %cst_2 : f32 to vector<16x1xf32>
    %5 = arith.mulf %3, %4 : vector<16x1xf32>
    %cst_3 = arith.constant dense<0xFF800000> : vector<16xf32>
    %6 = vector.multi_reduction <maximumf>, %1, %cst_3 [1] : vector<16x256xf32> to vector<16xf32>
    %7 = vector.shape_cast %6 : vector<16xf32> to vector<16x1xf32>
    %c0_4 = arith.constant 0 : index
    %c0_5 = arith.constant 0 : index
    %8 = vector.load %arg2[%c0_4, %c0_5] : memref<16x2xf32, #tpu.memory_space<vmem>>, vector<16x2xf32>
    %c0_6 = arith.constant 0 : index
    %c0_7 = arith.constant 0 : index
    %9 = vector.load %arg3[%c0_6, %c0_7] : memref<16x2xf32, #tpu.memory_space<vmem>>, vector<16x2xf32>
    %10 = vector.broadcast %5 : vector<16x1xf32> to vector<16x2xf32>
    %11 = arith.mulf %8, %10 : vector<16x2xf32>
    %cst_8 = arith.constant dense<0.000000e+00> : vector<2xf32>
    %12 = vector.multi_reduction <add>, %11, %cst_8 [0] : vector<16x2xf32> to vector<2xf32>
    %13 = vector.shape_cast %12 : vector<2xf32> to vector<1x2xf32>
    %cst_9 = arith.constant 0.000000e+00 : f32
    %14 = vector.broadcast %cst_9 : f32 to vector<1x2xf32>
    %15 = arith.maximumf %13, %14 : vector<1x2xf32>
    %16 = vector.broadcast %7 : vector<16x1xf32> to vector<16x2xf32>
    %17 = arith.mulf %8, %16 : vector<16x2xf32>
    %cst_10 = arith.constant dense<0.000000e+00> : vector<2xf32>
    %18 = vector.multi_reduction <add>, %17, %cst_10 [0] : vector<16x2xf32> to vector<2xf32>
    %19 = vector.shape_cast %18 : vector<2xf32> to vector<1x2xf32>
    %cst_11 = arith.constant 0.000000e+00 : f32
    %20 = vector.broadcast %cst_11 : f32 to vector<1x2xf32>
    %21 = arith.maximumf %19, %20 : vector<1x2xf32>
    %22 = arith.addf %15, %21 : vector<1x2xf32>
    %23 = vector.broadcast %22 : vector<1x2xf32> to vector<16x2xf32>
    %24 = arith.mulf %9, %23 : vector<16x2xf32>
    %cst_12 = arith.constant dense<0.000000e+00> : vector<16xf32>
    %25 = vector.multi_reduction <add>, %24, %cst_12 [1] : vector<16x2xf32> to vector<16xf32>
    %26 = vector.shape_cast %25 : vector<16xf32> to vector<16x1xf32>
    %cst_13 = arith.constant 0.000000e+00 : f32
    %27 = vector.broadcast %cst_13 : f32 to vector<16x1xf32>
    %28 = arith.subf %27, %26 : vector<16x1xf32>
    %29 = math.exp %28 : vector<16x1xf32>
    %cst_14 = arith.constant 1.000000e+00 : f32
    %30 = vector.broadcast %cst_14 : f32 to vector<16x1xf32>
    %31 = arith.addf %30, %29 : vector<16x1xf32>
    %cst_15 = arith.constant 1.000000e+00 : f32
    %32 = vector.broadcast %cst_15 : f32 to vector<16x1xf32>
    %33 = arith.divf %32, %31 : vector<16x1xf32>
    %34 = vector.broadcast %33 : vector<16x1xf32> to vector<16x256xf32>
    %35 = arith.mulf %1, %34 : vector<16x256xf32>
    %cst_16 = arith.constant dense<0.000000e+00> : vector<256xf32>
    %36 = vector.multi_reduction <add>, %35, %cst_16 [0] : vector<16x256xf32> to vector<256xf32>
    %37 = vector.shape_cast %36 : vector<256xf32> to vector<1x256xf32>
    %cst_17 = arith.constant 6.250000e-02 : f32
    %38 = vector.broadcast %cst_17 : f32 to vector<1x256xf32>
    %39 = arith.mulf %37, %38 : vector<1x256xf32>
    %cst_18 = arith.constant dense<0xFF800000> : vector<256xf32>
    %40 = vector.multi_reduction <maximumf>, %35, %cst_18 [0] : vector<16x256xf32> to vector<256xf32>
    %41 = vector.shape_cast %40 : vector<256xf32> to vector<1x256xf32>
    %42 = tpu.iota {dimensions = array<i32: 1>} : vector<1x256xi32>
    %c0_i32 = arith.constant 0 : i32
    %43 = vector.broadcast %c0_i32 : i32 to vector<1x256xi32>
    %c16_i32 = arith.constant 16 : i32
    %44 = vector.broadcast %c16_i32 : i32 to vector<1x256xi32>
    %45 = arith.cmpi sge, %42, %44 : vector<1x256xi32>
    %c1_i32 = arith.constant 1 : i32
    %c0_i32_19 = arith.constant 0 : i32
    %46 = vector.broadcast %c1_i32 : i32 to vector<1x256xi32>
    %47 = vector.broadcast %c0_i32_19 : i32 to vector<1x256xi32>
    %48 = arith.select %45, %46, %47 : vector<1x256xi1>, vector<1x256xi32>
    %49 = arith.addi %43, %48 : vector<1x256xi32>
    %c32_i32 = arith.constant 32 : i32
    %50 = vector.broadcast %c32_i32 : i32 to vector<1x256xi32>
    %51 = arith.cmpi sge, %42, %50 : vector<1x256xi32>
    %c1_i32_20 = arith.constant 1 : i32
    %c0_i32_21 = arith.constant 0 : i32
    %52 = vector.broadcast %c1_i32_20 : i32 to vector<1x256xi32>
    %53 = vector.broadcast %c0_i32_21 : i32 to vector<1x256xi32>
    %54 = arith.select %51, %52, %53 : vector<1x256xi1>, vector<1x256xi32>
    %55 = arith.addi %49, %54 : vector<1x256xi32>
    %c48_i32 = arith.constant 48 : i32
    %56 = vector.broadcast %c48_i32 : i32 to vector<1x256xi32>
    %57 = arith.cmpi sge, %42, %56 : vector<1x256xi32>
    %c1_i32_22 = arith.constant 1 : i32
    %c0_i32_23 = arith.constant 0 : i32
    %58 = vector.broadcast %c1_i32_22 : i32 to vector<1x256xi32>
    %59 = vector.broadcast %c0_i32_23 : i32 to vector<1x256xi32>
    %60 = arith.select %57, %58, %59 : vector<1x256xi1>, vector<1x256xi32>
    %61 = arith.addi %55, %60 : vector<1x256xi32>
    %c64_i32 = arith.constant 64 : i32
    %62 = vector.broadcast %c64_i32 : i32 to vector<1x256xi32>
    %63 = arith.cmpi sge, %42, %62 : vector<1x256xi32>
    %c1_i32_24 = arith.constant 1 : i32
    %c0_i32_25 = arith.constant 0 : i32
    %64 = vector.broadcast %c1_i32_24 : i32 to vector<1x256xi32>
    %65 = vector.broadcast %c0_i32_25 : i32 to vector<1x256xi32>
    %66 = arith.select %63, %64, %65 : vector<1x256xi1>, vector<1x256xi32>
    %67 = arith.addi %61, %66 : vector<1x256xi32>
    %c80_i32 = arith.constant 80 : i32
    %68 = vector.broadcast %c80_i32 : i32 to vector<1x256xi32>
    %69 = arith.cmpi sge, %42, %68 : vector<1x256xi32>
    %c1_i32_26 = arith.constant 1 : i32
    %c0_i32_27 = arith.constant 0 : i32
    %70 = vector.broadcast %c1_i32_26 : i32 to vector<1x256xi32>
    %71 = vector.broadcast %c0_i32_27 : i32 to vector<1x256xi32>
    %72 = arith.select %69, %70, %71 : vector<1x256xi1>, vector<1x256xi32>
    %73 = arith.addi %67, %72 : vector<1x256xi32>
    %c96_i32 = arith.constant 96 : i32
    %74 = vector.broadcast %c96_i32 : i32 to vector<1x256xi32>
    %75 = arith.cmpi sge, %42, %74 : vector<1x256xi32>
    %c1_i32_28 = arith.constant 1 : i32
    %c0_i32_29 = arith.constant 0 : i32
    %76 = vector.broadcast %c1_i32_28 : i32 to vector<1x256xi32>
    %77 = vector.broadcast %c0_i32_29 : i32 to vector<1x256xi32>
    %78 = arith.select %75, %76, %77 : vector<1x256xi1>, vector<1x256xi32>
    %79 = arith.addi %73, %78 : vector<1x256xi32>
    %c112_i32 = arith.constant 112 : i32
    %80 = vector.broadcast %c112_i32 : i32 to vector<1x256xi32>
    %81 = arith.cmpi sge, %42, %80 : vector<1x256xi32>
    %c1_i32_30 = arith.constant 1 : i32
    %c0_i32_31 = arith.constant 0 : i32
    %82 = vector.broadcast %c1_i32_30 : i32 to vector<1x256xi32>
    %83 = vector.broadcast %c0_i32_31 : i32 to vector<1x256xi32>
    %84 = arith.select %81, %82, %83 : vector<1x256xi1>, vector<1x256xi32>
    %85 = arith.addi %79, %84 : vector<1x256xi32>
    %c128_i32 = arith.constant 128 : i32
    %86 = vector.broadcast %c128_i32 : i32 to vector<1x256xi32>
    %87 = arith.cmpi sge, %42, %86 : vector<1x256xi32>
    %c1_i32_32 = arith.constant 1 : i32
    %c0_i32_33 = arith.constant 0 : i32
    %88 = vector.broadcast %c1_i32_32 : i32 to vector<1x256xi32>
    %89 = vector.broadcast %c0_i32_33 : i32 to vector<1x256xi32>
    %90 = arith.select %87, %88, %89 : vector<1x256xi1>, vector<1x256xi32>
    %91 = arith.addi %85, %90 : vector<1x256xi32>
    %c144_i32 = arith.constant 144 : i32
    %92 = vector.broadcast %c144_i32 : i32 to vector<1x256xi32>
    %93 = arith.cmpi sge, %42, %92 : vector<1x256xi32>
    %c1_i32_34 = arith.constant 1 : i32
    %c0_i32_35 = arith.constant 0 : i32
    %94 = vector.broadcast %c1_i32_34 : i32 to vector<1x256xi32>
    %95 = vector.broadcast %c0_i32_35 : i32 to vector<1x256xi32>
    %96 = arith.select %93, %94, %95 : vector<1x256xi1>, vector<1x256xi32>
    %97 = arith.addi %91, %96 : vector<1x256xi32>
    %c160_i32 = arith.constant 160 : i32
    %98 = vector.broadcast %c160_i32 : i32 to vector<1x256xi32>
    %99 = arith.cmpi sge, %42, %98 : vector<1x256xi32>
    %c1_i32_36 = arith.constant 1 : i32
    %c0_i32_37 = arith.constant 0 : i32
    %100 = vector.broadcast %c1_i32_36 : i32 to vector<1x256xi32>
    %101 = vector.broadcast %c0_i32_37 : i32 to vector<1x256xi32>
    %102 = arith.select %99, %100, %101 : vector<1x256xi1>, vector<1x256xi32>
    %103 = arith.addi %97, %102 : vector<1x256xi32>
    %c176_i32 = arith.constant 176 : i32
    %104 = vector.broadcast %c176_i32 : i32 to vector<1x256xi32>
    %105 = arith.cmpi sge, %42, %104 : vector<1x256xi32>
    %c1_i32_38 = arith.constant 1 : i32
    %c0_i32_39 = arith.constant 0 : i32
    %106 = vector.broadcast %c1_i32_38 : i32 to vector<1x256xi32>
    %107 = vector.broadcast %c0_i32_39 : i32 to vector<1x256xi32>
    %108 = arith.select %105, %106, %107 : vector<1x256xi1>, vector<1x256xi32>
    %109 = arith.addi %103, %108 : vector<1x256xi32>
    %c192_i32 = arith.constant 192 : i32
    %110 = vector.broadcast %c192_i32 : i32 to vector<1x256xi32>
    %111 = arith.cmpi sge, %42, %110 : vector<1x256xi32>
    %c1_i32_40 = arith.constant 1 : i32
    %c0_i32_41 = arith.constant 0 : i32
    %112 = vector.broadcast %c1_i32_40 : i32 to vector<1x256xi32>
    %113 = vector.broadcast %c0_i32_41 : i32 to vector<1x256xi32>
    %114 = arith.select %111, %112, %113 : vector<1x256xi1>, vector<1x256xi32>
    %115 = arith.addi %109, %114 : vector<1x256xi32>
    %c208_i32 = arith.constant 208 : i32
    %116 = vector.broadcast %c208_i32 : i32 to vector<1x256xi32>
    %117 = arith.cmpi sge, %42, %116 : vector<1x256xi32>
    %c1_i32_42 = arith.constant 1 : i32
    %c0_i32_43 = arith.constant 0 : i32
    %118 = vector.broadcast %c1_i32_42 : i32 to vector<1x256xi32>
    %119 = vector.broadcast %c0_i32_43 : i32 to vector<1x256xi32>
    %120 = arith.select %117, %118, %119 : vector<1x256xi1>, vector<1x256xi32>
    %121 = arith.addi %115, %120 : vector<1x256xi32>
    %c224_i32 = arith.constant 224 : i32
    %122 = vector.broadcast %c224_i32 : i32 to vector<1x256xi32>
    %123 = arith.cmpi sge, %42, %122 : vector<1x256xi32>
    %c1_i32_44 = arith.constant 1 : i32
    %c0_i32_45 = arith.constant 0 : i32
    %124 = vector.broadcast %c1_i32_44 : i32 to vector<1x256xi32>
    %125 = vector.broadcast %c0_i32_45 : i32 to vector<1x256xi32>
    %126 = arith.select %123, %124, %125 : vector<1x256xi1>, vector<1x256xi32>
    %127 = arith.addi %121, %126 : vector<1x256xi32>
    %c240_i32 = arith.constant 240 : i32
    %128 = vector.broadcast %c240_i32 : i32 to vector<1x256xi32>
    %129 = arith.cmpi sge, %42, %128 : vector<1x256xi32>
    %c1_i32_46 = arith.constant 1 : i32
    %c0_i32_47 = arith.constant 0 : i32
    %130 = vector.broadcast %c1_i32_46 : i32 to vector<1x256xi32>
    %131 = vector.broadcast %c0_i32_47 : i32 to vector<1x256xi32>
    %132 = arith.select %129, %130, %131 : vector<1x256xi1>, vector<1x256xi32>
    %133 = arith.addi %127, %132 : vector<1x256xi32>
    %c16_i32_48 = arith.constant 16 : i32
    %134 = vector.broadcast %c16_i32_48 : i32 to vector<1x256xi32>
    %135 = arith.muli %133, %134 : vector<1x256xi32>
    %136 = arith.subi %42, %135 : vector<1x256xi32>
    %c48_i32_49 = arith.constant 48 : i32
    %137 = vector.broadcast %c48_i32_49 : i32 to vector<1x256xi32>
    %138 = arith.cmpi sge, %42, %137 : vector<1x256xi32>
    %c304_i32 = arith.constant 304 : i32
    %139 = vector.broadcast %c304_i32 : i32 to vector<1x256xi32>
    %140 = arith.cmpi slt, %42, %139 : vector<1x256xi32>
    %141 = arith.andi %138, %140 : vector<1x256xi1>
    %cst_50 = arith.constant 1.000000e+00 : f32
    %cst_51 = arith.constant 0.000000e+00 : f32
    %142 = vector.broadcast %cst_50 : f32 to vector<1x256xf32>
    %143 = vector.broadcast %cst_51 : f32 to vector<1x256xf32>
    %144 = arith.select %141, %142, %143 : vector<1x256xi1>, vector<1x256xf32>
    %c32_i32_52 = arith.constant 32 : i32
    %145 = vector.broadcast %c32_i32_52 : i32 to vector<1x256xi32>
    %146 = arith.cmpi sge, %42, %145 : vector<1x256xi32>
    %c288_i32 = arith.constant 288 : i32
    %147 = vector.broadcast %c288_i32 : i32 to vector<1x256xi32>
    %148 = arith.cmpi slt, %42, %147 : vector<1x256xi32>
    %149 = arith.andi %146, %148 : vector<1x256xi1>
    %cst_53 = arith.constant 1.000000e+00 : f32
    %cst_54 = arith.constant 0.000000e+00 : f32
    %150 = vector.broadcast %cst_53 : f32 to vector<1x256xf32>
    %151 = vector.broadcast %cst_54 : f32 to vector<1x256xf32>
    %152 = arith.select %149, %150, %151 : vector<1x256xi1>, vector<1x256xf32>
    %c16_i32_55 = arith.constant 16 : i32
    %153 = vector.broadcast %c16_i32_55 : i32 to vector<1x256xi32>
    %154 = arith.cmpi sge, %42, %153 : vector<1x256xi32>
    %c272_i32 = arith.constant 272 : i32
    %155 = vector.broadcast %c272_i32 : i32 to vector<1x256xi32>
    %156 = arith.cmpi slt, %42, %155 : vector<1x256xi32>
    %157 = arith.andi %154, %156 : vector<1x256xi1>
    %cst_56 = arith.constant 1.000000e+00 : f32
    %cst_57 = arith.constant 0.000000e+00 : f32
    %158 = vector.broadcast %cst_56 : f32 to vector<1x256xf32>
    %159 = vector.broadcast %cst_57 : f32 to vector<1x256xf32>
    %160 = arith.select %157, %158, %159 : vector<1x256xi1>, vector<1x256xf32>
    %c0_i32_58 = arith.constant 0 : i32
    %161 = vector.broadcast %c0_i32_58 : i32 to vector<1x256xi32>
    %162 = arith.cmpi sge, %42, %161 : vector<1x256xi32>
    %c256_i32 = arith.constant 256 : i32
    %163 = vector.broadcast %c256_i32 : i32 to vector<1x256xi32>
    %164 = arith.cmpi slt, %42, %163 : vector<1x256xi32>
    %165 = arith.andi %162, %164 : vector<1x256xi1>
    %cst_59 = arith.constant 1.000000e+00 : f32
    %cst_60 = arith.constant 0.000000e+00 : f32
    %166 = vector.broadcast %cst_59 : f32 to vector<1x256xf32>
    %167 = vector.broadcast %cst_60 : f32 to vector<1x256xf32>
    %168 = arith.select %165, %166, %167 : vector<1x256xi1>, vector<1x256xf32>
    %c-16_i32 = arith.constant -16 : i32
    %169 = vector.broadcast %c-16_i32 : i32 to vector<1x256xi32>
    %170 = arith.cmpi sge, %42, %169 : vector<1x256xi32>
    %c240_i32_61 = arith.constant 240 : i32
    %171 = vector.broadcast %c240_i32_61 : i32 to vector<1x256xi32>
    %172 = arith.cmpi slt, %42, %171 : vector<1x256xi32>
    %173 = arith.andi %170, %172 : vector<1x256xi1>
    %cst_62 = arith.constant 1.000000e+00 : f32
    %cst_63 = arith.constant 0.000000e+00 : f32
    %174 = vector.broadcast %cst_62 : f32 to vector<1x256xf32>
    %175 = vector.broadcast %cst_63 : f32 to vector<1x256xf32>
    %176 = arith.select %173, %174, %175 : vector<1x256xi1>, vector<1x256xf32>
    %c-32_i32 = arith.constant -32 : i32
    %177 = vector.broadcast %c-32_i32 : i32 to vector<1x256xi32>
    %178 = arith.cmpi sge, %42, %177 : vector<1x256xi32>
    %c224_i32_64 = arith.constant 224 : i32
    %179 = vector.broadcast %c224_i32_64 : i32 to vector<1x256xi32>
    %180 = arith.cmpi slt, %42, %179 : vector<1x256xi32>
    %181 = arith.andi %178, %180 : vector<1x256xi1>
    %cst_65 = arith.constant 1.000000e+00 : f32
    %cst_66 = arith.constant 0.000000e+00 : f32
    %182 = vector.broadcast %cst_65 : f32 to vector<1x256xf32>
    %183 = vector.broadcast %cst_66 : f32 to vector<1x256xf32>
    %184 = arith.select %181, %182, %183 : vector<1x256xi1>, vector<1x256xf32>
    %c-48_i32 = arith.constant -48 : i32
    %185 = vector.broadcast %c-48_i32 : i32 to vector<1x256xi32>
    %186 = arith.cmpi sge, %42, %185 : vector<1x256xi32>
    %c208_i32_67 = arith.constant 208 : i32
    %187 = vector.broadcast %c208_i32_67 : i32 to vector<1x256xi32>
    %188 = arith.cmpi slt, %42, %187 : vector<1x256xi32>
    %189 = arith.andi %186, %188 : vector<1x256xi1>
    %cst_68 = arith.constant 1.000000e+00 : f32
    %cst_69 = arith.constant 0.000000e+00 : f32
    %190 = vector.broadcast %cst_68 : f32 to vector<1x256xf32>
    %191 = vector.broadcast %cst_69 : f32 to vector<1x256xf32>
    %192 = arith.select %189, %190, %191 : vector<1x256xi1>, vector<1x256xf32>
    %c-3_i32 = arith.constant -3 : i32
    %193 = vector.broadcast %c-3_i32 : i32 to vector<1x256xi32>
    %194 = arith.cmpi sge, %136, %193 : vector<1x256xi32>
    %c13_i32 = arith.constant 13 : i32
    %195 = vector.broadcast %c13_i32 : i32 to vector<1x256xi32>
    %196 = arith.cmpi slt, %136, %195 : vector<1x256xi32>
    %197 = arith.andi %194, %196 : vector<1x256xi1>
    %cst_70 = arith.constant 1.000000e+00 : f32
    %cst_71 = arith.constant 0.000000e+00 : f32
    %198 = vector.broadcast %cst_70 : f32 to vector<1x256xf32>
    %199 = vector.broadcast %cst_71 : f32 to vector<1x256xf32>
    %200 = arith.select %197, %198, %199 : vector<1x256xi1>, vector<1x256xf32>
    %c-2_i32 = arith.constant -2 : i32
    %201 = vector.broadcast %c-2_i32 : i32 to vector<1x256xi32>
    %202 = arith.cmpi sge, %136, %201 : vector<1x256xi32>
    %c14_i32 = arith.constant 14 : i32
    %203 = vector.broadcast %c14_i32 : i32 to vector<1x256xi32>
    %204 = arith.cmpi slt, %136, %203 : vector<1x256xi32>
    %205 = arith.andi %202, %204 : vector<1x256xi1>
    %cst_72 = arith.constant 1.000000e+00 : f32
    %cst_73 = arith.constant 0.000000e+00 : f32
    %206 = vector.broadcast %cst_72 : f32 to vector<1x256xf32>
    %207 = vector.broadcast %cst_73 : f32 to vector<1x256xf32>
    %208 = arith.select %205, %206, %207 : vector<1x256xi1>, vector<1x256xf32>
    %c-1_i32 = arith.constant -1 : i32
    %209 = vector.broadcast %c-1_i32 : i32 to vector<1x256xi32>
    %210 = arith.cmpi sge, %136, %209 : vector<1x256xi32>
    %c15_i32 = arith.constant 15 : i32
    %211 = vector.broadcast %c15_i32 : i32 to vector<1x256xi32>
    %212 = arith.cmpi slt, %136, %211 : vector<1x256xi32>
    %213 = arith.andi %210, %212 : vector<1x256xi1>
    %cst_74 = arith.constant 1.000000e+00 : f32
    %cst_75 = arith.constant 0.000000e+00 : f32
    %214 = vector.broadcast %cst_74 : f32 to vector<1x256xf32>
    %215 = vector.broadcast %cst_75 : f32 to vector<1x256xf32>
    %216 = arith.select %213, %214, %215 : vector<1x256xi1>, vector<1x256xf32>
    %c0_i32_76 = arith.constant 0 : i32
    %217 = vector.broadcast %c0_i32_76 : i32 to vector<1x256xi32>
    %218 = arith.cmpi sge, %136, %217 : vector<1x256xi32>
    %c16_i32_77 = arith.constant 16 : i32
    %219 = vector.broadcast %c16_i32_77 : i32 to vector<1x256xi32>
    %220 = arith.cmpi slt, %136, %219 : vector<1x256xi32>
    %221 = arith.andi %218, %220 : vector<1x256xi1>
    %cst_78 = arith.constant 1.000000e+00 : f32
    %cst_79 = arith.constant 0.000000e+00 : f32
    %222 = vector.broadcast %cst_78 : f32 to vector<1x256xf32>
    %223 = vector.broadcast %cst_79 : f32 to vector<1x256xf32>
    %224 = arith.select %221, %222, %223 : vector<1x256xi1>, vector<1x256xf32>
    %c1_i32_80 = arith.constant 1 : i32
    %225 = vector.broadcast %c1_i32_80 : i32 to vector<1x256xi32>
    %226 = arith.cmpi sge, %136, %225 : vector<1x256xi32>
    %c17_i32 = arith.constant 17 : i32
    %227 = vector.broadcast %c17_i32 : i32 to vector<1x256xi32>
    %228 = arith.cmpi slt, %136, %227 : vector<1x256xi32>
    %229 = arith.andi %226, %228 : vector<1x256xi1>
    %cst_81 = arith.constant 1.000000e+00 : f32
    %cst_82 = arith.constant 0.000000e+00 : f32
    %230 = vector.broadcast %cst_81 : f32 to vector<1x256xf32>
    %231 = vector.broadcast %cst_82 : f32 to vector<1x256xf32>
    %232 = arith.select %229, %230, %231 : vector<1x256xi1>, vector<1x256xf32>
    %c2_i32 = arith.constant 2 : i32
    %233 = vector.broadcast %c2_i32 : i32 to vector<1x256xi32>
    %234 = arith.cmpi sge, %136, %233 : vector<1x256xi32>
    %c18_i32 = arith.constant 18 : i32
    %235 = vector.broadcast %c18_i32 : i32 to vector<1x256xi32>
    %236 = arith.cmpi slt, %136, %235 : vector<1x256xi32>
    %237 = arith.andi %234, %236 : vector<1x256xi1>
    %cst_83 = arith.constant 1.000000e+00 : f32
    %cst_84 = arith.constant 0.000000e+00 : f32
    %238 = vector.broadcast %cst_83 : f32 to vector<1x256xf32>
    %239 = vector.broadcast %cst_84 : f32 to vector<1x256xf32>
    %240 = arith.select %237, %238, %239 : vector<1x256xi1>, vector<1x256xf32>
    %c3_i32 = arith.constant 3 : i32
    %241 = vector.broadcast %c3_i32 : i32 to vector<1x256xi32>
    %242 = arith.cmpi sge, %136, %241 : vector<1x256xi32>
    %c19_i32 = arith.constant 19 : i32
    %243 = vector.broadcast %c19_i32 : i32 to vector<1x256xi32>
    %244 = arith.cmpi slt, %136, %243 : vector<1x256xi32>
    %245 = arith.andi %242, %244 : vector<1x256xi1>
    %cst_85 = arith.constant 1.000000e+00 : f32
    %cst_86 = arith.constant 0.000000e+00 : f32
    %246 = vector.broadcast %cst_85 : f32 to vector<1x256xf32>
    %247 = vector.broadcast %cst_86 : f32 to vector<1x256xf32>
    %248 = arith.select %245, %246, %247 : vector<1x256xi1>, vector<1x256xf32>
    %249 = arith.mulf %39, %200 : vector<1x256xf32>
    %250 = arith.mulf %41, %200 : vector<1x256xf32>
    %c3_i32_87 = arith.constant 3 : i32
    %251 = tpu.dynamic_rotate %249 by %c3_i32_87 dim 1 : vector<1x256xf32>, i32 -> vector<1x256xf32>
    %c3_i32_88 = arith.constant 3 : i32
    %252 = tpu.dynamic_rotate %250 by %c3_i32_88 dim 1 : vector<1x256xf32>, i32 -> vector<1x256xf32>
    %253 = arith.mulf %39, %208 : vector<1x256xf32>
    %254 = arith.mulf %41, %208 : vector<1x256xf32>
    %c2_i32_89 = arith.constant 2 : i32
    %255 = tpu.dynamic_rotate %253 by %c2_i32_89 dim 1 : vector<1x256xf32>, i32 -> vector<1x256xf32>
    %c2_i32_90 = arith.constant 2 : i32
    %256 = tpu.dynamic_rotate %254 by %c2_i32_90 dim 1 : vector<1x256xf32>, i32 -> vector<1x256xf32>
    %257 = arith.mulf %39, %216 : vector<1x256xf32>
    %258 = arith.mulf %41, %216 : vector<1x256xf32>
    %c1_i32_91 = arith.constant 1 : i32
    %259 = tpu.dynamic_rotate %257 by %c1_i32_91 dim 1 : vector<1x256xf32>, i32 -> vector<1x256xf32>
    %c1_i32_92 = arith.constant 1 : i32
    %260 = tpu.dynamic_rotate %258 by %c1_i32_92 dim 1 : vector<1x256xf32>, i32 -> vector<1x256xf32>
    %261 = arith.mulf %39, %224 : vector<1x256xf32>
    %262 = arith.mulf %41, %224 : vector<1x256xf32>
    %263 = arith.mulf %39, %232 : vector<1x256xf32>
    %264 = arith.mulf %41, %232 : vector<1x256xf32>
    %c255_i32 = arith.constant 255 : i32
    %265 = tpu.dynamic_rotate %263 by %c255_i32 dim 1 : vector<1x256xf32>, i32 -> vector<1x256xf32>
    %c255_i32_93 = arith.constant 255 : i32
    %266 = tpu.dynamic_rotate %264 by %c255_i32_93 dim 1 : vector<1x256xf32>, i32 -> vector<1x256xf32>
    %267 = arith.mulf %39, %240 : vector<1x256xf32>
    %268 = arith.mulf %41, %240 : vector<1x256xf32>
    %c254_i32 = arith.constant 254 : i32
    %269 = tpu.dynamic_rotate %267 by %c254_i32 dim 1 : vector<1x256xf32>, i32 -> vector<1x256xf32>
    %c254_i32_94 = arith.constant 254 : i32
    %270 = tpu.dynamic_rotate %268 by %c254_i32_94 dim 1 : vector<1x256xf32>, i32 -> vector<1x256xf32>
    %271 = arith.mulf %39, %248 : vector<1x256xf32>
    %272 = arith.mulf %41, %248 : vector<1x256xf32>
    %c253_i32 = arith.constant 253 : i32
    %273 = tpu.dynamic_rotate %271 by %c253_i32 dim 1 : vector<1x256xf32>, i32 -> vector<1x256xf32>
    %c253_i32_95 = arith.constant 253 : i32
    %274 = tpu.dynamic_rotate %272 by %c253_i32_95 dim 1 : vector<1x256xf32>, i32 -> vector<1x256xf32>
    %cst_96 = arith.constant 0.000000e+00 : f32
    %275 = vector.broadcast %cst_96 : f32 to vector<1x256xf32>
    %cst_97 = arith.constant 0.000000e+00 : f32
    %276 = vector.broadcast %cst_97 : f32 to vector<1x256xf32>
    %c0_98 = arith.constant 0 : index
    %277 = memref.load %arg4[%c0_98] : memref<98xf32, #tpu.memory_space<smem>>
    %c49 = arith.constant 49 : index
    %278 = memref.load %arg4[%c49] : memref<98xf32, #tpu.memory_space<smem>>
    %279 = vector.broadcast %277 : f32 to vector<1x256xf32>
    %280 = arith.mulf %251, %279 : vector<1x256xf32>
    %281 = arith.addf %276, %280 : vector<1x256xf32>
    %282 = vector.broadcast %278 : f32 to vector<1x256xf32>
    %283 = arith.mulf %252, %282 : vector<1x256xf32>
    %284 = arith.addf %281, %283 : vector<1x256xf32>
    %c1 = arith.constant 1 : index
    %285 = memref.load %arg4[%c1] : memref<98xf32, #tpu.memory_space<smem>>
    %c50 = arith.constant 50 : index
    %286 = memref.load %arg4[%c50] : memref<98xf32, #tpu.memory_space<smem>>
    %287 = vector.broadcast %285 : f32 to vector<1x256xf32>
    %288 = arith.mulf %255, %287 : vector<1x256xf32>
    %289 = arith.addf %284, %288 : vector<1x256xf32>
    %290 = vector.broadcast %286 : f32 to vector<1x256xf32>
    %291 = arith.mulf %256, %290 : vector<1x256xf32>
    %292 = arith.addf %289, %291 : vector<1x256xf32>
    %c2 = arith.constant 2 : index
    %293 = memref.load %arg4[%c2] : memref<98xf32, #tpu.memory_space<smem>>
    %c51 = arith.constant 51 : index
    %294 = memref.load %arg4[%c51] : memref<98xf32, #tpu.memory_space<smem>>
    %295 = vector.broadcast %293 : f32 to vector<1x256xf32>
    %296 = arith.mulf %259, %295 : vector<1x256xf32>
    %297 = arith.addf %292, %296 : vector<1x256xf32>
    %298 = vector.broadcast %294 : f32 to vector<1x256xf32>
    %299 = arith.mulf %260, %298 : vector<1x256xf32>
    %300 = arith.addf %297, %299 : vector<1x256xf32>
    %c3 = arith.constant 3 : index
    %301 = memref.load %arg4[%c3] : memref<98xf32, #tpu.memory_space<smem>>
    %c52 = arith.constant 52 : index
    %302 = memref.load %arg4[%c52] : memref<98xf32, #tpu.memory_space<smem>>
    %303 = vector.broadcast %301 : f32 to vector<1x256xf32>
    %304 = arith.mulf %261, %303 : vector<1x256xf32>
    %305 = arith.addf %300, %304 : vector<1x256xf32>
    %306 = vector.broadcast %302 : f32 to vector<1x256xf32>
    %307 = arith.mulf %262, %306 : vector<1x256xf32>
    %308 = arith.addf %305, %307 : vector<1x256xf32>
    %c4 = arith.constant 4 : index
    %309 = memref.load %arg4[%c4] : memref<98xf32, #tpu.memory_space<smem>>
    %c53 = arith.constant 53 : index
    %310 = memref.load %arg4[%c53] : memref<98xf32, #tpu.memory_space<smem>>
    %311 = vector.broadcast %309 : f32 to vector<1x256xf32>
    %312 = arith.mulf %265, %311 : vector<1x256xf32>
    %313 = arith.addf %308, %312 : vector<1x256xf32>
    %314 = vector.broadcast %310 : f32 to vector<1x256xf32>
    %315 = arith.mulf %266, %314 : vector<1x256xf32>
    %316 = arith.addf %313, %315 : vector<1x256xf32>
    %c5 = arith.constant 5 : index
    %317 = memref.load %arg4[%c5] : memref<98xf32, #tpu.memory_space<smem>>
    %c54 = arith.constant 54 : index
    %318 = memref.load %arg4[%c54] : memref<98xf32, #tpu.memory_space<smem>>
    %319 = vector.broadcast %317 : f32 to vector<1x256xf32>
    %320 = arith.mulf %269, %319 : vector<1x256xf32>
    %321 = arith.addf %316, %320 : vector<1x256xf32>
    %322 = vector.broadcast %318 : f32 to vector<1x256xf32>
    %323 = arith.mulf %270, %322 : vector<1x256xf32>
    %324 = arith.addf %321, %323 : vector<1x256xf32>
    %c6 = arith.constant 6 : index
    %325 = memref.load %arg4[%c6] : memref<98xf32, #tpu.memory_space<smem>>
    %c55 = arith.constant 55 : index
    %326 = memref.load %arg4[%c55] : memref<98xf32, #tpu.memory_space<smem>>
    %327 = vector.broadcast %325 : f32 to vector<1x256xf32>
    %328 = arith.mulf %273, %327 : vector<1x256xf32>
    %329 = arith.addf %324, %328 : vector<1x256xf32>
    %330 = vector.broadcast %326 : f32 to vector<1x256xf32>
    %331 = arith.mulf %274, %330 : vector<1x256xf32>
    %332 = arith.addf %329, %331 : vector<1x256xf32>
    %c48_i32_99 = arith.constant 48 : i32
    %333 = tpu.dynamic_rotate %332 by %c48_i32_99 dim 1 : vector<1x256xf32>, i32 -> vector<1x256xf32>
    %334 = arith.mulf %144, %333 : vector<1x256xf32>
    %335 = arith.addf %275, %334 : vector<1x256xf32>
    %cst_100 = arith.constant 0.000000e+00 : f32
    %336 = vector.broadcast %cst_100 : f32 to vector<1x256xf32>
    %c7 = arith.constant 7 : index
    %337 = memref.load %arg4[%c7] : memref<98xf32, #tpu.memory_space<smem>>
    %c56 = arith.constant 56 : index
    %338 = memref.load %arg4[%c56] : memref<98xf32, #tpu.memory_space<smem>>
    %339 = vector.broadcast %337 : f32 to vector<1x256xf32>
    %340 = arith.mulf %251, %339 : vector<1x256xf32>
    %341 = arith.addf %336, %340 : vector<1x256xf32>
    %342 = vector.broadcast %338 : f32 to vector<1x256xf32>
    %343 = arith.mulf %252, %342 : vector<1x256xf32>
    %344 = arith.addf %341, %343 : vector<1x256xf32>
    %c8 = arith.constant 8 : index
    %345 = memref.load %arg4[%c8] : memref<98xf32, #tpu.memory_space<smem>>
    %c57 = arith.constant 57 : index
    %346 = memref.load %arg4[%c57] : memref<98xf32, #tpu.memory_space<smem>>
    %347 = vector.broadcast %345 : f32 to vector<1x256xf32>
    %348 = arith.mulf %255, %347 : vector<1x256xf32>
    %349 = arith.addf %344, %348 : vector<1x256xf32>
    %350 = vector.broadcast %346 : f32 to vector<1x256xf32>
    %351 = arith.mulf %256, %350 : vector<1x256xf32>
    %352 = arith.addf %349, %351 : vector<1x256xf32>
    %c9 = arith.constant 9 : index
    %353 = memref.load %arg4[%c9] : memref<98xf32, #tpu.memory_space<smem>>
    %c58 = arith.constant 58 : index
    %354 = memref.load %arg4[%c58] : memref<98xf32, #tpu.memory_space<smem>>
    %355 = vector.broadcast %353 : f32 to vector<1x256xf32>
    %356 = arith.mulf %259, %355 : vector<1x256xf32>
    %357 = arith.addf %352, %356 : vector<1x256xf32>
    %358 = vector.broadcast %354 : f32 to vector<1x256xf32>
    %359 = arith.mulf %260, %358 : vector<1x256xf32>
    %360 = arith.addf %357, %359 : vector<1x256xf32>
    %c10 = arith.constant 10 : index
    %361 = memref.load %arg4[%c10] : memref<98xf32, #tpu.memory_space<smem>>
    %c59 = arith.constant 59 : index
    %362 = memref.load %arg4[%c59] : memref<98xf32, #tpu.memory_space<smem>>
    %363 = vector.broadcast %361 : f32 to vector<1x256xf32>
    %364 = arith.mulf %261, %363 : vector<1x256xf32>
    %365 = arith.addf %360, %364 : vector<1x256xf32>
    %366 = vector.broadcast %362 : f32 to vector<1x256xf32>
    %367 = arith.mulf %262, %366 : vector<1x256xf32>
    %368 = arith.addf %365, %367 : vector<1x256xf32>
    %c11 = arith.constant 11 : index
    %369 = memref.load %arg4[%c11] : memref<98xf32, #tpu.memory_space<smem>>
    %c60 = arith.constant 60 : index
    %370 = memref.load %arg4[%c60] : memref<98xf32, #tpu.memory_space<smem>>
    %371 = vector.broadcast %369 : f32 to vector<1x256xf32>
    %372 = arith.mulf %265, %371 : vector<1x256xf32>
    %373 = arith.addf %368, %372 : vector<1x256xf32>
    %374 = vector.broadcast %370 : f32 to vector<1x256xf32>
    %375 = arith.mulf %266, %374 : vector<1x256xf32>
    %376 = arith.addf %373, %375 : vector<1x256xf32>
    %c12 = arith.constant 12 : index
    %377 = memref.load %arg4[%c12] : memref<98xf32, #tpu.memory_space<smem>>
    %c61 = arith.constant 61 : index
    %378 = memref.load %arg4[%c61] : memref<98xf32, #tpu.memory_space<smem>>
    %379 = vector.broadcast %377 : f32 to vector<1x256xf32>
    %380 = arith.mulf %269, %379 : vector<1x256xf32>
    %381 = arith.addf %376, %380 : vector<1x256xf32>
    %382 = vector.broadcast %378 : f32 to vector<1x256xf32>
    %383 = arith.mulf %270, %382 : vector<1x256xf32>
    %384 = arith.addf %381, %383 : vector<1x256xf32>
    %c13 = arith.constant 13 : index
    %385 = memref.load %arg4[%c13] : memref<98xf32, #tpu.memory_space<smem>>
    %c62 = arith.constant 62 : index
    %386 = memref.load %arg4[%c62] : memref<98xf32, #tpu.memory_space<smem>>
    %387 = vector.broadcast %385 : f32 to vector<1x256xf32>
    %388 = arith.mulf %273, %387 : vector<1x256xf32>
    %389 = arith.addf %384, %388 : vector<1x256xf32>
    %390 = vector.broadcast %386 : f32 to vector<1x256xf32>
    %391 = arith.mulf %274, %390 : vector<1x256xf32>
    %392 = arith.addf %389, %391 : vector<1x256xf32>
    %c32_i32_101 = arith.constant 32 : i32
    %393 = tpu.dynamic_rotate %392 by %c32_i32_101 dim 1 : vector<1x256xf32>, i32 -> vector<1x256xf32>
    %394 = arith.mulf %152, %393 : vector<1x256xf32>
    %395 = arith.addf %335, %394 : vector<1x256xf32>
    %cst_102 = arith.constant 0.000000e+00 : f32
    %396 = vector.broadcast %cst_102 : f32 to vector<1x256xf32>
    %c14 = arith.constant 14 : index
    %397 = memref.load %arg4[%c14] : memref<98xf32, #tpu.memory_space<smem>>
    %c63 = arith.constant 63 : index
    %398 = memref.load %arg4[%c63] : memref<98xf32, #tpu.memory_space<smem>>
    %399 = vector.broadcast %397 : f32 to vector<1x256xf32>
    %400 = arith.mulf %251, %399 : vector<1x256xf32>
    %401 = arith.addf %396, %400 : vector<1x256xf32>
    %402 = vector.broadcast %398 : f32 to vector<1x256xf32>
    %403 = arith.mulf %252, %402 : vector<1x256xf32>
    %404 = arith.addf %401, %403 : vector<1x256xf32>
    %c15 = arith.constant 15 : index
    %405 = memref.load %arg4[%c15] : memref<98xf32, #tpu.memory_space<smem>>
    %c64 = arith.constant 64 : index
    %406 = memref.load %arg4[%c64] : memref<98xf32, #tpu.memory_space<smem>>
    %407 = vector.broadcast %405 : f32 to vector<1x256xf32>
    %408 = arith.mulf %255, %407 : vector<1x256xf32>
    %409 = arith.addf %404, %408 : vector<1x256xf32>
    %410 = vector.broadcast %406 : f32 to vector<1x256xf32>
    %411 = arith.mulf %256, %410 : vector<1x256xf32>
    %412 = arith.addf %409, %411 : vector<1x256xf32>
    %c16 = arith.constant 16 : index
    %413 = memref.load %arg4[%c16] : memref<98xf32, #tpu.memory_space<smem>>
    %c65 = arith.constant 65 : index
    %414 = memref.load %arg4[%c65] : memref<98xf32, #tpu.memory_space<smem>>
    %415 = vector.broadcast %413 : f32 to vector<1x256xf32>
    %416 = arith.mulf %259, %415 : vector<1x256xf32>
    %417 = arith.addf %412, %416 : vector<1x256xf32>
    %418 = vector.broadcast %414 : f32 to vector<1x256xf32>
    %419 = arith.mulf %260, %418 : vector<1x256xf32>
    %420 = arith.addf %417, %419 : vector<1x256xf32>
    %c17 = arith.constant 17 : index
    %421 = memref.load %arg4[%c17] : memref<98xf32, #tpu.memory_space<smem>>
    %c66 = arith.constant 66 : index
    %422 = memref.load %arg4[%c66] : memref<98xf32, #tpu.memory_space<smem>>
    %423 = vector.broadcast %421 : f32 to vector<1x256xf32>
    %424 = arith.mulf %261, %423 : vector<1x256xf32>
    %425 = arith.addf %420, %424 : vector<1x256xf32>
    %426 = vector.broadcast %422 : f32 to vector<1x256xf32>
    %427 = arith.mulf %262, %426 : vector<1x256xf32>
    %428 = arith.addf %425, %427 : vector<1x256xf32>
    %c18 = arith.constant 18 : index
    %429 = memref.load %arg4[%c18] : memref<98xf32, #tpu.memory_space<smem>>
    %c67 = arith.constant 67 : index
    %430 = memref.load %arg4[%c67] : memref<98xf32, #tpu.memory_space<smem>>
    %431 = vector.broadcast %429 : f32 to vector<1x256xf32>
    %432 = arith.mulf %265, %431 : vector<1x256xf32>
    %433 = arith.addf %428, %432 : vector<1x256xf32>
    %434 = vector.broadcast %430 : f32 to vector<1x256xf32>
    %435 = arith.mulf %266, %434 : vector<1x256xf32>
    %436 = arith.addf %433, %435 : vector<1x256xf32>
    %c19 = arith.constant 19 : index
    %437 = memref.load %arg4[%c19] : memref<98xf32, #tpu.memory_space<smem>>
    %c68 = arith.constant 68 : index
    %438 = memref.load %arg4[%c68] : memref<98xf32, #tpu.memory_space<smem>>
    %439 = vector.broadcast %437 : f32 to vector<1x256xf32>
    %440 = arith.mulf %269, %439 : vector<1x256xf32>
    %441 = arith.addf %436, %440 : vector<1x256xf32>
    %442 = vector.broadcast %438 : f32 to vector<1x256xf32>
    %443 = arith.mulf %270, %442 : vector<1x256xf32>
    %444 = arith.addf %441, %443 : vector<1x256xf32>
    %c20 = arith.constant 20 : index
    %445 = memref.load %arg4[%c20] : memref<98xf32, #tpu.memory_space<smem>>
    %c69 = arith.constant 69 : index
    %446 = memref.load %arg4[%c69] : memref<98xf32, #tpu.memory_space<smem>>
    %447 = vector.broadcast %445 : f32 to vector<1x256xf32>
    %448 = arith.mulf %273, %447 : vector<1x256xf32>
    %449 = arith.addf %444, %448 : vector<1x256xf32>
    %450 = vector.broadcast %446 : f32 to vector<1x256xf32>
    %451 = arith.mulf %274, %450 : vector<1x256xf32>
    %452 = arith.addf %449, %451 : vector<1x256xf32>
    %c16_i32_103 = arith.constant 16 : i32
    %453 = tpu.dynamic_rotate %452 by %c16_i32_103 dim 1 : vector<1x256xf32>, i32 -> vector<1x256xf32>
    %454 = arith.mulf %160, %453 : vector<1x256xf32>
    %455 = arith.addf %395, %454 : vector<1x256xf32>
    %cst_104 = arith.constant 0.000000e+00 : f32
    %456 = vector.broadcast %cst_104 : f32 to vector<1x256xf32>
    %c21 = arith.constant 21 : index
    %457 = memref.load %arg4[%c21] : memref<98xf32, #tpu.memory_space<smem>>
    %c70 = arith.constant 70 : index
    %458 = memref.load %arg4[%c70] : memref<98xf32, #tpu.memory_space<smem>>
    %459 = vector.broadcast %457 : f32 to vector<1x256xf32>
    %460 = arith.mulf %251, %459 : vector<1x256xf32>
    %461 = arith.addf %456, %460 : vector<1x256xf32>
    %462 = vector.broadcast %458 : f32 to vector<1x256xf32>
    %463 = arith.mulf %252, %462 : vector<1x256xf32>
    %464 = arith.addf %461, %463 : vector<1x256xf32>
    %c22 = arith.constant 22 : index
    %465 = memref.load %arg4[%c22] : memref<98xf32, #tpu.memory_space<smem>>
    %c71 = arith.constant 71 : index
    %466 = memref.load %arg4[%c71] : memref<98xf32, #tpu.memory_space<smem>>
    %467 = vector.broadcast %465 : f32 to vector<1x256xf32>
    %468 = arith.mulf %255, %467 : vector<1x256xf32>
    %469 = arith.addf %464, %468 : vector<1x256xf32>
    %470 = vector.broadcast %466 : f32 to vector<1x256xf32>
    %471 = arith.mulf %256, %470 : vector<1x256xf32>
    %472 = arith.addf %469, %471 : vector<1x256xf32>
    %c23 = arith.constant 23 : index
    %473 = memref.load %arg4[%c23] : memref<98xf32, #tpu.memory_space<smem>>
    %c72 = arith.constant 72 : index
    %474 = memref.load %arg4[%c72] : memref<98xf32, #tpu.memory_space<smem>>
    %475 = vector.broadcast %473 : f32 to vector<1x256xf32>
    %476 = arith.mulf %259, %475 : vector<1x256xf32>
    %477 = arith.addf %472, %476 : vector<1x256xf32>
    %478 = vector.broadcast %474 : f32 to vector<1x256xf32>
    %479 = arith.mulf %260, %478 : vector<1x256xf32>
    %480 = arith.addf %477, %479 : vector<1x256xf32>
    %c24 = arith.constant 24 : index
    %481 = memref.load %arg4[%c24] : memref<98xf32, #tpu.memory_space<smem>>
    %c73 = arith.constant 73 : index
    %482 = memref.load %arg4[%c73] : memref<98xf32, #tpu.memory_space<smem>>
    %483 = vector.broadcast %481 : f32 to vector<1x256xf32>
    %484 = arith.mulf %261, %483 : vector<1x256xf32>
    %485 = arith.addf %480, %484 : vector<1x256xf32>
    %486 = vector.broadcast %482 : f32 to vector<1x256xf32>
    %487 = arith.mulf %262, %486 : vector<1x256xf32>
    %488 = arith.addf %485, %487 : vector<1x256xf32>
    %c25 = arith.constant 25 : index
    %489 = memref.load %arg4[%c25] : memref<98xf32, #tpu.memory_space<smem>>
    %c74 = arith.constant 74 : index
    %490 = memref.load %arg4[%c74] : memref<98xf32, #tpu.memory_space<smem>>
    %491 = vector.broadcast %489 : f32 to vector<1x256xf32>
    %492 = arith.mulf %265, %491 : vector<1x256xf32>
    %493 = arith.addf %488, %492 : vector<1x256xf32>
    %494 = vector.broadcast %490 : f32 to vector<1x256xf32>
    %495 = arith.mulf %266, %494 : vector<1x256xf32>
    %496 = arith.addf %493, %495 : vector<1x256xf32>
    %c26 = arith.constant 26 : index
    %497 = memref.load %arg4[%c26] : memref<98xf32, #tpu.memory_space<smem>>
    %c75 = arith.constant 75 : index
    %498 = memref.load %arg4[%c75] : memref<98xf32, #tpu.memory_space<smem>>
    %499 = vector.broadcast %497 : f32 to vector<1x256xf32>
    %500 = arith.mulf %269, %499 : vector<1x256xf32>
    %501 = arith.addf %496, %500 : vector<1x256xf32>
    %502 = vector.broadcast %498 : f32 to vector<1x256xf32>
    %503 = arith.mulf %270, %502 : vector<1x256xf32>
    %504 = arith.addf %501, %503 : vector<1x256xf32>
    %c27 = arith.constant 27 : index
    %505 = memref.load %arg4[%c27] : memref<98xf32, #tpu.memory_space<smem>>
    %c76 = arith.constant 76 : index
    %506 = memref.load %arg4[%c76] : memref<98xf32, #tpu.memory_space<smem>>
    %507 = vector.broadcast %505 : f32 to vector<1x256xf32>
    %508 = arith.mulf %273, %507 : vector<1x256xf32>
    %509 = arith.addf %504, %508 : vector<1x256xf32>
    %510 = vector.broadcast %506 : f32 to vector<1x256xf32>
    %511 = arith.mulf %274, %510 : vector<1x256xf32>
    %512 = arith.addf %509, %511 : vector<1x256xf32>
    %513 = arith.mulf %168, %512 : vector<1x256xf32>
    %514 = arith.addf %455, %513 : vector<1x256xf32>
    %cst_105 = arith.constant 0.000000e+00 : f32
    %515 = vector.broadcast %cst_105 : f32 to vector<1x256xf32>
    %c28 = arith.constant 28 : index
    %516 = memref.load %arg4[%c28] : memref<98xf32, #tpu.memory_space<smem>>
    %c77 = arith.constant 77 : index
    %517 = memref.load %arg4[%c77] : memref<98xf32, #tpu.memory_space<smem>>
    %518 = vector.broadcast %516 : f32 to vector<1x256xf32>
    %519 = arith.mulf %251, %518 : vector<1x256xf32>
    %520 = arith.addf %515, %519 : vector<1x256xf32>
    %521 = vector.broadcast %517 : f32 to vector<1x256xf32>
    %522 = arith.mulf %252, %521 : vector<1x256xf32>
    %523 = arith.addf %520, %522 : vector<1x256xf32>
    %c29 = arith.constant 29 : index
    %524 = memref.load %arg4[%c29] : memref<98xf32, #tpu.memory_space<smem>>
    %c78 = arith.constant 78 : index
    %525 = memref.load %arg4[%c78] : memref<98xf32, #tpu.memory_space<smem>>
    %526 = vector.broadcast %524 : f32 to vector<1x256xf32>
    %527 = arith.mulf %255, %526 : vector<1x256xf32>
    %528 = arith.addf %523, %527 : vector<1x256xf32>
    %529 = vector.broadcast %525 : f32 to vector<1x256xf32>
    %530 = arith.mulf %256, %529 : vector<1x256xf32>
    %531 = arith.addf %528, %530 : vector<1x256xf32>
    %c30 = arith.constant 30 : index
    %532 = memref.load %arg4[%c30] : memref<98xf32, #tpu.memory_space<smem>>
    %c79 = arith.constant 79 : index
    %533 = memref.load %arg4[%c79] : memref<98xf32, #tpu.memory_space<smem>>
    %534 = vector.broadcast %532 : f32 to vector<1x256xf32>
    %535 = arith.mulf %259, %534 : vector<1x256xf32>
    %536 = arith.addf %531, %535 : vector<1x256xf32>
    %537 = vector.broadcast %533 : f32 to vector<1x256xf32>
    %538 = arith.mulf %260, %537 : vector<1x256xf32>
    %539 = arith.addf %536, %538 : vector<1x256xf32>
    %c31 = arith.constant 31 : index
    %540 = memref.load %arg4[%c31] : memref<98xf32, #tpu.memory_space<smem>>
    %c80 = arith.constant 80 : index
    %541 = memref.load %arg4[%c80] : memref<98xf32, #tpu.memory_space<smem>>
    %542 = vector.broadcast %540 : f32 to vector<1x256xf32>
    %543 = arith.mulf %261, %542 : vector<1x256xf32>
    %544 = arith.addf %539, %543 : vector<1x256xf32>
    %545 = vector.broadcast %541 : f32 to vector<1x256xf32>
    %546 = arith.mulf %262, %545 : vector<1x256xf32>
    %547 = arith.addf %544, %546 : vector<1x256xf32>
    %c32 = arith.constant 32 : index
    %548 = memref.load %arg4[%c32] : memref<98xf32, #tpu.memory_space<smem>>
    %c81 = arith.constant 81 : index
    %549 = memref.load %arg4[%c81] : memref<98xf32, #tpu.memory_space<smem>>
    %550 = vector.broadcast %548 : f32 to vector<1x256xf32>
    %551 = arith.mulf %265, %550 : vector<1x256xf32>
    %552 = arith.addf %547, %551 : vector<1x256xf32>
    %553 = vector.broadcast %549 : f32 to vector<1x256xf32>
    %554 = arith.mulf %266, %553 : vector<1x256xf32>
    %555 = arith.addf %552, %554 : vector<1x256xf32>
    %c33 = arith.constant 33 : index
    %556 = memref.load %arg4[%c33] : memref<98xf32, #tpu.memory_space<smem>>
    %c82 = arith.constant 82 : index
    %557 = memref.load %arg4[%c82] : memref<98xf32, #tpu.memory_space<smem>>
    %558 = vector.broadcast %556 : f32 to vector<1x256xf32>
    %559 = arith.mulf %269, %558 : vector<1x256xf32>
    %560 = arith.addf %555, %559 : vector<1x256xf32>
    %561 = vector.broadcast %557 : f32 to vector<1x256xf32>
    %562 = arith.mulf %270, %561 : vector<1x256xf32>
    %563 = arith.addf %560, %562 : vector<1x256xf32>
    %c34 = arith.constant 34 : index
    %564 = memref.load %arg4[%c34] : memref<98xf32, #tpu.memory_space<smem>>
    %c83 = arith.constant 83 : index
    %565 = memref.load %arg4[%c83] : memref<98xf32, #tpu.memory_space<smem>>
    %566 = vector.broadcast %564 : f32 to vector<1x256xf32>
    %567 = arith.mulf %273, %566 : vector<1x256xf32>
    %568 = arith.addf %563, %567 : vector<1x256xf32>
    %569 = vector.broadcast %565 : f32 to vector<1x256xf32>
    %570 = arith.mulf %274, %569 : vector<1x256xf32>
    %571 = arith.addf %568, %570 : vector<1x256xf32>
    %c240_i32_106 = arith.constant 240 : i32
    %572 = tpu.dynamic_rotate %571 by %c240_i32_106 dim 1 : vector<1x256xf32>, i32 -> vector<1x256xf32>
    %573 = arith.mulf %176, %572 : vector<1x256xf32>
    %574 = arith.addf %514, %573 : vector<1x256xf32>
    %cst_107 = arith.constant 0.000000e+00 : f32
    %575 = vector.broadcast %cst_107 : f32 to vector<1x256xf32>
    %c35 = arith.constant 35 : index
    %576 = memref.load %arg4[%c35] : memref<98xf32, #tpu.memory_space<smem>>
    %c84 = arith.constant 84 : index
    %577 = memref.load %arg4[%c84] : memref<98xf32, #tpu.memory_space<smem>>
    %578 = vector.broadcast %576 : f32 to vector<1x256xf32>
    %579 = arith.mulf %251, %578 : vector<1x256xf32>
    %580 = arith.addf %575, %579 : vector<1x256xf32>
    %581 = vector.broadcast %577 : f32 to vector<1x256xf32>
    %582 = arith.mulf %252, %581 : vector<1x256xf32>
    %583 = arith.addf %580, %582 : vector<1x256xf32>
    %c36 = arith.constant 36 : index
    %584 = memref.load %arg4[%c36] : memref<98xf32, #tpu.memory_space<smem>>
    %c85 = arith.constant 85 : index
    %585 = memref.load %arg4[%c85] : memref<98xf32, #tpu.memory_space<smem>>
    %586 = vector.broadcast %584 : f32 to vector<1x256xf32>
    %587 = arith.mulf %255, %586 : vector<1x256xf32>
    %588 = arith.addf %583, %587 : vector<1x256xf32>
    %589 = vector.broadcast %585 : f32 to vector<1x256xf32>
    %590 = arith.mulf %256, %589 : vector<1x256xf32>
    %591 = arith.addf %588, %590 : vector<1x256xf32>
    %c37 = arith.constant 37 : index
    %592 = memref.load %arg4[%c37] : memref<98xf32, #tpu.memory_space<smem>>
    %c86 = arith.constant 86 : index
    %593 = memref.load %arg4[%c86] : memref<98xf32, #tpu.memory_space<smem>>
    %594 = vector.broadcast %592 : f32 to vector<1x256xf32>
    %595 = arith.mulf %259, %594 : vector<1x256xf32>
    %596 = arith.addf %591, %595 : vector<1x256xf32>
    %597 = vector.broadcast %593 : f32 to vector<1x256xf32>
    %598 = arith.mulf %260, %597 : vector<1x256xf32>
    %599 = arith.addf %596, %598 : vector<1x256xf32>
    %c38 = arith.constant 38 : index
    %600 = memref.load %arg4[%c38] : memref<98xf32, #tpu.memory_space<smem>>
    %c87 = arith.constant 87 : index
    %601 = memref.load %arg4[%c87] : memref<98xf32, #tpu.memory_space<smem>>
    %602 = vector.broadcast %600 : f32 to vector<1x256xf32>
    %603 = arith.mulf %261, %602 : vector<1x256xf32>
    %604 = arith.addf %599, %603 : vector<1x256xf32>
    %605 = vector.broadcast %601 : f32 to vector<1x256xf32>
    %606 = arith.mulf %262, %605 : vector<1x256xf32>
    %607 = arith.addf %604, %606 : vector<1x256xf32>
    %c39 = arith.constant 39 : index
    %608 = memref.load %arg4[%c39] : memref<98xf32, #tpu.memory_space<smem>>
    %c88 = arith.constant 88 : index
    %609 = memref.load %arg4[%c88] : memref<98xf32, #tpu.memory_space<smem>>
    %610 = vector.broadcast %608 : f32 to vector<1x256xf32>
    %611 = arith.mulf %265, %610 : vector<1x256xf32>
    %612 = arith.addf %607, %611 : vector<1x256xf32>
    %613 = vector.broadcast %609 : f32 to vector<1x256xf32>
    %614 = arith.mulf %266, %613 : vector<1x256xf32>
    %615 = arith.addf %612, %614 : vector<1x256xf32>
    %c40 = arith.constant 40 : index
    %616 = memref.load %arg4[%c40] : memref<98xf32, #tpu.memory_space<smem>>
    %c89 = arith.constant 89 : index
    %617 = memref.load %arg4[%c89] : memref<98xf32, #tpu.memory_space<smem>>
    %618 = vector.broadcast %616 : f32 to vector<1x256xf32>
    %619 = arith.mulf %269, %618 : vector<1x256xf32>
    %620 = arith.addf %615, %619 : vector<1x256xf32>
    %621 = vector.broadcast %617 : f32 to vector<1x256xf32>
    %622 = arith.mulf %270, %621 : vector<1x256xf32>
    %623 = arith.addf %620, %622 : vector<1x256xf32>
    %c41 = arith.constant 41 : index
    %624 = memref.load %arg4[%c41] : memref<98xf32, #tpu.memory_space<smem>>
    %c90 = arith.constant 90 : index
    %625 = memref.load %arg4[%c90] : memref<98xf32, #tpu.memory_space<smem>>
    %626 = vector.broadcast %624 : f32 to vector<1x256xf32>
    %627 = arith.mulf %273, %626 : vector<1x256xf32>
    %628 = arith.addf %623, %627 : vector<1x256xf32>
    %629 = vector.broadcast %625 : f32 to vector<1x256xf32>
    %630 = arith.mulf %274, %629 : vector<1x256xf32>
    %631 = arith.addf %628, %630 : vector<1x256xf32>
    %c224_i32_108 = arith.constant 224 : i32
    %632 = tpu.dynamic_rotate %631 by %c224_i32_108 dim 1 : vector<1x256xf32>, i32 -> vector<1x256xf32>
    %633 = arith.mulf %184, %632 : vector<1x256xf32>
    %634 = arith.addf %574, %633 : vector<1x256xf32>
    %cst_109 = arith.constant 0.000000e+00 : f32
    %635 = vector.broadcast %cst_109 : f32 to vector<1x256xf32>
    %c42 = arith.constant 42 : index
    %636 = memref.load %arg4[%c42] : memref<98xf32, #tpu.memory_space<smem>>
    %c91 = arith.constant 91 : index
    %637 = memref.load %arg4[%c91] : memref<98xf32, #tpu.memory_space<smem>>
    %638 = vector.broadcast %636 : f32 to vector<1x256xf32>
    %639 = arith.mulf %251, %638 : vector<1x256xf32>
    %640 = arith.addf %635, %639 : vector<1x256xf32>
    %641 = vector.broadcast %637 : f32 to vector<1x256xf32>
    %642 = arith.mulf %252, %641 : vector<1x256xf32>
    %643 = arith.addf %640, %642 : vector<1x256xf32>
    %c43 = arith.constant 43 : index
    %644 = memref.load %arg4[%c43] : memref<98xf32, #tpu.memory_space<smem>>
    %c92 = arith.constant 92 : index
    %645 = memref.load %arg4[%c92] : memref<98xf32, #tpu.memory_space<smem>>
    %646 = vector.broadcast %644 : f32 to vector<1x256xf32>
    %647 = arith.mulf %255, %646 : vector<1x256xf32>
    %648 = arith.addf %643, %647 : vector<1x256xf32>
    %649 = vector.broadcast %645 : f32 to vector<1x256xf32>
    %650 = arith.mulf %256, %649 : vector<1x256xf32>
    %651 = arith.addf %648, %650 : vector<1x256xf32>
    %c44 = arith.constant 44 : index
    %652 = memref.load %arg4[%c44] : memref<98xf32, #tpu.memory_space<smem>>
    %c93 = arith.constant 93 : index
    %653 = memref.load %arg4[%c93] : memref<98xf32, #tpu.memory_space<smem>>
    %654 = vector.broadcast %652 : f32 to vector<1x256xf32>
    %655 = arith.mulf %259, %654 : vector<1x256xf32>
    %656 = arith.addf %651, %655 : vector<1x256xf32>
    %657 = vector.broadcast %653 : f32 to vector<1x256xf32>
    %658 = arith.mulf %260, %657 : vector<1x256xf32>
    %659 = arith.addf %656, %658 : vector<1x256xf32>
    %c45 = arith.constant 45 : index
    %660 = memref.load %arg4[%c45] : memref<98xf32, #tpu.memory_space<smem>>
    %c94 = arith.constant 94 : index
    %661 = memref.load %arg4[%c94] : memref<98xf32, #tpu.memory_space<smem>>
    %662 = vector.broadcast %660 : f32 to vector<1x256xf32>
    %663 = arith.mulf %261, %662 : vector<1x256xf32>
    %664 = arith.addf %659, %663 : vector<1x256xf32>
    %665 = vector.broadcast %661 : f32 to vector<1x256xf32>
    %666 = arith.mulf %262, %665 : vector<1x256xf32>
    %667 = arith.addf %664, %666 : vector<1x256xf32>
    %c46 = arith.constant 46 : index
    %668 = memref.load %arg4[%c46] : memref<98xf32, #tpu.memory_space<smem>>
    %c95 = arith.constant 95 : index
    %669 = memref.load %arg4[%c95] : memref<98xf32, #tpu.memory_space<smem>>
    %670 = vector.broadcast %668 : f32 to vector<1x256xf32>
    %671 = arith.mulf %265, %670 : vector<1x256xf32>
    %672 = arith.addf %667, %671 : vector<1x256xf32>
    %673 = vector.broadcast %669 : f32 to vector<1x256xf32>
    %674 = arith.mulf %266, %673 : vector<1x256xf32>
    %675 = arith.addf %672, %674 : vector<1x256xf32>
    %c47 = arith.constant 47 : index
    %676 = memref.load %arg4[%c47] : memref<98xf32, #tpu.memory_space<smem>>
    %c96 = arith.constant 96 : index
    %677 = memref.load %arg4[%c96] : memref<98xf32, #tpu.memory_space<smem>>
    %678 = vector.broadcast %676 : f32 to vector<1x256xf32>
    %679 = arith.mulf %269, %678 : vector<1x256xf32>
    %680 = arith.addf %675, %679 : vector<1x256xf32>
    %681 = vector.broadcast %677 : f32 to vector<1x256xf32>
    %682 = arith.mulf %270, %681 : vector<1x256xf32>
    %683 = arith.addf %680, %682 : vector<1x256xf32>
    %c48 = arith.constant 48 : index
    %684 = memref.load %arg4[%c48] : memref<98xf32, #tpu.memory_space<smem>>
    %c97 = arith.constant 97 : index
    %685 = memref.load %arg4[%c97] : memref<98xf32, #tpu.memory_space<smem>>
    %686 = vector.broadcast %684 : f32 to vector<1x256xf32>
    %687 = arith.mulf %273, %686 : vector<1x256xf32>
    %688 = arith.addf %683, %687 : vector<1x256xf32>
    %689 = vector.broadcast %685 : f32 to vector<1x256xf32>
    %690 = arith.mulf %274, %689 : vector<1x256xf32>
    %691 = arith.addf %688, %690 : vector<1x256xf32>
    %c208_i32_110 = arith.constant 208 : i32
    %692 = tpu.dynamic_rotate %691 by %c208_i32_110 dim 1 : vector<1x256xf32>, i32 -> vector<1x256xf32>
    %693 = arith.mulf %192, %692 : vector<1x256xf32>
    %694 = arith.addf %634, %693 : vector<1x256xf32>
    %cst_111 = arith.constant 0.000000e+00 : f32
    %695 = vector.broadcast %cst_111 : f32 to vector<1x256xf32>
    %696 = arith.subf %695, %694 : vector<1x256xf32>
    %697 = math.exp %696 : vector<1x256xf32>
    %cst_112 = arith.constant 1.000000e+00 : f32
    %698 = vector.broadcast %cst_112 : f32 to vector<1x256xf32>
    %699 = arith.addf %698, %697 : vector<1x256xf32>
    %cst_113 = arith.constant 1.000000e+00 : f32
    %700 = vector.broadcast %cst_113 : f32 to vector<1x256xf32>
    %701 = arith.divf %700, %699 : vector<1x256xf32>
    %702 = vector.broadcast %701 : vector<1x256xf32> to vector<16x256xf32>
    %703 = arith.mulf %35, %702 : vector<16x256xf32>
    %c0_114 = arith.constant 0 : index
    %c0_115 = arith.constant 0 : index
    %c0_116 = arith.constant 0 : index
    %704 = vector.load %arg5[%c0_114, %c0_115, %c0_116] : memref<1x16x256xf32, #tpu.memory_space<vmem>>, vector<1x16x256xf32>
    %705 = vector.shape_cast %704 : vector<1x16x256xf32> to vector<16x256xf32>
    %706 = vector.shape_cast %703 : vector<16x256xf32> to vector<1x16x256xf32>
    tpu.vector_store %arg5[%c0_114, %c0_115, %c0_116], %706 {strides = array<i32>} : memref<1x16x256xf32, #tpu.memory_space<vmem>>, vector<1x16x256xf32>,
    return
  }
  func.func @transform_0(%arg0: i32) -> (i32, i32, i32) {
    %c0_i32 = arith.constant 0 : i32
    %c0_i32_0 = arith.constant 0 : i32
    %c0_i32_1 = arith.constant 0 : i32
    return %arg0, %c0_i32, %c0_i32_0 : i32, i32, i32
  }
  func.func @transform_1(%arg0: i32) -> (i32, i32) {
    %c0_i32 = arith.constant 0 : i32
    %c0_i32_0 = arith.constant 0 : i32
    %c0_i32_1 = arith.constant 0 : i32
    return %c0_i32, %c0_i32_0 : i32, i32
  }
  func.func @transform_2(%arg0: i32) -> (i32, i32) {
    %c0_i32 = arith.constant 0 : i32
    %c0_i32_0 = arith.constant 0 : i32
    %c0_i32_1 = arith.constant 0 : i32
    return %c0_i32, %c0_i32_0 : i32, i32
  }
  func.func @transform_3(%arg0: i32) -> i32 {
    %c0_i32 = arith.constant 0 : i32
    %c0_i32_0 = arith.constant 0 : i32
    return %c0_i32 : i32
  }
  func.func @transform_4(%arg0: i32) -> (i32, i32, i32) {
    %c0_i32 = arith.constant 0 : i32
    %c0_i32_0 = arith.constant 0 : i32
    %c0_i32_1 = arith.constant 0 : i32
    return %arg0, %c0_i32, %c0_i32_0 : i32, i32, i32
  }
}

</mosaic_0001>

<bundles_post_ra>
// kernel: tpu_custom_call.1
= control target key start
LH: loop header
LB: loop body
LE: loop exit
PB: predicated region body
PF: predicated region fallthrough
CT: control target
= control target key end

     0   :  { %s3342_s0 = inlined_call_operand.hbm [shape: f32[2,16,256], index: 0, kind: input, shape index: {}]   ;;  %s3343_s1 = inlined_call_operand.vmem [shape: f32[16,2], index: 1, kind: input, shape index: {}]   ;;  %s3344_s2 = inlined_call_operand.vmem [shape: f32[16,2], index: 2, kind: input, shape index: {}]   ;;  %s3345_s3 = inlined_call_operand.vmem [shape: f32[98], index: 3, kind: input, shape index: {}]   ;;  %s3346_s4 = inlined_call_operand.hbm [shape: f32[2,16,256], index: 4, kind: output, shape index: {}]  }
   0x1   :  { %3470 = sst [smem:[#allocation151_spill]] %s3342_s0 }
   0x2   :  { %3471 = sst [smem:[#allocation152_spill]] %s3343_s1 }
   0x3   :  { %3472 = sst [smem:[#allocation153_spill]] %s3344_s2 }
   0x4   :  { %3473 = sst [smem:[#allocation154_spill]] %s3345_s3 }
   0x5   :  { %3474 = sst [smem:[#allocation155_spill]] %s3346_s4 }
   0x6   :  { %9 = vsyncpa [#allocation3], 0 }
   0x7   :  { %11 = vsyncpa [#allocation3 + $0x1], 0 }
   0x8   :  { %12 = vsyncpa [#allocation5], 0 }
   0x9   :  { %13 = vsyncpa [#allocation4], 0 }
   0xa   :  { %15 = vsyncpa [#allocation4 + $0x1], 0  ;;  %s1787_s15 = smov 0   ;;  %s1789_s16 = smov 0  }
   0xb   :  { %s1791_s17 = smov 0   ;;  %s1793_s18 = smov 0  }
   0xc LB: > { %3475 = sst [smem:[#allocation11_spill]] %s1728_s15  ;;  %s1808_s19 = sadd.s32 4294967295, %s1740_s18   ;;  %s1740_s18 = sphi %s1793_s18, %s3976_s18   ;;  %s1736_s17 = sphi %s1791_s17, %s3979_s17   ;;  %s1732_s16 = sphi %s1789_s16, %s3978_s16   ;;  %s1728_s15 = sphi %s1787_s15, %s3977_s15  }
   0xd   : > { %3476 = sst [smem:[#allocation12_spill]] %s1732_s16  ;;  %s1424_s20 = sadd.s32 4294967294, %s1740_s18  }
   0xe   : > { %3477 = sst [smem:[#allocation13_spill]] %s1736_s17  ;;  %s1812_s21 = sadd.s32 1, %s1740_s18  }
   0xf   : > { %3478 = sst [smem:[#allocation14_spill]] %s1740_s18  ;;  %s28_s22 = sadd.s32 1, %s1736_s17 }
  0x10   : > { %3479 = sst [smem:[#allocation15_spill]] %s1808_s19  ;;  %s25_s23 = ssub.s32 %s1740_s18, %s1812_s21 }
  0x11   : > { %3480 = sst [smem:[#allocation16_spill]] %s1812_s21  ;;  %p35_p0 = scmp.ne.s32.totalorder %s1736_s17, %s1732_s16 }
  0x12   : > { %p26_p1 = scmp.eq.s32.totalorder %s25_s23, 0  ;;  %p36_p2 = scmp.eq.s32.totalorder %s1740_s18, 0 }
  0x13   : > { %p41_p3 = scmp.ne.s32.totalorder %s1732_s16, %s1728_s15  ;;  %p3348_p4 = scmp.eq.s32.totalorder %s1808_s19, 0 }
  0x14   : > { %s1824_s24 = scalar_select %p26_p1, %s1736_s17, %s28_s22  }
  0x15   : > { %p1826_p5 = por %p36_p2, %p35_p0  ;;  %p1832_p6 = por %p3348_p4, %p41_p3 }
  0x16   : > { %3481 = sst [smem:[#allocation17_spill]] %s1824_s24  ;;  %p128_p7 = scmp.eq.s32.totalorder %s1808_s19, 1 }
  0x17   : > { %s3483_s26 = scalar_select %p1832_p6, 1, 0 }
  0x18   : > { %p134_p8 = scmp.eq.s32.totalorder %s1424_s20, 1  ;;  %p1425_p9 = scmp.ge.s32.totalorder %s1740_s18, 1 }
  0x19   : > { %p141_p10 = scmp.lt.s32.totalorder %s1740_s18, 3  ;;  %p1839_p11 = por %p128_p7, %p35_p0 }
  0x1a   : > { %p1843_p12 = por %p134_p8, %p41_p3  ;;  %s3489_s3 = sld [smem:[#allocation154_spill]] }
  0x1b   : > { %s3484_s27 = scalar_select %p1839_p11, 1, 0 }
  0x1c   : > { %s3486_s28 = scalar_select %p1843_p12, 1, 0 }
  0x1d   : > { %3485 = sst [smem:[#allocation18_spill]] %s3484_s27  ;;  %p1847_p13 = pnand %p1425_p9, %p141_p10 }
  0x1e   : > { %3487 = sst [smem:[#allocation19_spill]] %s3486_s28  ;;  %p1560_p2 = scmp.lt.s32.totalorder %s1740_s18, 2 }
  0x1f   : > { %s3488_s29 = scalar_select %p1847_p13, 1, 0 }
  0x20   : > { %s160_s6 = sshll.u32 %s3489_s3, 4  ;;  %p1547_p1 = pneg %p1847_p13  ;;  %s161_s6 = int_to_ptr.vmem [resolvable:$true] %s160_s6 }
  0x21   : > { %s171_s8 = sand.u32 1, %s1736_s17   ;;  %p1867_p3 = pnand %p1560_p2, %p1826_p5 }
  0x22   : > { %p1860_p7 = pnand %p1547_p1, %p3348_p4  ;;  %s1428_s10 = sshll.u32 %s171_s8, 5 }
  0x23   : > { %s1629_s11 = scalar_lea.vmem %s161_s6, 16  ;;  %p1637_p12 = scmp.lt.s32.totalorder %s161_s6, %s161_s6 }
  0x24   : > { %p1630_p8 = scmp.ne.s32.totalorder %s161_s6, %s1629_s11  ;;  %p1631_p9 = pneg %p1860_p7 }
  0x25   : > { %p1638_p11 = scmp.lt.s32.totalorder %s1629_s11, %s1629_s11 }
  0x26   : > { %p1632_p10 = pnand %p1631_p9, %p1630_p8 }
  0x27   : > { %p1639_p1 = por %p1638_p11, %p1637_p12 }
  0x28   : > { %p1633_p0 = pneg %p1632_p10 }
  0x2a   : > { %p1640_p4 = pnand %p1639_p1, %p1633_p0 }
  0x2c   : > { %1643 = shalt.err (!%p1640_p4)
}
  0x2d   : > { %s1742_s12 = smov [#allocation6]   ;;  %s1537_s13 = sshll.u32 %s1740_s18, 9 }
  0x2e   : > { %1550 = dma.vmem_to_smem (!%p1860_p7), %s161_s6, 16, %s1742_s12, [#allocation5]  }
  0x2f   : > { %s175_s14 = scalar_lea.vmem [#allocation2], %s1428_s10  ;;  %s3492_s0 = sld [smem:[#allocation151_spill]] }
  0x30   : > { %s182_s20 = sshll.u32 %s175_s14, 4  ;;  %s1883_s30 = scalar_lea.sflag [#allocation3], %s171_s8  ;;  %s1881_s20 = int_to_ptr.vmem [resolvable:$true] %s182_s20 }
  0x31   : > { %p1646_p5 = pneg %p1867_p3 }
  0x35   : > { %s1879_s25 = scalar_lea.hbm %s3492_s0, %s1537_s13  ;;  %s1649_s10 = scalar_lea.hbm %s3492_s0, 1024 }
  0x36   : > { %s1644_s5 = scalar_lea.hbm %s1879_s25, 512  ;;  %p1650_p0 = scmp.lt.s32.totalorder %s1879_s25, %s3492_s0 }
  0x37   : > { %p1645_p4 = scmp.ne.s32.totalorder %s1879_s25, %s1644_s5  ;;  %p1651_p2 = scmp.lt.s32.totalorder %s1649_s10, %s1644_s5 }
  0x39   : > { %p1647_p11 = pnand %p1646_p5, %p1645_p4  ;;  %p1652_p7 = por %p1651_p2, %p1650_p0 }
  0x3b   : > { %p1648_p12 = pneg %p1647_p11 }
  0x3d   : > { %p1653_p8 = pnand %p1652_p7, %p1648_p12 }
  0x3f   : > { %1656 = shalt.err (!%p1653_p8)
}
  0x40   : > { %s1657_s8 = scalar_lea.vmem %s1881_s20, 512  ;;  %s1743_s13 = smov [#allocation2]  }
  0x41   : > { %p1658_p9 = scmp.ne.s32.totalorder %s1881_s20, %s1657_s8  ;;  %s1662_s14 = sshll.u32 %s1743_s13, 4  ;;  %s1663_s14 = int_to_ptr.vmem [resolvable:$false] %s1662_s14 }
  0x42   : > { %s1664_s22 = scalar_lea.vmem %s1663_s14, 1024  ;;  %p1665_p4 = scmp.lt.s32.totalorder %s1881_s20, %s1663_s14 }
  0x43   : > { %p1660_p10 = pnand %p1658_p9, %p1646_p5  ;;  %p1666_p11 = scmp.lt.s32.totalorder %s1664_s22, %s1657_s8 }
  0x45   : > { %p1661_p1 = pneg %p1660_p10  ;;  %p1667_p6 = por %p1666_p11, %p1665_p4 }
  0x47   : > { %p1668_p13 = pnand %p1667_p6, %p1661_p1 }
  0x49   : > { %1671 = shalt.err (!%p1668_p13)
}
  0x4a   : > { %s1744_s23 = smov 256   ;;  %s1745_s5 = smov 16  }
  0x4b   : > { %1554 = dma.hbm_to_vmem [thread:$0]  (!%p1867_p3), %s1879_s25, 512, %s1881_s20, %s1883_s30, %s1744_s23, %s1744_s23, %s1745_s5  }
  0x4c   : > { %p3493_p5 = scmp.ne.s32.totalorder %s3488_s29, 0 }
  0x4e   : > { %194 = sbr.rel (%p3493_p5) target bundleno = 875 (0x36b), region = 36 }
  0x53   : > { %s1907_s6 = sand.u32 1, %s1732_s16   ;;  %p3495_p6 = scmp.ne.s32.totalorder %s3483_s26, 0 }
  0x54   : > { %3494 = sst [smem:[#allocation20_spill]] %s1907_s6  ;;  %s3351_s7 = sshll.u32 %s1907_s6, 5 }
  0x55   : > { %s197_s10 = scalar_lea.sflag [#allocation3], %s1907_s6  ;;  %s200_s11 = scalar_lea.vmem [#allocation2], %s3351_s7 }
  0x56   : > { %1715 = dma.done.wait (%p3495_p6), %s197_s10, 512  }
  0x57   : > { %1717 = vsyncadd (%p3495_p6), %s197_s10, 4294966784  ;;  %p3496_p13 = scmp.eq.s32.totalorder %s1808_s19, 0 }
  0x59   : > { %1719 = dma.done.wait (%p3496_p13), [#allocation5], 16   ;;  %p3497_p3 = pmov %p3496_p13 }
  0x5b   : > { %1721 = vsyncadd (%p3497_p3), [#allocation5], 4294967280 }
  0x5c   : > { %209 = sfence }
  0x5d   : > { %v1921_v0 = vld [vmem:[%s200_s11] sm:$0xff]  ;;  %v1923_v1 = vld [vmem:[%s200_s11 + $0x8] sm:$0xff]  ;;  %v1925_v2 = vld [vmem:[%s200_s11 + $0x10] sm:$0xff]  ;;  %s3498_s1 = sld [smem:[#allocation152_spill]]  ;;  %vm254_vm0 = vcmask 15360   ;;  %v3431_v47 = vlaneseq  ;;  %v1746_v56 = vmov 0  }
  0x5e   : > { %v242_v3 = vmax.f32 %v1921_v0, %v1923_v1  ;;  %v234_v4 = vadd.f32 %v1923_v1, %v1921_v0  ;;  %v1931_v5 = vld [vmem:[%s200_s11 + $0x18] sm:$0xff]  ;;  %s3499_s2 = sld [smem:[#allocation153_spill]]  ;;  %s1748_s13 = smov 2  }
  0x5f   : > { %v245_v6 = vmax.f32 %v1925_v2, %v1931_v5  ;;  %v237_v7 = vadd.f32 %v1931_v5, %v1925_v2  ;;  %v1956_v48 = vand.u32 127, %v3431_v47  ;;  %s1749_s14 = smov 3   ;;  %s1750_s22 = smov 1  }
  0x60   : > { %243 = vmax.xlane.f32.xlu1 %v242_v3  ;;  %235 = vadd.xlane.f32.xlu0 %v234_v4  ;;  %s3354_s23 = smov 127   ;;  %s2095_s5 = sld [smem:[#allocation6 + $0x49]] }
  0x61   : > { %v1959_v53 = vadd.s32 128, %v1956_v48  ;;  %vm335_vm1 = vcmp.ge.s32.totalorder %v1956_v48, 16  ;;  %vm339_vm2 = vcmp.ge.s32.totalorder %v1956_v48, 32  ;;  %vm345_vm4 = vcmp.ge.s32.totalorder %v1956_v48, 48  ;;  %s2099_s10 = sld [smem:[#allocation6 + $0x34]]  ;;  %s3352_s25 = smov 126  }
  0x62   : > { %v337_v57 = vsel %vm335_vm1, 1, %v1746_v56  ;;  %v341_v58 = vsel %vm339_vm2, 1, %v1746_v56  ;;  %v347_v61 = vsel %vm345_vm4, 1, %v1746_v56  ;;  %vm351_vm6 = vcmp.ge.s32.totalorder %v1956_v48, 64  ;;  %s2102_s11 = sld [smem:[#allocation6 + $0x18]]  ;;  %s3513_s24 = smov 127  }
  0x63   : > { %v248_v8 = vld [vmem:[%s3498_s1] sm:$0xff]  ;;  %v249_v12 = vld [vmem:[%s3498_s1 + $0x8] sm:$0xff]  ;;  %3500 = vst [vmem:[#allocation21_spill] sm:$0xff] %v1959_v53  ;;  %vm382_vm3 = vcmp.ge.s32.totalorder %v1959_v53, 144  ;;  %v343_v60 = vadd.s32 %v341_v58, %v337_v57  ;;  %vm388_vm5 = vcmp.ge.s32.totalorder %v1959_v53, 160  ;;  %vm394_vm7 = vcmp.ge.s32.totalorder %v1959_v53, 176 }
  0x64   : > { %246 = vmax.xlane.f32.xlu1 %v245_v6  ;;  %238 = vadd.xlane.f32.xlu0 %v237_v7  ;;  %v251_v40 = vld [vmem:[%s3499_s2 + $0x8] sm:$0xff]  ;;  %v250_v41 = vld [vmem:[%s3499_s2] sm:$0xff]  ;;  %v384_v59 = vsel %vm382_vm3, 1, %v1746_v56  ;;  %v390_v63 = vsel %vm388_vm5, 1, %v1746_v56  ;;  %v353_v4 = vsel %vm351_vm6, 1, %v1746_v56  ;;  %vm357_vm8 = vcmp.ge.s32.totalorder %v1956_v48, 80 }
  0x65   : > { %v386_v62 = vadd.s32 8, %v384_v59  ;;  %v349_v3 = vadd.s32 %v347_v61, %v343_v60  ;;  %v396_v7 = vsel %vm394_vm7, 1, %v1746_v56  ;;  %vm400_vm9 = vcmp.ge.s32.totalorder %v1959_v53, 192  ;;  %s2106_s26 = sld [smem:[#allocation6 + $0x3]]  ;;  %s3508_s1 = smov 126  }
  0x66   : > { %vm363_vm10 = vcmp.ge.s32.totalorder %v1956_v48, 96  ;;  %vm406_vm11 = vcmp.ge.s32.totalorder %v1959_v53, 208  ;;  %vm369_vm12 = vcmp.ge.s32.totalorder %v1956_v48, 112  ;;  %vm412_vm13 = vcmp.ge.s32.totalorder %v1959_v53, 224  ;;  %s2110_s29 = sld [smem:[#allocation6 + $0x3b]]  ;;  %s1753_s17 = smov 125  }
  0x67   : > { %v392_v6 = vadd.s32 %v390_v63, %v386_v62  ;;  %vm418_vm14 = vcmp.ge.s32.totalorder %v1959_v53, 240  ;;  %v3432_v60 = vmov 0.0   ;;  %s2114_s9 = sld [smem:[#allocation6 + $0xa]] }
  0x68   : > { %s2116_s20 = sld [smem:[#allocation6 + $0x42]] }
  0x69   : > { %s2120_s30 = sld [smem:[#allocation6 + $0x11]] }
  0x6a   : > { %s2122_s12 = sld [smem:[#allocation6 + $0x50]] }
  0x6b   : > { %s2126_s8 = sld [smem:[#allocation6 + $0x1f]] }
  0x6c   : > { %s2137_s7 = sld [smem:[#allocation6 + $0x5e]] }
  0x6d   : > { %s2143_s0 = sld [smem:[#allocation6 + $0x31]] }
  0x6e   : > { %s2154_s2 = sld [smem:[#allocation6 + $0x46]] }
  0x6f   : > { %s2158_s3 = sld [smem:[#allocation6 + $0x4d]] }
  0x70   : > { %s2161_s16 = sld [smem:[#allocation6 + $0x54]] }
  0x71   : > { %s2163_s21 = sld [smem:[#allocation6 + $0x5b]] }
  0x72   : > { %s2167_s18 = sld [smem:[#allocation6 + $0x32]] }
  0x73   : > { %3507 = sst [smem:[#allocation26_spill]] %s2143_s0 }
  0x74   : > { %3511 = sst [smem:[#allocation29_spill]] %s2154_s2 }
  0x75   : > { %3512 = sst [smem:[#allocation30_spill]] %s2158_s3 }
  0x76   : > { %3514 = sst [smem:[#allocation31_spill]] %s2161_s16 }
  0x77   : > { %3515 = sst [smem:[#allocation32_spill]] %s2163_s21 }
  0x78   : > { %3516 = sst [smem:[#allocation33_spill]] %s2167_s18 }
  0x79   : > { %s2169_s28 = sld [smem:[#allocation6 + $0x39]] }
  0x7a   : > { %s2172_s15 = sld [smem:[#allocation6 + $0x40]] }
  0x7b   : > { %s2178_s4 = sld [smem:[#allocation6 + $0x4e]] }
  0x7c   : > { %s2180_s27 = sld [smem:[#allocation6 + $0x55]] }
  0x7d   : > { %s2182_s6 = sld [smem:[#allocation6 + $0x5c]] }
  0x7e   : > { %s2184_s19 = sld [smem:[#allocation6 + $0x33]] }
  0x7f   : > { %3517 = sst [smem:[#allocation34_spill]] %s2169_s28 }
  0x80   : > { %3518 = sst [smem:[#allocation35_spill]] %s2172_s15 }
  0x81   : > { %3520 = sst [smem:[#allocation37_spill]] %s2178_s4 }
  0x82   : > { %3521 = sst [smem:[#allocation38_spill]] %s2180_s27 }
  0x83   : > { %3522 = sst [smem:[#allocation39_spill]] %s2182_s6 }
  0x84   : > { %3523 = sst [smem:[#allocation40_spill]] %s2184_s19 }
  0x85   : > { %s2189_s15 = sld [smem:[#allocation6 + $0x41]] }
  0x86   : > { %s2191_s28 = sld [smem:[#allocation6 + $0x48]] }
  0x87   : > { %s2195_s18 = sld [smem:[#allocation6 + $0x56]] }
  0x88   : > { %s2197_s4 = sld [smem:[#allocation6 + $0x5d]] }
  0x89   : > { %s2199_s27 = sld [smem:[#allocation6 + $0x4a]] }
  0x8a   : > { %s2201_s6 = sld [smem:[#allocation6]] }
  0x8b   : > { %3525 = sst [smem:[#allocation42_spill]] %s2189_s15 }
  0x8c   : > { %3526 = sst [smem:[#allocation43_spill]] %s2191_s28 }
  0x8d   : > { %3528 = sst [smem:[#allocation45_spill]] %s2195_s18 }
  0x8e   : > { %3529 = sst [smem:[#allocation46_spill]] %s2197_s4 }
  0x8f   : > { %3530 = sst [smem:[#allocation47_spill]] %s2199_s27 }
  0x90   : > { %3531 = sst [smem:[#allocation48_spill]] %s2201_s6 }
  0x91   : > { %s2203_s19 = sld [smem:[#allocation6 + $0x7]] }
  0x92   : > { %s2205_s21 = sld [smem:[#allocation6 + $0xe]] }
  0x93   : > { %s2209_s15 = sld [smem:[#allocation6 + $0x1c]] }
  0x94   : > { %s2213_s28 = sld [smem:[#allocation6 + $0x2a]] }
  0x95   : > { %s2217_s18 = sld [smem:[#allocation6 + $0x8]] }
  0x96   : > { %s2219_s4 = sld [smem:[#allocation6 + $0xf]] }
  0x97   : > { %3532 = sst [smem:[#allocation49_spill]] %s2203_s19 }
  0x98   : > { %3533 = sst [smem:[#allocation50_spill]] %s2205_s21 }
  0x99   : > { %3535 = sst [smem:[#allocation52_spill]] %s2209_s15 }
  0x9a   : > { %3537 = sst [smem:[#allocation54_spill]] %s2213_s28 }
  0x9b   : > { %3539 = sst [smem:[#allocation56_spill]] %s2217_s18 }
  0x9c   : > { %3540 = sst [smem:[#allocation57_spill]] %s2219_s4 }
  0x9d   : > { %s2221_s27 = sld [smem:[#allocation6 + $0x16]] }
  0x9e   : > { %s2223_s6 = sld [smem:[#allocation6 + $0x1d]] }
  0x9f   : > { %s2225_s19 = sld [smem:[#allocation6 + $0x24]] }
  0xa0   : > { %s2227_s21 = sld [smem:[#allocation6 + $0x2b]] }
  0xa1   : > { %s2231_s15 = sld [smem:[#allocation6 + $0x9]] }
  0xa2   : > { %s2235_s28 = sld [smem:[#allocation6 + $0x17]] }
  0xa3   : > { %3541 = sst [smem:[#allocation58_spill]] %s2221_s27 }
  0xa4   : > { %3542 = sst [smem:[#allocation59_spill]] %s2223_s6 }
  0xa5   : > { %3543 = sst [smem:[#allocation60_spill]] %s2225_s19 }
  0xa6   : > { %3544 = sst [smem:[#allocation61_spill]] %s2227_s21 }
  0xa7   : > { %3546 = sst [smem:[#allocation63_spill]] %s2231_s15 }
  0xa8   : > { %3548 = sst [smem:[#allocation65_spill]] %s2235_s28 }
  0xa9   : > { %s2239_s18 = sld [smem:[#allocation6 + $0x25]] }
  0xaa   : > { %s2241_s4 = sld [smem:[#allocation6 + $0x2c]] }
  0xab   : > { %s2243_s27 = sld [smem:[#allocation6 + $0x35]] }
  0xac   : > { %s2245_s19 = sld [smem:[#allocation6 + $0x3c]] }
  0xad   : > { %s2247_s21 = sld [smem:[#allocation6 + $0x43]] }
  0xae   : > { %s2249_s15 = sld [smem:[#allocation6 + $0x4]] }
  0xaf   : > { %3550 = sst [smem:[#allocation67_spill]] %s2239_s18 }
  0xb0   : > { %3551 = sst [smem:[#allocation68_spill]] %s2241_s4 }
  0xb1   : > { %3552 = sst [smem:[#allocation69_spill]] %s2243_s27 }
  0xb2   : > { %3553 = sst [smem:[#allocation70_spill]] %s2245_s19 }
  0xb3   : > { %3554 = sst [smem:[#allocation71_spill]] %s2247_s21 }
  0xb4   : > { %3555 = sst [smem:[#allocation72_spill]] %s2249_s15 }
  0xb5   : > { %s2253_s28 = sld [smem:[#allocation6 + $0x12]] }
  0xb6   : > { %s2257_s4 = sld [smem:[#allocation6 + $0x20]] }
  0xb7   : > { %s2259_s27 = sld [smem:[#allocation6 + $0x27]] }
  0xb8   : > { %s2261_s19 = sld [smem:[#allocation6 + $0x2e]] }
  0xb9   : > { %s2263_s21 = sld [smem:[#allocation6 + $0x1a]] }
  0xba   : > { %s2265_s15 = sld [smem:[#allocation6 + $0x5]] }
  0xbb   : > { %3557 = sst [smem:[#allocation74_spill]] %s2253_s28 }
  0xbc   : > { %3559 = sst [smem:[#allocation76_spill]] %s2257_s4 }
  0xbd   : > { %3560 = sst [smem:[#allocation77_spill]] %s2259_s27 }
  0xbe   : > { %3561 = sst [smem:[#allocation78_spill]] %s2261_s19 }
  0xbf   : > { %3562 = sst [smem:[#allocation79_spill]] %s2263_s21 }
  0xc0   : > { %s2269_s28 = sld [smem:[#allocation6 + $0x3d]] }
  0xc1   : > { %s2273_s4 = sld [smem:[#allocation6 + $0x44]] }
  0xc2   : > { %s2278_s21 = sld [smem:[#allocation6 + $0x51]] }
  0xc3   : > { %s2478_s18 = sld [smem:[#allocation6 + $0x1b]] }
  0xc4   : > { %s3683_s19 = sld [smem:[#allocation38_spill]] }
  0xc5   : > { %s3684_s6 = sld [smem:[#allocation39_spill]] }
  0xc6   : > { %3564 = sst [smem:[#allocation81_spill]] %s2269_s28 }
  0xc7   : > { %3566 = sst [smem:[#allocation83_spill]] %s2273_s4 }
  0xc8   : > { %3567 = sst [smem:[#allocation84_spill]] %s2278_s21 }
  0xc9   : > { %s2287_s4 = sld [smem:[#allocation6 + $0x13]] }
  0xca   : > { %s3572_s21 = sld [smem:[#allocation35_spill]] }
  0xe9   : > { %v244_v9 = vpop.xlane.xlu1 %243  ;;  %v236_v10 = vpop.xlane.xlu0 %235 }
  0xea   : > { %v240_v11 = vmul.f32 0.00390625, %v236_v10  ;;  %v265_v13 = vmul.f32 %v248_v8, %v244_v9  ;;  %v359_v10 = vsel %vm357_vm8, 1, %v1746_v56 }
  0xec   : > { %v252_v16 = vmul.f32 %v248_v8, %v240_v11  ;;  %v267_v19 = vsel %vm254_vm0, %v265_v13, 0.0  ;;  %v355_v8 = vadd.s32 %v353_v4, %v349_v3  ;;  %v398_v13 = vadd.s32 %v396_v7, %v392_v6 }
  0xed   : > { %v247_v14 = vpop.xlane.xlu1 %246  ;;  %v239_v15 = vpop.xlane.xlu0 %238 }
  0xee   : > { %v266_v17 = vmul.f32 %v249_v12, %v247_v14  ;;  %v241_v18 = vmul.f32 0.00390625, %v239_v15  ;;  %v255_v23 = vsel %vm254_vm0, %v252_v16, 0.0  ;;  %v402_v15 = vsel %vm400_vm9, 1, %v1746_v56 }
  0xef   : > { %v361_v16 = vadd.s32 %v359_v10, %v355_v8 }
  0xf0   : > { %v268_v20 = vsel %vm254_vm0, %v266_v17, 0.0  ;;  %v253_v21 = vmul.f32 %v249_v12, %v241_v18  ;;  %v365_v17 = vsel %vm363_vm10, 1, %v1746_v56  ;;  %v404_v18 = vadd.s32 %v402_v15, %v398_v13 }
  0xf1   : > { %v269_v22 = vadd.f32 %v268_v20, %v267_v19  ;;  %v408_v19 = vsel %vm406_vm11, 1, %v1746_v56  ;;  %v367_v20 = vadd.s32 %v365_v17, %v361_v16 }
  0xf2   : > { %v256_v24 = vsel %vm254_vm0, %v253_v21, 0.0  ;;  %v371_v21 = vsel %vm369_vm12, 1, %v1746_v56 }
  0xf3   : > { %v270_v25 = vrot.slane %v269_v22, 4  ;;  %v257_v26 = vadd.f32 %v256_v24, %v255_v23  ;;  %v414_v23 = vsel %vm412_vm13, 1, %v1746_v56  ;;  %v373_v24 = vadd.s32 %v371_v21, %v367_v20 }
  0xf5   : > { %v271_v27 = vadd.f32 %v270_v25, %v269_v22  ;;  %v258_v28 = vrot.slane %v257_v26, 4  ;;  %v410_v22 = vadd.s32 %v408_v19, %v404_v18 }
  0xf7   : > { %v272_v29 = vrot.slane %v271_v27, 2  ;;  %v259_v30 = vadd.f32 %v258_v28, %v257_v26  ;;  %v416_v25 = vadd.s32 %v414_v23, %v410_v22  ;;  %v420_v26 = vsel %vm418_vm14, 1, %v1746_v56 }
  0xf9   : > { %v273_v31 = vadd.f32 %v272_v29, %v271_v27  ;;  %v260_v32 = vrot.slane %v259_v30, 2  ;;  %v423_v27 = vmul.u32 16, %v373_v24 }
  0xfb   : > { %v261_v33 = vadd.f32 %v260_v32, %v259_v30  ;;  %v274_v34 = vrot.slane %v273_v31, 1  ;;  %v422_v32 = vadd.s32 %v420_v26, %v416_v25 }
  0xfd   : > { %v262_v35 = vrot.slane %v261_v33, 1  ;;  %v275_v36 = vadd.f32 %v274_v34, %v273_v31 }
  0xff   : > { %v263_v37 = vadd.f32 %v262_v35, %v261_v33  ;;  %v276_v39 = vmax.f32 %v275_v36, 0.0  ;;  %v1994_v35 = vsub.s32 %v1956_v48, %v423_v27 }
 0x101   : > { %v264_v38 = vmax.f32 %v263_v37, 0.0  ;;  %vm485_vm15 = vcmp.ge.s32.totalorder %v1994_v35, 4294967294  ;;  %vm477_vm3 = vcmp.ge.s32.totalorder %v1994_v35, 4294967293  ;;  %vm479_vm5 = vcmp.lt.s32.totalorder %v1994_v35, 13 }
 0x102   : > { %vm493_vm7 = vcmp.ge.s32.totalorder %v1994_v35, 4294967295  ;;  %vm495_vm8 = vcmp.lt.s32.totalorder %v1994_v35, 15  ;;  %vm481_vm9 = vmand %vm477_vm3, %vm479_vm5  ;;  %vm509_vm14 = vcmp.ge.s32.totalorder %v1994_v35, 1  ;;  %vm501_vm5 = vcmp.ge.s32.totalorder %v1994_v35, 0 }
 0x103   : > { %v277_v42 = vadd.f32 %v276_v39, %v264_v38  ;;  %vm497_vm12 = vmand %vm493_vm7, %vm495_vm8  ;;  %v483_v62 = vsel %vm481_vm9, 1.0, %v3432_v60 }
 0x104   : > { %v499_v4 = vsel %vm497_vm12, 1.0, %v3432_v60 }
 0x105   : > { %v279_v43 = vmul.f32 %v277_v42, %v251_v40  ;;  %v278_v44 = vmul.f32 %v277_v42, %v250_v41 }
 0x107   : > { %v283_v45 = vsel %vm254_vm0, %v279_v43, 0.0  ;;  %v280_v46 = vsel %vm254_vm0, %v278_v44, 0.0  ;;  %vm487_vm0 = vcmp.lt.s32.totalorder %v1994_v35, 14 }
 0x108   : > { %284 = vadd.xlane.f32.xlu1 %v283_v45  ;;  %281 = vadd.xlane.f32.xlu0 %v280_v46  ;;  %vm489_vm6 = vmand %vm485_vm15, %vm487_vm0  ;;  %vm511_vm15 = vcmp.lt.s32.totalorder %v1994_v35, 17 }
 0x109   : > { %v2016_v61 = vsel %vm489_vm6, 1.0, %v3432_v60  ;;  %vm503_vm6 = vcmp.lt.s32.totalorder %v1994_v35, 16  ;;  %vm2034_vm7 = vmand %vm509_vm14, %vm511_vm15 }
 0x10a   : > { %v515_v15 = vsel %vm2034_vm7, 1.0, %v3432_v60  ;;  %vm519_vm7 = vcmp.lt.s32.totalorder %v1994_v35, 18 }
 0x191   : > { %v285_v49 = vpop.xlane.xlu1 %284  ;;  %v282_v50 = vpop.xlane.xlu0 %281 }
 0x192   : > { %v287_v51 = vsub.f32 0.0, %v285_v49  ;;  %v286_v52 = vsub.f32 0.0, %v282_v50 }
 0x194   : > { %v290_v54 = vmul.f32 1.442695, %v287_v51  ;;  %v288_v55 = vmul.f32 1.442695, %v286_v52 }
 0x196   : > { %1613 = vpow2.f32 %v290_v54 }
 0x197   : > { %1615 = vpow2.f32 %v288_v55 }
 0x1a3   : > { %v1614_v9 = vpop.eup %1613 }
 0x1a4   : > { %v1616_v11 = vpop.eup %1615  ;;  %v293_v12 = vadd.f32 1.0, %v1614_v9 }
 0x1a5   : > { %v292_v14 = vadd.f32 1.0, %v1616_v11 }
 0x1a6   : > { %1617 = vrcp.f32 %v293_v12 }
 0x1a7   : > { %1619 = vrcp.f32 %v292_v14 }
 0x1b3   : > { %v1618_v28 = vpop.eup %1617 }
 0x1b4   : > { %v1620_v29 = vpop.eup %1619  ;;  %v1982_v30 = vmul.f32 %v1618_v28, %v1925_v2  ;;  %v1985_v31 = vmul.f32 %v1618_v28, %v1931_v5 }
 0x1b5   : > { %v1988_v33 = vmul.f32 %v1620_v29, %v1921_v0  ;;  %v1991_v34 = vmul.f32 %v1620_v29, %v1923_v1  ;;  %v424_v0 = vmul.u32 16, %v422_v32 }
 0x1b6   : > { %3501 = vst [vmem:[#allocation22_spill] sm:$0xff] %v1982_v30  ;;  %3502 = vst [vmem:[#allocation23_spill] sm:$0xff] %v1985_v31 }
 0x1b7   : > { %3503 = vst [vmem:[#allocation24_spill] sm:$0xff] %v1988_v33  ;;  %3504 = vst [vmem:[#allocation25_spill] sm:$0xff] %v1991_v34  ;;  %v302_v36 = vadd.f32 %v1982_v30, %v1988_v33  ;;  %v309_v2 = vadd.f32 %v1985_v31, %v1991_v34  ;;  %v318_v5 = vmax.f32 %v1988_v33, %v1982_v30 }
 0x1b8   : > { %v325_v37 = vmax.f32 %v1991_v34, %v1985_v31  ;;  %v2009_v45 = vsub.s32 %v1959_v53, %v424_v0 }
 0x1b9   : > { %v303_v38 = vrot.slane %v302_v36, 4  ;;  %v310_v39 = vrot.slane %v309_v2, 4  ;;  %v319_v1 = vrot.slane %v318_v5, 4 }
 0x1ba   : > { %v326_v40 = vrot.slane %v325_v37, 4  ;;  %vm478_vm10 = vcmp.ge.s32.totalorder %v2009_v45, 4294967293  ;;  %vm480_vm11 = vcmp.lt.s32.totalorder %v2009_v45, 13  ;;  %vm486_vm0 = vcmp.ge.s32.totalorder %v2009_v45, 4294967294 }
 0x1bb   : > { %v304_v41 = vadd.f32 %v303_v38, %v302_v36  ;;  %v311_v42 = vadd.f32 %v310_v39, %v309_v2  ;;  %v320_v43 = vmax.f32 %v318_v5, %v319_v1  ;;  %vm482_vm13 = vmand %vm478_vm10, %vm480_vm11  ;;  %vm488_vm3 = vcmp.lt.s32.totalorder %v2009_v45, 14 }
 0x1bc   : > { %v327_v44 = vmax.f32 %v325_v37, %v326_v40  ;;  %v484_v9 = vsel %vm482_vm13, 1.0, %v3432_v60  ;;  %vm502_vm8 = vcmp.ge.s32.totalorder %v2009_v45, 0  ;;  %vm504_vm9 = vcmp.lt.s32.totalorder %v2009_v45, 16  ;;  %vm490_vm10 = vmand %vm486_vm0, %vm488_vm3 }
 0x1bd   : > { %v305_v46 = vrot.slane %v304_v41, 2  ;;  %v312_v49 = vrot.slane %v311_v42, 2  ;;  %v321_v50 = vrot.slane %v320_v43, 2  ;;  %vm494_vm11 = vcmp.ge.s32.totalorder %v2009_v45, 4294967295  ;;  %vm505_vm13 = vmand %vm501_vm5, %vm503_vm6 }
 0x1be   : > { %v328_v51 = vrot.slane %v327_v44, 2  ;;  %vm496_vm12 = vcmp.lt.s32.totalorder %v2009_v45, 15  ;;  %vm506_vm14 = vmand %vm502_vm8, %vm504_vm9  ;;  %v492_v16 = vsel %vm490_vm10, 1.0, %v3432_v60  ;;  %v507_v19 = vsel %vm505_vm13, 1.0, %v3432_v60 }
 0x1bf   : > { %v306_v52 = vadd.f32 %v305_v46, %v304_v41  ;;  %v313_v54 = vadd.f32 %v312_v49, %v311_v42  ;;  %v322_v55 = vmax.f32 %v320_v43, %v321_v50  ;;  %vm498_vm15 = vmand %vm494_vm11, %vm496_vm12  ;;  %vm510_vm0 = vcmp.ge.s32.totalorder %v2009_v45, 1 }
 0x1c0   : > { %v329_v56 = vmax.f32 %v327_v44, %v328_v51  ;;  %vm512_vm3 = vcmp.lt.s32.totalorder %v2009_v45, 17  ;;  %v508_v20 = vsel %vm506_vm14, 1.0, %v3432_v60  ;;  %v500_v23 = vsel %vm498_vm15, 1.0, %v3432_v60 }
 0x1c1   : > { %v323_v57 = vrot.slane %v322_v55, 1  ;;  %v314_v59 = vrot.slane %v313_v54, 1  ;;  %v307_v63 = vrot.slane %v306_v52, 1  ;;  %vm514_vm5 = vmand %vm510_vm0, %vm512_vm3  ;;  %vm517_vm6 = vcmp.ge.s32.totalorder %v1994_v35, 2 }
 0x1c2   : > { %v330_v58 = vrot.slane %v329_v56, 1  ;;  %v516_v32 = vsel %vm514_vm5, 1.0, %v3432_v60  ;;  %vm521_vm8 = vmand %vm517_vm6, %vm519_vm7  ;;  %vm518_vm9 = vcmp.ge.s32.totalorder %v2009_v45, 2  ;;  %vm520_vm10 = vcmp.lt.s32.totalorder %v2009_v45, 18 }
 0x1c3   : > { %v2019_v3 = vmax.f32 %v322_v55, %v323_v57  ;;  %v315_v11 = vadd.f32 %v314_v59, %v313_v54  ;;  %v308_v12 = vadd.f32 %v307_v63, %v306_v52  ;;  %v523_v0 = vsel %vm521_vm8, 1.0, %v3432_v60  ;;  %vm522_vm11 = vmand %vm518_vm9, %vm520_vm10 }
 0x1c4   : > { %v2030_v8 = vmax.f32 %v329_v56, %v330_v58  ;;  %v524_v41 = vsel %vm522_vm11, 1.0, %v3432_v60  ;;  %vm525_vm12 = vcmp.ge.s32.totalorder %v1994_v35, 3  ;;  %vm527_vm13 = vcmp.lt.s32.totalorder %v1994_v35, 19 }
 0x1c5   : > { %v552_v6 = vmul.f32 %v2016_v61, %v2019_v3  ;;  %v535_v7 = vmul.f32 %v483_v62, %v2019_v3  ;;  %v569_v13 = vmul.f32 %v499_v4, %v2019_v3  ;;  %v2056_v17 = vmul.f32 0.0625, %v315_v11  ;;  %vm529_vm14 = vmand %vm525_vm12, %vm527_vm13 }
 0x1c6   : > { %v536_v14 = vmul.f32 %v484_v9, %v2030_v8  ;;  %v2060_v18 = vmul.f32 0.0625, %v308_v12  ;;  %v590_v21 = vmul.f32 %v515_v15, %v2019_v3  ;;  %v553_v22 = vmul.f32 %v492_v16, %v2030_v8 }
 0x1c7   : > { %561 = vrot.lane.b32.xlu0 %v552_v6, %s1748_s13  ;;  %544 = vrot.lane.b32.xlu1 %v535_v7, %s1749_s14  ;;  %v2070_v24 = vmul.f32 %v508_v20, %v2056_v17  ;;  %v2073_v25 = vmul.f32 %v507_v19, %v2019_v3  ;;  %v2078_v26 = vmul.f32 %v508_v20, %v2030_v8  ;;  %v531_v35 = vsel %vm529_vm14, 1.0, %v3432_v60 }
 0x1c8   : > { %v2081_v27 = vmul.f32 %v507_v19, %v2060_v18  ;;  %v570_v28 = vmul.f32 %v500_v23, %v2030_v8  ;;  %v533_v29 = vmul.f32 %v483_v62, %v2060_v18  ;;  %v591_v36 = vmul.f32 %v516_v32, %v2030_v8 }
 0x1c9   : > { %v550_v2 = vmul.f32 %v2016_v61, %v2060_v18  ;;  %v534_v5 = vmul.f32 %v484_v9, %v2056_v17  ;;  %v567_v37 = vmul.f32 %v499_v4, %v2060_v18  ;;  %v551_v38 = vmul.f32 %v492_v16, %v2056_v17 }
 0x1ca   : > { %v607_v39 = vmul.f32 %v523_v0, %v2019_v3  ;;  %v568_v1 = vmul.f32 %v500_v23, %v2056_v17  ;;  %v588_v40 = vmul.f32 %v515_v15, %v2060_v18  ;;  %v608_v42 = vmul.f32 %v524_v41, %v2030_v8 }
 0x1cb   : > { %578 = vrot.lane.b32.xlu0 %v569_v13, %s1750_s22  ;;  %546 = vrot.lane.b32.xlu1 %v536_v14, %s1749_s14  ;;  %v605_v43 = vmul.f32 %v523_v0, %v2060_v18  ;;  %v589_v44 = vmul.f32 %v516_v32, %v2056_v17  ;;  %v622_v46 = vmul.f32 %v531_v35, %v2060_v18  ;;  %vm526_vm15 = vcmp.ge.s32.totalorder %v2009_v45, 3 }
 0x1cc   : > { %vm528_vm0 = vcmp.lt.s32.totalorder %v2009_v45, 19  ;;  %v606_v49 = vmul.f32 %v524_v41, %v2056_v17  ;;  %v624_v50 = vmul.f32 %v531_v35, %v2019_v3  ;;  %v962_v54 = vstv %s2102_s11  ;;  %s3569_s11 = sld [smem:[#allocation32_spill]] }
 0x1cd   : > { %vm530_vm3 = vmand %vm526_vm15, %vm528_vm0  ;;  %v967_v55 = vstv %s2095_s5  ;;  %v677_v56 = vstv %s2106_s26  ;;  %v682_v57 = vstv %s2099_s10  ;;  %v772_v58 = vstv %s2114_s9  ;;  %s3570_s5 = sld [smem:[#allocation33_spill]] }
 0x1ce   : > { %v532_v45 = vsel %vm530_vm3, 1.0, %v3432_v60  ;;  %v777_v59 = vstv %s2110_s29  ;;  %v872_v61 = vstv %s2116_s20  ;;  %v867_v62 = vstv %s2120_s30  ;;  %s3571_s26 = sld [smem:[#allocation34_spill]] }
 0x1cf   : > { %599 = vrot.lane.b32.xlu0 %v590_v21, %s3354_s23  ;;  %563 = vrot.lane.b32.xlu1 %v553_v22, %s1748_s13  ;;  %v623_v51 = vmul.f32 %v532_v45, %v2056_v17  ;;  %v625_v52 = vmul.f32 %v532_v45, %v2030_v8  ;;  %v1050_v63 = vstv %s2126_s8  ;;  %v1055_v3 = vstv %s2122_s12  ;;  %s2302_s20 = sld [smem:[#allocation6 + $0xd]] }
 0x1d0   : > { %v646_v6 = vstv %s2143_s0  ;;  %v1245_v9 = vstv %s2137_s7  ;;  %v931_v12 = vstv %s2154_s2  ;;  %v1019_v13 = vstv %s2158_s3  ;;  %s2308_s12 = sld [smem:[#allocation6 + $0x37]] }
 0x1d1   : > { %v1114_v14 = vstv %s2161_s16  ;;  %v848_v18 = vstv %s3572_s21  ;;  %v2318_v23 = vmul.f32 %v962_v54, %v2070_v24  ;;  %s2338_s29 = sld [smem:[#allocation6 + $0x3e]]  ;;  %v2342_v0 = vmul.f32 %v677_v56, %v2081_v27 }
 0x1d2   : > { %v1209_v15 = vstv %s3569_s11  ;;  %s2350_s30 = sld [smem:[#allocation6 + $0x14]]  ;;  %v2357_v41 = vmul.f32 %v772_v58, %v2081_v27  ;;  %v2366_v35 = vmul.f32 %v867_v62, %v2070_v24  ;;  %v2383_v45 = vmul.f32 %v1050_v63, %v2070_v24 }
 0x1d3   : > { %580 = vrot.lane.b32.xlu1 %v570_v28, %s1750_s22  ;;  %537 = vrot.lane.b32.xlu0 %v533_v29, %s1749_s14  ;;  %v658_v16 = vstv %s3570_s5  ;;  %3582 = vst [vmem:[#allocation88_spill] sm:$0xff] %v2318_v23  ;;  %v2321_v28 = vmul.f32 %v967_v55, %v2073_v25  ;;  %v2324_v29 = vmul.f32 %v677_v56, %v2070_v24  ;;  %3591 = vst [vmem:[#allocation95_spill] sm:$0xff] %v2342_v0  ;;  %s2362_s8 = sld [smem:[#allocation6 + $0x21]] }
 0x1d4   : > { %v753_v17 = vstv %s3571_s26  ;;  %3597 = vst [vmem:[#allocation100_spill] sm:$0xff] %v2357_v41  ;;  %3601 = vst [vmem:[#allocation103_spill] sm:$0xff] %v2366_v35  ;;  %s2377_s5 = sld [smem:[#allocation6 + $0x45]]  ;;  %vm541_vm5 = vcmp.lt.s32.totalorder %v1956_v48, 3  ;;  %vm558_vm6 = vcmp.lt.s32.totalorder %v1956_v48, 2  ;;  %vm575_vm7 = vcmp.lt.s32.totalorder %v1956_v48, 1 }
 0x1d5   : > { %3583 = vst [vmem:[#allocation89_spill] sm:$0xff] %v2321_v28  ;;  %3584 = vst [vmem:[#allocation90_spill] sm:$0xff] %v2324_v29  ;;  %s2398_s16 = sld [smem:[#allocation6 + $0x60]]  ;;  %vm596_vm8 = vcmp.lt.s32.totalorder %v1956_v48, 127  ;;  %vm613_vm9 = vcmp.lt.s32.totalorder %v1956_v48, 126  ;;  %vm630_vm10 = vcmp.lt.s32.totalorder %v1956_v48, 125 }
 0x1d6   : > { %3608 = vst [vmem:[#allocation109_spill] sm:$0xff] %v2383_v45  ;;  %s3643_s9 = sld [smem:[#allocation69_spill]]  ;;  %vm822_vm11 = vcmp.lt.s32.totalorder %v1956_v48, 32  ;;  %vm727_vm12 = vcmp.lt.s32.totalorder %v1956_v48, 48  ;;  %vm917_vm13 = vcmp.lt.s32.totalorder %v1956_v48, 16  ;;  %vm1195_vm14 = vcmp.lt.s32.totalorder %v1956_v48, 96 }
 0x1d7   : > { %601 = vrot.lane.b32.xlu1 %v591_v36, %s3354_s23  ;;  %554 = vrot.lane.b32.xlu0 %v550_v2, %s1748_s13  ;;  %v2330_v36 = vmul.f32 %v967_v55, %v2078_v26  ;;  %v2333_v2 = vmul.f32 %v962_v54, %v2081_v27  ;;  %v2390_v54 = vmul.f32 %v1050_v63, %v2081_v27  ;;  %s3644_s11 = sld [smem:[#allocation70_spill]]  ;;  %vm1290_vm0 = vcmp.lt.s32.totalorder %v1956_v48, 80 }
 0x1d8   : > { %3594 = sst [smem:[#allocation98_spill]] %s2350_s30  ;;  %v2393_v55 = vmul.f32 %v1055_v3, %v2073_v25 }
 0x1d9   : > { %3587 = vst [vmem:[#allocation92_spill] sm:$0xff] %v2330_v36  ;;  %3588 = vst [vmem:[#allocation93_spill] sm:$0xff] %v2333_v2  ;;  %3599 = sst [smem:[#allocation102_spill]] %s2362_s8 }
 0x1da   : > { %3606 = sst [smem:[#allocation107_spill]] %s2377_s5  ;;  %3612 = vst [vmem:[#allocation111_spill] sm:$0xff] %v2390_v54  ;;  %3614 = vst [vmem:[#allocation112_spill] sm:$0xff] %v2393_v55 }
 0x1db   : > { %539 = vrot.lane.b32.xlu1 %v534_v5, %s1749_s14  ;;  %571 = vrot.lane.b32.xlu0 %v567_v37, %s1750_s22  ;;  %s2135_s14 = sld [smem:[#allocation6 + $0x26]]  ;;  %v2336_v5 = vmul.f32 %v682_v57, %v2078_v26 }
 0x1dc   : > { %3616 = sst [smem:[#allocation114_spill]] %s2398_s16 }
 0x1dd   : > { %3589 = vst [vmem:[#allocation94_spill] sm:$0xff] %v2336_v5  ;;  %s2434_s8 = sld [smem:[#allocation6 + $0x4b]] }
 0x1de   : > { %s2440_s30 = sld [smem:[#allocation6 + $0x53]] }
 0x1df   : > { %556 = vrot.lane.b32.xlu1 %v551_v38, %s1748_s13  ;;  %616 = vrot.lane.b32.xlu0 %v607_v39, %s3352_s25  ;;  %s2131_s13 = sld [smem:[#allocation6 + $0x57]]  ;;  %v2345_v38 = vmul.f32 %v682_v57, %v2073_v25  ;;  %v2348_v39 = vmul.f32 %v772_v58, %v2070_v24 }
 0x1e0   : > { %s2141_s25 = sld [smem:[#allocation6 + $0x2d]] }
 0x1e1   : > { %v1145_v7 = vstv %s2135_s14  ;;  %s2326_s14 = sld [smem:[#allocation6 + $0x5f]]  ;;  %3592 = vst [vmem:[#allocation96_spill] sm:$0xff] %v2345_v38  ;;  %3593 = vst [vmem:[#allocation97_spill] sm:$0xff] %v2348_v39 }
 0x1e2   : > { %v2396_v56 = vmul.f32 %v1145_v7, %v2070_v24  ;;  %s2447_s3 = sld [smem:[#allocation6 + $0x29]] }
 0x1e3   : > { %573 = vrot.lane.b32.xlu1 %v568_v1, %s1750_s22  ;;  %592 = vrot.lane.b32.xlu0 %v588_v40, %s3354_s23  ;;  %s2147_s22 = sld [smem:[#allocation6 + $0x38]]  ;;  %v2354_v40 = vmul.f32 %v777_v59, %v2078_v26 }
 0x1e4   : > { %s2150_s23 = sld [smem:[#allocation6 + $0x3f]]  ;;  %3615 = vst [vmem:[#allocation113_spill] sm:$0xff] %v2396_v56 }
 0x1e5   : > { %v1150_v4 = vstv %s2131_s13  ;;  %3596 = vst [vmem:[#allocation99_spill] sm:$0xff] %v2354_v40  ;;  %s2374_s13 = sld [smem:[#allocation6 + $0x59]] }
 0x1e6   : > { %v1240_v8 = vstv %s2141_s25  ;;  %s2314_s25 = sld [smem:[#allocation6 + $0x58]]  ;;  %v2402_v58 = vmul.f32 %v1150_v4, %v2078_v26 }
 0x1e7   : > { %618 = vrot.lane.b32.xlu1 %v608_v42, %s3508_s1  ;;  %609 = vrot.lane.b32.xlu0 %v605_v43, %s3508_s1  ;;  %3585 = sst [smem:[#allocation91_spill]] %s2326_s14  ;;  %v2360_v42 = vmul.f32 %v777_v59, %v2073_v25  ;;  %v2407_v59 = vmul.f32 %v1145_v7, %v2081_v27  ;;  %v2416_v63 = vmul.f32 %v1240_v8, %v2070_v24 }
 0x1e8   : > { %3619 = vst [vmem:[#allocation115_spill] sm:$0xff] %v2402_v58  ;;  %v2424_v7 = vmul.f32 %v1240_v8, %v2081_v27  ;;  %3636 = sst [smem:[#allocation124_spill]] %s2434_s8 }
 0x1e9   : > { %3509 = sst [smem:[#allocation27_spill]] %s2147_s22  ;;  %v741_v10 = vstv %s2147_s22  ;;  %3598 = vst [vmem:[#allocation101_spill] sm:$0xff] %v2360_v42  ;;  %3623 = vst [vmem:[#allocation117_spill] sm:$0xff] %v2407_v59 }
 0x1ea   : > { %3510 = sst [smem:[#allocation28_spill]] %s2150_s23  ;;  %v836_v11 = vstv %s2150_s23  ;;  %3628 = vst [vmem:[#allocation120_spill] sm:$0xff] %v2416_v63  ;;  %3632 = vst [vmem:[#allocation122_spill] sm:$0xff] %v2424_v7  ;;  %v3694_v7 = vstv %s3684_s6 }
 0x1eb   : > { %594 = vrot.lane.b32.xlu1 %v589_v44, %s3513_s24  ;;  %626 = vrot.lane.b32.xlu0 %v622_v46, %s1753_s17  ;;  %s2175_s24 = sld [smem:[#allocation6 + $0x47]]  ;;  %v2369_v44 = vmul.f32 %v872_v61, %v2078_v26  ;;  %v2372_v46 = vmul.f32 %v867_v62, %v2081_v27  ;;  %v2432_v62 = vmul.f32 %v1245_v9, %v2073_v25 }
 0x1ec   : > { %3580 = sst [smem:[#allocation87_spill]] %s2314_s25 }
 0x1ed   : > { %3602 = vst [vmem:[#allocation104_spill] sm:$0xff] %v2369_v44  ;;  %3603 = vst [vmem:[#allocation105_spill] sm:$0xff] %v2372_v46  ;;  %3604 = sst [smem:[#allocation106_spill]] %s2374_s13 }
 0x1ee   : > { %s2404_s23 = sld [smem:[#allocation6 + $0x28]]  ;;  %3635 = vst [vmem:[#allocation123_spill] sm:$0xff] %v2432_v62  ;;  %v3691_v62 = vstv %s3683_s19 }
 0x1ef   : > { %611 = vrot.lane.b32.xlu1 %v606_v49, %s3508_s1  ;;  %633 = vrot.lane.b32.xlu0 %v624_v50, %s1753_s17  ;;  %s2187_s1 = sld [smem:[#allocation6 + $0x3a]]  ;;  %v2380_v50 = vmul.f32 %v872_v61, %v2073_v25  ;;  %v2410_v61 = vmul.f32 %v1150_v4, %v2073_v25 }
 0x1f0   : > { %s2413_s13 = sld [smem:[#allocation6 + $0x22]] }
 0x1f1   : > { %3519 = sst [smem:[#allocation36_spill]] %s2175_s24  ;;  %3607 = vst [vmem:[#allocation108_spill] sm:$0xff] %v2380_v50  ;;  %3624 = vst [vmem:[#allocation118_spill] sm:$0xff] %v2410_v61 }
 0x1f2   : > { %s2193_s24 = sld [smem:[#allocation6 + $0x4f]] }
 0x1f3   : > { %628 = vrot.lane.b32.xlu1 %v623_v51, %s1753_s17  ;;  %s3573_s10 = sld [smem:[#allocation36_spill]]  ;;  %v2386_v51 = vmul.f32 %v1055_v3, %v2078_v26  ;;  %v2421_v3 = vmul.f32 %v1245_v9, %v2078_v26 }
 0x1f4   : > { %3621 = sst [smem:[#allocation116_spill]] %s2404_s23 }
 0x1f5   : > { %3524 = sst [smem:[#allocation41_spill]] %s2187_s1  ;;  %3609 = vst [vmem:[#allocation110_spill] sm:$0xff] %v2386_v51  ;;  %3630 = vst [vmem:[#allocation121_spill] sm:$0xff] %v2421_v3  ;;  %v3695_v3 = vmov %v3694_v7 }
 0x1f6   : > { %s2207_s1 = sld [smem:[#allocation6 + $0x15]] }
 0x1f7   : > { %635 = vrot.lane.b32.xlu1 %v625_v52, %s1753_s17  ;;  %s2211_s17 = sld [smem:[#allocation6 + $0x23]] }
 0x1f8   : > { %3527 = sst [smem:[#allocation44_spill]] %s2193_s24 }
 0x1f9   : > { %s2215_s24 = sld [smem:[#allocation6 + $0x1]]  ;;  %v943_v19 = vstv %s3573_s10 }
 0x1fa   : > { %3626 = sst [smem:[#allocation119_spill]] %s2413_s13 }
 0x1fb   : > { %3641 = sst [smem:[#allocation125_spill]] %s2440_s30 }
 0x1fc   : > { %3534 = sst [smem:[#allocation51_spill]] %s2207_s1 }
 0x1fd   : > { %3536 = sst [smem:[#allocation53_spill]] %s2211_s17 }
 0x1fe   : > { %s2229_s1 = sld [smem:[#allocation6 + $0x2]] }
 0x1ff   : > { %3538 = sst [smem:[#allocation55_spill]] %s2215_s24 }
 0x200   : > { %s2233_s17 = sld [smem:[#allocation6 + $0x10]] }
 0x201   : > { %s2237_s24 = sld [smem:[#allocation6 + $0x1e]] }
 0x202   : > { %3645 = sst [smem:[#allocation69_spill]] %s2447_s3 }
 0x203   : > { %s3649_s8 = sld [smem:[#allocation71_spill]] }
 0x204   : > { %3545 = sst [smem:[#allocation62_spill]] %s2229_s1 }
 0x205   : > { %s2453_s30 = sld [smem:[#allocation6 + $0x2f]] }
 0x206   : > { %3547 = sst [smem:[#allocation64_spill]] %s2233_s17 }
 0x207   : > { %3549 = sst [smem:[#allocation66_spill]] %s2237_s24 }
 0x208   : > { %s2251_s17 = sld [smem:[#allocation6 + $0xb]] }
 0x209   : > { %s2255_s24 = sld [smem:[#allocation6 + $0x19]] }
 0x20a   : > { %s2459_s16 = sld [smem:[#allocation6 + $0x5a]] }
 0x20b   : > { %s2465_s1 = sld [smem:[#allocation6 + $0x30]] }
 0x20c   : > { %s2472_s5 = sld [smem:[#allocation6 + $0x61]] }
 0x20d   : > { %s3657_s7 = sld [smem:[#allocation84_spill]] }
 0x20e   : > { %3556 = sst [smem:[#allocation73_spill]] %s2251_s17 }
 0x20f   : > { %3558 = sst [smem:[#allocation75_spill]] %s2255_s24 }
 0x210   : > { %s2267_s17 = sld [smem:[#allocation6 + $0x36]] }
 0x211   : > { %s2271_s24 = sld [smem:[#allocation6 + $0xc]] }
 0x212   : > { %3658 = sst [smem:[#allocation70_spill]] %s2478_s18 }
 0x213   : > { %s3661_s2 = sld [smem:[#allocation91_spill]]  ;;  %v3742_v0 = vstv %s3657_s7 }
 0x214   : > { %s2484_s0 = sld [smem:[#allocation6 + $0x4c]] }
 0x215   : > { %s3663_s10 = sld [smem:[#allocation107_spill]] }
 0x216   : > { %3563 = sst [smem:[#allocation80_spill]] %s2267_s17 }
 0x217   : > { %3565 = sst [smem:[#allocation82_spill]] %s2271_s24 }
 0x218   : > { %s2281_s17 = sld [smem:[#allocation6 + $0x6]] }
 0x219   : > { %s2293_s24 = sld [smem:[#allocation6 + $0x52]] }
 0x21a   : > { %s3655_s26 = sld [smem:[#allocation82_spill]] }
 0x21b   : > { %3662 = sst [smem:[#allocation71_spill]] %s2484_s0 }
 0x21c   : > { %s3664_s27 = sld [smem:[#allocation102_spill]] }
 0x21d   : > { %s3668_s21 = sld [smem:[#allocation116_spill]] }
 0x21e   : > { %3568 = sst [smem:[#allocation85_spill]] %s2281_s17 }
 0x21f   : > { %3574 = sst [smem:[#allocation86_spill]] %s2293_s24 }
 0x220   : > { %s3654_s25 = sld [smem:[#allocation85_spill]] }
 0x221   : > { %s3660_s17 = sld [smem:[#allocation87_spill]] }
 0x222   : > { %s3669_s13 = sld [smem:[#allocation125_spill]] }
 0x223   : > { %s3682_s22 = sld [smem:[#allocation37_spill]] }
 0x224   : > { %s3685_s23 = sld [smem:[#allocation40_spill]] }
 0x225   : > { %s3686_s0 = sld [smem:[#allocation41_spill]] }
 0x226   : > { %s3687_s3 = sld [smem:[#allocation42_spill]] }
 0x227   : > { %s3690_s18 = sld [smem:[#allocation43_spill]] }
 0x228   : > { %s3693_s28 = sld [smem:[#allocation44_spill]] }
 0x229   : > { %v3688_v34 = vstv %s3682_s22  ;;  %s3696_s14 = sld [smem:[#allocation45_spill]] }
 0x22a   : > { %v3689_v33 = vmov %v3688_v34  ;;  %v3697_v63 = vstv %s3685_s23  ;;  %s3699_s24 = sld [smem:[#allocation46_spill]] }
 0x22b   : > { %v3698_v61 = vmov %v3697_v63  ;;  %v3700_v59 = vstv %s3686_s0  ;;  %s3702_s22 = sld [smem:[#allocation47_spill]] }
 0x22c   : > { %s3721_s0 = sld [smem:[#allocation51_spill]] }
 0x22d   : > { %v3710_v54 = vstv %s3690_s18  ;;  %s3728_s19 = sld [smem:[#allocation48_spill]] }
 0x22e   : > { %s3732_s6 = sld [smem:[#allocation49_spill]] }
 0x22f   : > { %s3736_s23 = sld [smem:[#allocation50_spill]] }
 0x230   : > { %s3770_s7 = sld [smem:[#allocation58_spill]] }
 0x231   : > { %v3725_v41 = vstv %s3702_s22  ;;  %s3776_s18 = sld [smem:[#allocation59_spill]] }
 0x235   : > { %v3758_v23 = vstv %s3736_s23  ;;  %s3801_s23 = sld [smem:[#allocation66_spill]] }
 0x236   : > { %v3759_v2 = vmov %v3758_v23 }
 0x239   : > { %v562_v8 = vpop.permute.xlu0 %561  ;;  %v545_v47 = vpop.permute.xlu1 %544 }
 0x23d   : > { %v579_v26 = vpop.permute.xlu0 %578  ;;  %v547_v60 = vpop.permute.xlu1 %546 }
 0x23e   : > { %v548_v27 = vsel %vm541_vm5, %v545_v47, %v547_v60  ;;  %v549_v9 = vsel %vm541_vm5, %v547_v60, %v545_v47 }
 0x23f   : > { %v2520_v60 = vmul.f32 %v646_v6, %v549_v9  ;;  %v2524_v24 = vmul.f32 %v646_v6, %v548_v27  ;;  %v2528_v25 = vmul.f32 %v741_v10, %v549_v9  ;;  %v2533_v37 = vmul.f32 %v741_v10, %v548_v27 }
 0x240   : > { %v2537_v47 = vmul.f32 %v836_v11, %v549_v9  ;;  %v2545_v52 = vmul.f32 %v836_v11, %v548_v27  ;;  %v2549_v4 = vmul.f32 %v931_v12, %v549_v9  ;;  %v2553_v10 = vmul.f32 %v931_v12, %v548_v27 }
 0x241   : > { %v564_v49 = vpop.permute.xlu1 %563  ;;  %v2557_v43 = vmul.f32 %v1019_v13, %v549_v9  ;;  %v600_v57 = vpop.permute.xlu0 %599  ;;  %v2561_v32 = vmul.f32 %v1019_v13, %v548_v27  ;;  %v2565_v11 = vmul.f32 %v1114_v14, %v549_v9  ;;  %v2573_v12 = vmul.f32 %v1209_v15, %v549_v9 }
 0x242   : > { %v565_v6 = vsel %vm558_vm6, %v562_v8, %v564_v49  ;;  %v566_v1 = vsel %vm558_vm6, %v564_v49, %v562_v8  ;;  %v2569_v49 = vmul.f32 %v1114_v14, %v548_v27  ;;  %v2577_v8 = vmul.f32 %v1209_v15, %v548_v27 }
 0x243   : > { %v2581_v13 = vmul.f32 %v658_v16, %v566_v1  ;;  %v2585_v22 = vmul.f32 %v658_v16, %v565_v6  ;;  %v2589_v14 = vmul.f32 %v753_v17, %v566_v1  ;;  %v2593_v9 = vmul.f32 %v753_v17, %v565_v6 }
 0x244   : > { %v2597_v15 = vmul.f32 %v848_v18, %v566_v1  ;;  %v2605_v20 = vmul.f32 %v848_v18, %v565_v6  ;;  %v2609_v31 = vmul.f32 %v943_v19, %v566_v1  ;;  %v2613_v17 = vmul.f32 %v943_v19, %v565_v6 }
 0x245   : > { %v581_v21 = vpop.permute.xlu1 %580  ;;  %v2617_v30 = vmul.f32 %v3688_v34, %v566_v1  ;;  %v2621_v53 = vmul.f32 %v3689_v33, %v565_v6  ;;  %v3692_v18 = vmov %v3691_v62  ;;  %v2633_v19 = vmul.f32 %v3694_v7, %v566_v1  ;;  %v538_v58 = vpop.permute.xlu0 %537 }
 0x246   : > { %v582_v27 = vsel %vm575_vm7, %v579_v26, %v581_v21  ;;  %v583_v16 = vsel %vm575_vm7, %v581_v21, %v579_v26  ;;  %v2625_v21 = vmul.f32 %v3691_v62, %v566_v1  ;;  %v2629_v26 = vmul.f32 %v3692_v18, %v565_v6 }
 0x247   : > { %v2637_v34 = vmul.f32 %v3695_v3, %v565_v6  ;;  %v2641_v33 = vmul.f32 %v3697_v63, %v583_v16  ;;  %v2645_v62 = vmul.f32 %v3698_v61, %v582_v27  ;;  %v2649_v18 = vmul.f32 %v3700_v59, %v583_v16 }
 0x248   : > { %v3703_v7 = vmov %v3700_v59  ;;  %v3705_v3 = vstv %s3687_s3  ;;  %v2671_v51 = vmul.f32 %v3710_v54, %v583_v16  ;;  %s3772_s3 = sld [smem:[#allocation57_spill]] }
 0x249   : > { %3701 = vst [vmem:[#allocation126_spill] sm:$0xff] %v2649_v18  ;;  %v602_v1 = vpop.permute.xlu1 %601  ;;  %v2653_v56 = vmul.f32 %v3703_v7, %v582_v27  ;;  %v2657_v6 = vmul.f32 %v3705_v3, %v583_v16  ;;  %v3708_v59 = vmov %v3705_v3  ;;  %v3711_v7 = vmov %v3710_v54 }
 0x24a   : > { %v2661_v63 = vsel %vm596_vm8, %v600_v57, %v602_v1  ;;  %v604_v61 = vsel %vm596_vm8, %v602_v1, %v600_v57  ;;  %v2667_v55 = vmul.f32 %v3708_v59, %v582_v27  ;;  %v2675_v45 = vmul.f32 %v3711_v7, %v582_v27 }
 0x24b   : > { %3704 = vst [vmem:[#allocation127_spill] sm:$0xff] %v2653_v56  ;;  %3706 = vst [vmem:[#allocation128_spill] sm:$0xff] %v2657_v6  ;;  %v3712_v3 = vstv %s3693_s28  ;;  %v3716_v57 = vstv %s3696_s14  ;;  %v3720_v54 = vstv %s3699_s24  ;;  %s3778_s28 = sld [smem:[#allocation60_spill]] }
 0x24c   : > { %3707 = vst [vmem:[#allocation129_spill] sm:$0xff] %v2661_v63  ;;  %3709 = vst [vmem:[#allocation130_spill] sm:$0xff] %v2667_v55  ;;  %v2679_v50 = vmul.f32 %v3712_v3, %v583_v16  ;;  %v3714_v46 = vmov %v3712_v3  ;;  %v2687_v1 = vmul.f32 %v3716_v57, %v583_v16  ;;  %v3718_v59 = vmov %v3716_v57  ;;  %s3781_s14 = sld [smem:[#allocation61_spill]] }
 0x24d   : > { %v2683_v44 = vmul.f32 %v3714_v46, %v582_v27  ;;  %v2691_v35 = vmul.f32 %v3718_v59, %v582_v27  ;;  %v2695_v7 = vmul.f32 %v3720_v54, %v583_v16  ;;  %v3723_v42 = vmov %v3720_v54  ;;  %v540_v40 = vpop.permute.xlu1 %539  ;;  %s3788_s24 = sld [smem:[#allocation62_spill]] }
 0x24e   : > { %3713 = vst [vmem:[#allocation131_spill] sm:$0xff] %v2679_v50  ;;  %3717 = vst [vmem:[#allocation133_spill] sm:$0xff] %v2687_v1  ;;  %v2699_v3 = vmul.f32 %v3723_v42, %v582_v27  ;;  %v2703_v46 = vmul.f32 %v3725_v41, %v604_v61  ;;  %v3727_v57 = vstv %s3643_s9  ;;  %v542_v42 = vsel %vm541_vm5, %v538_v58, %v540_v40  ;;  %s3743_s9 = sld [smem:[#allocation52_spill]] }
 0x24f   : > { %3715 = vst [vmem:[#allocation132_spill] sm:$0xff] %v2683_v44  ;;  %3719 = vst [vmem:[#allocation134_spill] sm:$0xff] %v2691_v35  ;;  %v2707_v38 = vmul.f32 %v3727_v57, %v604_v61  ;;  %v3730_v59 = vmov %v3727_v57  ;;  %v543_v41 = vsel %vm541_vm5, %v540_v40, %v538_v58  ;;  %v3733_v27 = vstv %s3644_s11  ;;  %s3750_s11 = sld [smem:[#allocation53_spill]] }
 0x250   : > { %3722 = vst [vmem:[#allocation135_spill] sm:$0xff] %v2695_v7  ;;  %3724 = vst [vmem:[#allocation136_spill] sm:$0xff] %v2699_v3  ;;  %v2712_v39 = vmul.f32 %v3730_v59, %v2661_v63  ;;  %v2720_v16 = vmul.f32 %v3733_v27, %v604_v61  ;;  %v3735_v54 = vmov %v3733_v27  ;;  %v3738_v59 = vstv %s3649_s8  ;;  %s3769_s8 = sld [smem:[#allocation54_spill]] }
 0x251   : > { %3726 = vst [vmem:[#allocation137_spill] sm:$0xff] %v2703_v46  ;;  %3729 = vst [vmem:[#allocation138_spill] sm:$0xff] %v2707_v38  ;;  %v2725_v57 = vmul.f32 %v3735_v54, %v2661_v63  ;;  %v555_v46 = vpop.permute.xlu0 %554  ;;  %v3740_v38 = vmov %v3738_v59  ;;  %v2738_v40 = vmul.f32 %v3742_v0, %v604_v61  ;;  %v3745_v58 = vmov %v3742_v0  ;;  %v557_v28 = vpop.permute.xlu1 %556 }
 0x252   : > { %3731 = vst [vmem:[#allocation139_spill] sm:$0xff] %v2712_v39  ;;  %3734 = vst [vmem:[#allocation140_spill] sm:$0xff] %v2720_v16  ;;  %v2729_v39 = vmul.f32 %v3738_v59, %v604_v61  ;;  %v2734_v5 = vmul.f32 %v3740_v38, %v2661_v63  ;;  %v2743_v27 = vmul.f32 %v3745_v58, %v2661_v63  ;;  %v3747_v54 = vstv %s3721_s0  ;;  %s3794_s0 = sld [smem:[#allocation63_spill]] }
 0x253   : > { %3737 = vst [vmem:[#allocation141_spill] sm:$0xff] %v2725_v57  ;;  %3744 = vst [vmem:[#allocation144_spill] sm:$0xff] %v2738_v40  ;;  %v927_v57 = vmul.f32 %v3747_v54, %v543_v41  ;;  %v3748_v16 = vmov %v3747_v54  ;;  %v3754_v40 = vstv %s3728_s19  ;;  %v833_v35 = vmul.f32 %v3759_v2, %v542_v42  ;;  %s3797_s19 = sld [smem:[#allocation64_spill]] }
 0x254   : > { %3739 = vst [vmem:[#allocation142_spill] sm:$0xff] %v2729_v39  ;;  %3741 = vst [vmem:[#allocation143_spill] sm:$0xff] %v2734_v5  ;;  %v928_v59 = vmul.f32 %v3748_v16, %v542_v42  ;;  %v3749_v39 = vstv %s3660_s17  ;;  %v642_v5 = vmul.f32 %v3754_v40, %v543_v41  ;;  %v3755_v3 = vmov %v3754_v40  ;;  %s3762_s17 = sld [smem:[#allocation55_spill]] }
 0x255   : > { %3746 = vst [vmem:[#allocation145_spill] sm:$0xff] %v2743_v27  ;;  %v2751_v29 = vmul.f32 %v3749_v39, %v604_v61  ;;  %v3752_v38 = vmov %v3749_v39  ;;  %v643_v58 = vmul.f32 %v3755_v3, %v542_v42  ;;  %v3756_v27 = vstv %s3732_s6  ;;  %s3798_s6 = sld [smem:[#allocation65_spill]] }
 0x256   : > { %v2756_v0 = vmul.f32 %v3752_v38, %v2661_v63  ;;  %v737_v7 = vmul.f32 %v3756_v27, %v543_v41  ;;  %v3757_v36 = vmov %v3756_v27  ;;  %v832_v16 = vmul.f32 %v3758_v23, %v543_v41 }
 0x257   : > { %3751 = vst [vmem:[#allocation146_spill] sm:$0xff] %v2751_v29  ;;  %v738_v54 = vmul.f32 %v3757_v36, %v542_v42  ;;  %v934_v39 = vadd.f32 %v2549_v4, %v927_v57  ;;  %v935_v29 = vadd.f32 %v2553_v10, %v928_v59  ;;  %v3760_v1 = vstv %s3743_s9  ;;  %s3805_s9 = sld [smem:[#allocation67_spill]] }
 0x258   : > { %3753 = vst [vmem:[#allocation147_spill] sm:$0xff] %v2756_v0  ;;  %v1015_v38 = vmul.f32 %v3760_v1, %v543_v41  ;;  %v3761_v0 = vmov %v3760_v1  ;;  %v3763_v44 = vstv %s3661_s2  ;;  %v3767_v23 = vstv %s3750_s11  ;;  %s3771_s2 = sld [smem:[#allocation56_spill]] }
 0x259   : > { %v1016_v40 = vmul.f32 %v3761_v0, %v542_v42  ;;  %v2778_v3 = vmul.f32 %v3763_v44, %v604_v61  ;;  %v3765_v36 = vmov %v3763_v44  ;;  %v1110_v50 = vmul.f32 %v3767_v23, %v543_v41  ;;  %v572_v0 = vpop.permute.xlu0 %571  ;;  %s3809_s11 = sld [smem:[#allocation68_spill]] }
 0x25a   : > { %v2783_v27 = vmul.f32 %v3765_v36, %v2661_v63  ;;  %v3768_v2 = vmov %v3767_v23  ;;  %v559_v10 = vsel %vm558_vm6, %v555_v46, %v557_v28  ;;  %v560_v1 = vsel %vm558_vm6, %v557_v28, %v555_v46  ;;  %v574_v36 = vpop.permute.xlu1 %573 }
 0x25b   : > { %3764 = vst [vmem:[#allocation148_spill] sm:$0xff] %v2778_v3  ;;  %v1111_v4 = vmul.f32 %v3768_v2, %v542_v42  ;;  %v649_v57 = vadd.f32 %v2520_v60, %v642_v5  ;;  %v650_v44 = vadd.f32 %v2524_v24, %v643_v58  ;;  %v744_v61 = vadd.f32 %v2528_v25, %v737_v7 }
 0x25c   : > { %3766 = vst [vmem:[#allocation149_spill] sm:$0xff] %v2783_v27  ;;  %v745_v59 = vadd.f32 %v2533_v37, %v738_v54  ;;  %v839_v23 = vadd.f32 %v2537_v47, %v832_v16  ;;  %v840_v28 = vadd.f32 %v2545_v52, %v833_v35  ;;  %v3773_v46 = vstv %s3762_s17  ;;  %s3818_s17 = sld [smem:[#allocation72_spill]] }
 0x25d   : > { %v654_v5 = vmul.f32 %v3773_v46, %v560_v1  ;;  %v3774_v60 = vmov %v3773_v46  ;;  %v1022_v24 = vadd.f32 %v2557_v43, %v1015_v38  ;;  %v1023_v25 = vadd.f32 %v2561_v32, %v1016_v40  ;;  %v2833_v56 = vpop.permute.xlu0 %616 }
 0x25e   : > { %v655_v2 = vmul.f32 %v3774_v60, %v559_v10  ;;  %v3775_v7 = vstv %s3769_s8  ;;  %v1117_v27 = vadd.f32 %v2565_v11, %v1110_v50  ;;  %v1118_v35 = vadd.f32 %v2569_v49, %v1111_v4  ;;  %s3820_s8 = sld [smem:[#allocation75_spill]] }
 0x25f   : > { %v1205_v37 = vmul.f32 %v3775_v7, %v543_v41  ;;  %v3777_v58 = vmov %v3775_v7  ;;  %v3779_v52 = vstv %s3770_s7  ;;  %v3782_v43 = vstv %s3771_s2  ;;  %s3822_s7 = sld [smem:[#allocation73_spill]] }
 0x260   : > { %v1206_v54 = vmul.f32 %v3777_v58, %v542_v42  ;;  %v939_v47 = vmul.f32 %v3779_v52, %v560_v1  ;;  %v3780_v16 = vmov %v3779_v52  ;;  %v749_v32 = vmul.f32 %v3782_v43, %v560_v1  ;;  %v2823_v58 = vpop.permute.xlu1 %618  ;;  %s3824_s2 = sld [smem:[#allocation74_spill]] }
 0x261   : > { %v940_v46 = vmul.f32 %v3780_v16, %v559_v10  ;;  %v3783_v38 = vmov %v3782_v43  ;;  %v3784_v41 = vstv %s3772_s3  ;;  %3786 = vst [vmem:[#allocation150_spill] sm:$0xff] %v2823_v58  ;;  %v656_v50 = vadd.f32 %v654_v5, %v649_v57  ;;  %s3830_s3 = sld [smem:[#allocation76_spill]] }
 0x262   : > { %v750_v40 = vmul.f32 %v3783_v38, %v559_v10  ;;  %v844_v60 = vmul.f32 %v3784_v41, %v560_v1  ;;  %v3785_v7 = vmov %v3784_v41  ;;  %v657_v11 = vadd.f32 %v655_v2, %v650_v44 }
 0x263   : > { %v845_v42 = vmul.f32 %v3785_v7, %v559_v10  ;;  %v941_v63 = vadd.f32 %v939_v47, %v934_v39  ;;  %v942_v49 = vadd.f32 %v940_v46, %v935_v29  ;;  %v3787_v4 = vstv %s3776_s18  ;;  %s3833_s18 = sld [smem:[#allocation77_spill]] }
 0x264   : > { %v1027_v52 = vmul.f32 %v3787_v4, %v560_v1  ;;  %v3789_v3 = vmov %v3787_v4  ;;  %v3790_v55 = vstv %s3778_s28  ;;  %v3792_v41 = vstv %s3781_s14  ;;  %s3836_s28 = sld [smem:[#allocation78_spill]] }
 0x265   : > { %v1028_v16 = vmul.f32 %v3789_v3, %v559_v10  ;;  %v1122_v43 = vmul.f32 %v3790_v55, %v560_v1  ;;  %v3791_v6 = vmov %v3790_v55  ;;  %v1217_v7 = vmul.f32 %v3792_v41, %v560_v1  ;;  %s3847_s14 = sld [smem:[#allocation80_spill]] }
 0x266   : > { %v1123_v38 = vmul.f32 %v3791_v6, %v559_v10  ;;  %v3793_v18 = vmov %v3792_v41  ;;  %v2841_v39 = vsel %vm575_vm7, %v572_v0, %v574_v36  ;;  %v577_v29 = vsel %vm575_vm7, %v574_v36, %v572_v0 }
 0x267   : > { %v1218_v58 = vmul.f32 %v3793_v18, %v559_v10  ;;  %v1212_v57 = vadd.f32 %v2573_v12, %v1205_v37  ;;  %v1213_v3 = vadd.f32 %v2577_v8, %v1206_v54  ;;  %v751_v55 = vadd.f32 %v749_v32, %v744_v61  ;;  %v595_v12 = vpop.permute.xlu1 %594 }
 0x268   : > { %v752_v44 = vadd.f32 %v750_v40, %v745_v59  ;;  %v661_v6 = vadd.f32 %v2581_v13, %v656_v50  ;;  %v662_v1 = vadd.f32 %v2585_v22, %v657_v11  ;;  %v3795_v18 = vstv %s3788_s24  ;;  %s3857_s24 = sld [smem:[#allocation81_spill]] }
 0x269   : > { %v666_v10 = vmul.f32 %v3795_v18, %v577_v29  ;;  %v3796_v5 = vmov %v3795_v18  ;;  %v846_v47 = vadd.f32 %v844_v60, %v839_v23  ;;  %v847_v46 = vadd.f32 %v845_v42, %v840_v28 }
 0x26a   : > { %v667_v2 = vmul.f32 %v3796_v5, %v2841_v39  ;;  %v1029_v0 = vadd.f32 %v1027_v52, %v1022_v24  ;;  %v1030_v36 = vadd.f32 %v1028_v16, %v1023_v25  ;;  %v1124_v37 = vadd.f32 %v1122_v43, %v1117_v27  ;;  %v593_v24 = vpop.permute.xlu0 %592 }
 0x26b   : > { %v1125_v8 = vadd.f32 %v1123_v38, %v1118_v35  ;;  %v1219_v61 = vadd.f32 %v1217_v7, %v1212_v57  ;;  %v1220_v13 = vadd.f32 %v1218_v58, %v1213_v3  ;;  %v756_v22 = vadd.f32 %v2589_v14, %v751_v55  ;;  %v2883_v41 = vpop.permute.xlu1 %611 }
 0x26c   : > { %v757_v59 = vadd.f32 %v2593_v9, %v752_v44  ;;  %v3799_v54 = vstv %s3794_s0  ;;  %v668_v25 = vadd.f32 %v666_v10, %v661_v6  ;;  %v669_v27 = vadd.f32 %v667_v2, %v662_v1  ;;  %s1756_s0 = smov 16  }
 0x26d   : > { %v761_v32 = vmul.f32 %v3799_v54, %v577_v29  ;;  %v3800_v23 = vmov %v3799_v54  ;;  %v946_v35 = vadd.f32 %v2609_v31, %v941_v63  ;;  %v947_v40 = vadd.f32 %v2613_v17, %v942_v49 }
 0x26e   : > { %v762_v28 = vmul.f32 %v3800_v23, %v2841_v39  ;;  %v851_v14 = vadd.f32 %v2597_v15, %v846_v47  ;;  %v852_v9 = vadd.f32 %v2605_v20, %v847_v46  ;;  %v3802_v60 = vstv %s3797_s19  ;;  %v610_v10 = vpop.permute.xlu0 %609  ;;  %v3815_v23 = vld [vmem:[#allocation127_spill] sm:$0xff]  ;;  %s3941_s19 = sld [smem:[#allocation70_spill]] }
 0x26f   : > { %v856_v42 = vmul.f32 %v3802_v60, %v577_v29  ;;  %v3803_v58 = vmov %v3802_v60  ;;  %v3804_v11 = vstv %s3798_s6  ;;  %v1034_v17 = vadd.f32 %v2617_v30, %v1029_v0  ;;  %s3948_s6 = sld [smem:[#allocation71_spill]] }
 0x270   : > { %v857_v50 = vmul.f32 %v3803_v58, %v2841_v39  ;;  %v951_v4 = vmul.f32 %v3804_v11, %v577_v29  ;;  %v3806_v52 = vmov %v3804_v11  ;;  %v1035_v63 = vadd.f32 %v2621_v53, %v1030_v36 }
 0x271   : > { %v952_v31 = vmul.f32 %v3806_v52, %v2841_v39  ;;  %v763_v49 = vadd.f32 %v761_v32, %v756_v22  ;;  %v764_v15 = vadd.f32 %v762_v28, %v757_v59  ;;  %v3807_v16 = vstv %s3801_s23 }
 0x272   : > { %v1039_v20 = vmul.f32 %v3807_v16, %v577_v29  ;;  %v3808_v43 = vmov %v3807_v16  ;;  %v953_v7 = vadd.f32 %v951_v4, %v946_v35  ;;  %v1129_v3 = vadd.f32 %v2625_v21, %v1124_v37  ;;  %v627_v58 = vpop.permute.xlu0 %626  ;;  %v3827_v4 = vld [vmem:[#allocation93_spill] sm:$0xff] }
 0x273   : > { %v1040_v38 = vmul.f32 %v3808_v43, %v2841_v39  ;;  %v954_v57 = vadd.f32 %v952_v31, %v947_v40  ;;  %v1130_v55 = vadd.f32 %v2629_v26, %v1125_v8  ;;  %v858_v44 = vadd.f32 %v856_v42, %v851_v14  ;;  %v3828_v31 = vld [vmem:[#allocation88_spill] sm:$0xff] }
 0x274   : > { %v859_v30 = vadd.f32 %v857_v50, %v852_v9  ;;  %v3810_v6 = vstv %s3805_s9  ;;  %v958_v5 = vadd.f32 %v2671_v51, %v953_v7  ;;  %v1041_v47 = vadd.f32 %v1039_v20, %v1034_v17  ;;  %v3823_v9 = vld [vmem:[#allocation150_spill] sm:$0xff]  ;;  %v3825_v50 = vld [vmem:[#allocation133_spill] sm:$0xff] }
 0x275   : > { %v1134_v53 = vmul.f32 %v3810_v6, %v577_v29  ;;  %v3811_v1 = vmov %v3810_v6  ;;  %v959_v2 = vadd.f32 %v2675_v45, %v954_v57  ;;  %v1042_v46 = vadd.f32 %v1040_v38, %v1035_v63  ;;  %v3814_v45 = vld [vmem:[#allocation126_spill] sm:$0xff]  ;;  %v3839_v6 = vld [vmem:[#allocation92_spill] sm:$0xff] }
 0x276   : > { %v1135_v18 = vmul.f32 %v3811_v1, %v2841_v39  ;;  %v673_v21 = vadd.f32 %v2641_v33, %v668_v25  ;;  %v674_v26 = vadd.f32 %v2645_v62, %v669_v27  ;;  %v1224_v0 = vadd.f32 %v2633_v19, %v1219_v61  ;;  %v3816_v33 = vld [vmem:[#allocation128_spill] sm:$0xff]  ;;  %v3817_v62 = vld [vmem:[#allocation130_spill] sm:$0xff]  ;;  %v3819_v61 = vld [vmem:[#allocation131_spill] sm:$0xff] }
 0x277   : > { %v1225_v36 = vadd.f32 %v2637_v34, %v1220_v13  ;;  %v1136_v37 = vadd.f32 %v1134_v53, %v1129_v3  ;;  %v3812_v22 = vstv %s3809_s11  ;;  %v768_v32 = vadd.f32 %v3814_v45, %v763_v49  ;;  %v629_v34 = vpop.permute.xlu1 %628  ;;  %v3840_v1 = vld [vmem:[#allocation135_spill] sm:$0xff] }
 0x278   : > { %v1137_v8 = vadd.f32 %v1135_v18, %v1130_v55  ;;  %v1229_v59 = vmul.f32 %v3812_v22, %v577_v29  ;;  %v3813_v51 = vmov %v3812_v22  ;;  %v769_v28 = vadd.f32 %v3815_v23, %v764_v15  ;;  %v3821_v29 = vld [vmem:[#allocation132_spill] sm:$0xff] }
 0x279   : > { %v1230_v54 = vmul.f32 %v3813_v51, %v2841_v39  ;;  %v2907_v25 = vadd.f32 %v3816_v33, %v858_v44  ;;  %v2910_v19 = vadd.f32 %v3817_v62, %v859_v30  ;;  %v2913_v13 = vadd.f32 %v3819_v61, %v1041_v47  ;;  %v3838_v44 = vld [vmem:[#allocation89_spill] sm:$0xff] }
 0x27a   : > { %v2916_v39 = vadd.f32 %v3821_v29, %v1042_v46  ;;  %v597_v27 = vsel %vm596_vm8, %v593_v24, %v595_v12  ;;  %v598_v35 = vsel %vm596_vm8, %v595_v12, %v593_v24  ;;  %v1231_v40 = vadd.f32 %v1229_v59, %v1224_v0  ;;  %v3826_v12 = vld [vmem:[#allocation134_spill] sm:$0xff] }
 0x27b   : > { %v1232_v14 = vadd.f32 %v1230_v54, %v1225_v36  ;;  %v2926_v60 = vsel %vm613_vm9, %v2833_v56, %v3823_v9  ;;  %v2932_v42 = vsel %vm613_vm9, %v3823_v9, %v2833_v56  ;;  %v2935_v11 = vadd.f32 %v3825_v50, %v1136_v37  ;;  %v636_v37 = vpop.permute.xlu1 %635  ;;  %v634_v9 = vpop.permute.xlu0 %633 }
 0x27c   : > { %v2938_v24 = vadd.f32 %v3826_v12, %v1137_v8  ;;  %v965_v52 = vadd.f32 %v3827_v4, %v958_v5  ;;  %v966_v17 = vadd.f32 %v3828_v31, %v959_v2  ;;  %v3829_v63 = vstv %s3818_s17  ;;  %v3841_v5 = vld [vmem:[#allocation136_spill] sm:$0xff]  ;;  %s3964_s17 = sld [smem:[#allocation18_spill]] }
 0x27d   : > { %v690_v49 = vmul.f32 %v3829_v63, %v597_v27  ;;  %v3831_v15 = vmov %v3829_v63  ;;  %v3832_v16 = vstv %s3820_s8  ;;  %v3835_v7 = vstv %s3822_s7  ;;  %v3850_v4 = vld [vmem:[#allocation90_spill] sm:$0xff] }
 0x27e   : > { %v691_v56 = vmul.f32 %v3831_v15, %v598_v35  ;;  %v975_v20 = vmul.f32 %v3832_v16, %v597_v27  ;;  %v3834_v43 = vmov %v3832_v16  ;;  %v785_v57 = vmul.f32 %v3835_v7, %v597_v27  ;;  %v3853_v16 = vld [vmem:[#allocation94_spill] sm:$0xff] }
 0x27f   : > { %v976_v38 = vmul.f32 %v3834_v43, %v598_v35  ;;  %v3837_v3 = vmov %v3835_v7  ;;  %v970_v30 = vadd.f32 %v3838_v44, %v965_v52  ;;  %v971_v53 = vadd.f32 %v3839_v6, %v966_v17  ;;  %v3856_v7 = vld [vmem:[#allocation97_spill] sm:$0xff]  ;;  %v3860_v6 = vld [vmem:[#allocation96_spill] sm:$0xff] }
 0x280   : > { %v786_v55 = vmul.f32 %v3837_v3, %v598_v35  ;;  %v2957_v18 = vadd.f32 %v3840_v1, %v1231_v40  ;;  %v2960_v2 = vadd.f32 %v3841_v5, %v1232_v14  ;;  %v3842_v47 = vstv %s3824_s2 }
 0x281   : > { %v2964_v46 = vmul.f32 %v3842_v47, %v597_v27  ;;  %v3843_v0 = vmov %v3842_v47  ;;  %v2968_v8 = vadd.f32 %v975_v20, %v970_v30  ;;  %v2970_v22 = vadd.f32 %v976_v38, %v971_v53 }
 0x282   : > { %v881_v36 = vmul.f32 %v3843_v0, %v598_v35  ;;  %v3844_v59 = vstv %s3830_s3  ;;  %v3846_v23 = vstv %s3833_s18  ;;  %v3849_v29 = vstv %s3836_s28  ;;  %s3967_s3 = sld [smem:[#allocation155_spill]]  ;;  %p3970_p0 = scmp.ne.s32.totalorder %s3964_s17, 0 }
 0x283   : > { %v2974_v51 = vmul.f32 %v3844_v59, %v597_v27  ;;  %v3845_v54 = vmov %v3844_v59  ;;  %v2982_v33 = vmul.f32 %v3846_v23, %v597_v27  ;;  %v3848_v62 = vmov %v3846_v23 }
 0x284   : > { %v2978_v45 = vmul.f32 %v3845_v54, %v598_v35  ;;  %v2986_v61 = vmul.f32 %v3848_v62, %v598_v35  ;;  %v2990_v40 = vmul.f32 %v3849_v29, %v597_v27  ;;  %v2995_v14 = vsel %vm613_vm9, %v2883_v41, %v610_v10 }
 0x285   : > { %v3000_v50 = vsel %vm613_vm9, %v610_v10, %v2883_v41  ;;  %v3004_v12 = vsel %vm630_vm10, %v629_v34, %v627_v58  ;;  %v3008_v27 = vsel %vm630_vm10, %v636_v37, %v634_v9  ;;  %v681_v52 = vadd.f32 %v3850_v4, %v674_v26  ;;  %v3852_v10 = vld [vmem:[#allocation95_spill] sm:$0xff] }
 0x286   : > { %v3851_v31 = vmov %v3849_v29  ;;  %v3017_v63 = vsel %vm630_vm10, %v627_v58, %v629_v34  ;;  %v3021_v41 = vsel %vm630_vm10, %v634_v9, %v636_v37  ;;  %v680_v15 = vadd.f32 %v3852_v10, %v673_v21  ;;  %v3863_v37 = vld [vmem:[#allocation99_spill] sm:$0xff] }
 0x287   : > { %v3013_v17 = vmul.f32 %v3851_v31, %v598_v35  ;;  %v686_v20 = vadd.f32 %v3853_v16, %v681_v52  ;;  %v3854_v26 = vstv %s2265_s15  ;;  %v3855_v35 = vstv %s3847_s14  ;;  %s3882_s15 = sld [smem:[#allocation83_spill]] }
 0x288   : > { %v703_v43 = vmul.f32 %v3854_v26, %v2995_v14  ;;  %v708_v38 = vmul.f32 %v3855_v35, %v2932_v42  ;;  %v776_v34 = vadd.f32 %v3856_v7, %v769_v28  ;;  %v3858_v58 = vstv %s3654_s25  ;;  %v3864_v28 = vld [vmem:[#allocation100_spill] sm:$0xff]  ;;  %s1755_s25 = smov 32  }
 0x289   : > { %v715_v3 = vmul.f32 %v3858_v58, %v3004_v12  ;;  %v3859_v44 = vstv %s2308_s12  ;;  %v685_v21 = vadd.f32 %v3860_v6, %v680_v15  ;;  %v3861_v53 = vmov %v3854_v26  ;;  %v3870_v26 = vld [vmem:[#allocation101_spill] sm:$0xff]  ;;  %v3874_v6 = vld [vmem:[#allocation103_spill] sm:$0xff]  ;;  %s3900_s12 = sld [smem:[#allocation119_spill]] }
 0x28a   : > { %v720_v30 = vmul.f32 %v3859_v44, %v3008_v27  ;;  %v702_v1 = vmul.f32 %v3861_v53, %v3000_v50  ;;  %v693_v5 = vadd.f32 %v691_v56, %v686_v20  ;;  %v3862_v47 = vmov %v3855_v35  ;;  %v3868_v56 = vld [vmem:[#allocation138_spill] sm:$0xff]  ;;  %v3871_v35 = vld [vmem:[#allocation139_spill] sm:$0xff] }
 0x28b   : > { %v707_v0 = vmul.f32 %v3862_v47, %v2926_v60  ;;  %v781_v59 = vadd.f32 %v3863_v37, %v776_v34  ;;  %v775_v54 = vadd.f32 %v3864_v28, %v768_v32  ;;  %v692_v23 = vadd.f32 %v690_v49, %v685_v21 }
 0x28c   : > { %v3865_v62 = vmov %v3858_v58  ;;  %v3866_v9 = vmov %v3859_v44  ;;  %v3867_v52 = vstv %s3655_s26  ;;  %v698_v10 = vadd.f32 %v3868_v56, %v693_v5  ;;  %s3885_s26 = sld [smem:[#allocation98_spill]] }
 0x28d   : > { %v714_v29 = vmul.f32 %v3865_v62, %v3017_v63  ;;  %v719_v4 = vmul.f32 %v3866_v9, %v3021_v41  ;;  %v798_v31 = vmul.f32 %v3867_v52, %v2995_v14  ;;  %v788_v15 = vadd.f32 %v786_v55, %v781_v59  ;;  %v3875_v55 = vld [vmem:[#allocation140_spill] sm:$0xff]  ;;  %v3878_v62 = vld [vmem:[#allocation104_spill] sm:$0xff] }
 0x28e   : > { %v3869_v16 = vstv %s3857_s24  ;;  %v780_v32 = vadd.f32 %v3870_v26, %v775_v54  ;;  %v697_v49 = vadd.f32 %v3871_v35, %v692_v23  ;;  %v3872_v7 = vstv %s2302_s20  ;;  %s3898_s20 = sld [smem:[#allocation86_spill]]  ;;  %s1760_s24 = smov [#allocation7]  }
 0x28f   : > { %v803_v20 = vmul.f32 %v3869_v16, %v2932_v42  ;;  %v810_v34 = vmul.f32 %v3872_v7, %v3004_v12  ;;  %v3873_v58 = vstv %s2338_s29  ;;  %v871_v21 = vadd.f32 %v3874_v6, %v2910_v19 }
 0x290   : > { %v815_v44 = vmul.f32 %v3873_v58, %v3008_v27  ;;  %v705_v53 = vadd.f32 %v703_v43, %v698_v10  ;;  %v793_v5 = vadd.f32 %v3875_v55, %v788_v15  ;;  %v787_v47 = vadd.f32 %v785_v57, %v780_v32  ;;  %v3880_v43 = vld [vmem:[#allocation141_spill] sm:$0xff] }
 0x291   : > { %v3876_v37 = vmov %v3867_v52  ;;  %v704_v28 = vadd.f32 %v702_v1, %v697_v49  ;;  %v3877_v54 = vmov %v3869_v16  ;;  %v876_v9 = vadd.f32 %v3878_v62, %v871_v21  ;;  %v3879_v52 = vld [vmem:[#allocation105_spill] sm:$0xff]  ;;  %v3884_v49 = vld [vmem:[#allocation108_spill] sm:$0xff] }
 0x292   : > { %v797_v59 = vmul.f32 %v3876_v37, %v3000_v50  ;;  %v802_v23 = vmul.f32 %v3877_v54, %v2926_v60  ;;  %v870_v56 = vadd.f32 %v3879_v52, %v2907_v25  ;;  %v710_v16 = vadd.f32 %v708_v38, %v705_v53  ;;  %v3887_v53 = vld [vmem:[#allocation142_spill] sm:$0xff]  ;;  %v3892_v52 = vld [vmem:[#allocation143_spill] sm:$0xff] }
 0x293   : > { %v800_v19 = vadd.f32 %v798_v31, %v793_v5  ;;  %v792_v10 = vadd.f32 %v3880_v43, %v787_v47  ;;  %v3881_v57 = vmov %v3872_v7  ;;  %v709_v26 = vadd.f32 %v707_v0, %v704_v28 }
 0x294   : > { %v809_v15 = vmul.f32 %v3881_v57, %v3017_v63  ;;  %v883_v32 = vadd.f32 %v881_v36, %v876_v9  ;;  %v3883_v1 = vstv %s2287_s4  ;;  %v875_v7 = vadd.f32 %v3884_v49, %v870_v56  ;;  %s1754_s4 = smov 48  }
 0x295   : > { %v893_v35 = vmul.f32 %v3883_v1, %v2995_v14  ;;  %v717_v58 = vadd.f32 %v715_v3, %v710_v16  ;;  %v805_v6 = vadd.f32 %v803_v20, %v800_v19  ;;  %v799_v25 = vadd.f32 %v797_v59, %v792_v10  ;;  %v3890_v20 = vld [vmem:[#allocation109_spill] sm:$0xff] }
 0x296   : > { %v3886_v38 = vstv %s2338_s29  ;;  %v716_v21 = vadd.f32 %v714_v29, %v709_v26  ;;  %v888_v55 = vadd.f32 %v3887_v53, %v883_v32  ;;  %v882_v0 = vadd.f32 %v2964_v46, %v875_v7  ;;  %s3893_s29 = sld [smem:[#allocation79_spill]]  ;;  %v3901_v7 = vld [vmem:[#allocation111_spill] sm:$0xff] }
 0x297   : > { %v814_v31 = vmul.f32 %v3886_v38, %v3021_v41  ;;  %v3888_v36 = vmov %v3883_v1  ;;  %v722_v47 = vadd.f32 %v720_v30, %v717_v58  ;;  %v804_v37 = vadd.f32 %v802_v23, %v799_v25  ;;  %v3904_v53 = vld [vmem:[#allocation144_spill] sm:$0xff] }
 0x298   : > { %v892_v5 = vmul.f32 %v3888_v36, %v3000_v50  ;;  %v3889_v28 = vstv %s3882_s15  ;;  %v1054_v59 = vadd.f32 %v3890_v20, %v2916_v39  ;;  %v721_v54 = vadd.f32 %v719_v4, %v716_v21  ;;  %v3896_v39 = vld [vmem:[#allocation110_spill] sm:$0xff]  ;;  %s1676_s15 = sshll.u32 %s1760_s24, 4  ;;  %s1677_s15 = int_to_ptr.vmem [resolvable:$false] %s1676_s15 }
 0x299   : > { %v898_v3 = vmul.f32 %v3889_v28, %v2932_v42  ;;  %v895_v62 = vadd.f32 %v893_v35, %v888_v55  ;;  %v3891_v29 = vstv %s3885_s26  ;;  %v887_v46 = vadd.f32 %v3892_v52, %v882_v0  ;;  %725 = vrot.lane.b32.xlu1 %v722_v47, %s1754_s4  ;;  %v3905_v0 = vld [vmem:[#allocation112_spill] sm:$0xff]  ;;  %s1678_s26 = scalar_lea.vmem %s1677_s15, 1024 }
 0x29a   : > { %v905_v9 = vmul.f32 %v3891_v29, %v3004_v12  ;;  %v812_v30 = vadd.f32 %v810_v34, %v805_v6  ;;  %v3894_v23 = vstv %s3663_s10  ;;  %v3895_v16 = vmov %v3889_v28  ;;  %723 = vrot.lane.b32.xlu0 %v721_v54, %s1754_s4  ;;  %s3914_s10 = sld [smem:[#allocation106_spill]] }
 0x29b   : > { %v910_v56 = vmul.f32 %v3894_v23, %v3008_v27  ;;  %v897_v19 = vmul.f32 %v3895_v16, %v2926_v60  ;;  %v1059_v4 = vadd.f32 %v3896_v39, %v1054_v59  ;;  %v811_v43 = vadd.f32 %v809_v15, %v804_v37 }
 0x29c   : > { %v900_v10 = vadd.f32 %v898_v3, %v895_v62  ;;  %v894_v57 = vadd.f32 %v892_v5, %v887_v46  ;;  %v3897_v26 = vmov %v3891_v29  ;;  %v817_v1 = vadd.f32 %v815_v44, %v812_v30 }
 0x29d   : > { %v904_v32 = vmul.f32 %v3897_v26, %v3017_v63  ;;  %v1066_v34 = vadd.f32 %v2978_v45, %v1059_v4  ;;  %v3899_v35 = vstv %s3664_s27  ;;  %v1053_v58 = vadd.f32 %v3901_v7, %v2913_v13  ;;  %v3906_v13 = vld [vmem:[#allocation113_spill] sm:$0xff]  ;;  %s3915_s27 = sld [smem:[#allocation69_spill]] }
 0x29e   : > { %v1076_v49 = vmul.f32 %v3899_v35, %v2995_v14  ;;  %v3902_v6 = vstv %s3893_s29  ;;  %v816_v25 = vadd.f32 %v814_v31, %v811_v43  ;;  %v899_v38 = vadd.f32 %v897_v19, %v894_v57  ;;  %820 = vrot.lane.b32.xlu1 %v817_v1, %s1755_s25  ;;  %v3913_v19 = vld [vmem:[#allocation117_spill] sm:$0xff] }
 0x29f   : > { %v3124_v15 = vmul.f32 %v3902_v6, %v2995_v14  ;;  %v3903_v21 = vmov %v3894_v23  ;;  %v907_v45 = vadd.f32 %v905_v9, %v900_v10  ;;  %v1071_v55 = vadd.f32 %v3904_v53, %v1066_v34  ;;  %v3910_v9 = vld [vmem:[#allocation115_spill] sm:$0xff]  ;;  %v3920_v34 = vld [vmem:[#allocation118_spill] sm:$0xff]  ;;  %v3922_v6 = vld [vmem:[#allocation146_spill] sm:$0xff] }
 0x2a0   : > { %v909_v44 = vmul.f32 %v3903_v21, %v3021_v41  ;;  %v1058_v36 = vadd.f32 %v3905_v0, %v1053_v58  ;;  %v1149_v5 = vadd.f32 %v3906_v13, %v2938_v24  ;;  %818 = vrot.lane.b32.xlu0 %v816_v25, %s1755_s25  ;;  %v906_v47 = vadd.f32 %v904_v32, %v899_v38 }
 0x2a1   : > { %v3907_v31 = vstv %s3898_s20  ;;  %v3908_v28 = vstv %s3900_s12  ;;  %v3909_v20 = vmov %v3899_v35  ;;  %v912_v54 = vadd.f32 %v910_v56, %v907_v45 }
 0x2a2   : > { %v1081_v37 = vmul.f32 %v3907_v31, %v2932_v42  ;;  %v1088_v3 = vmul.f32 %v3908_v28, %v3004_v12  ;;  %v1075_v59 = vmul.f32 %v3909_v20, %v3000_v50  ;;  %v1078_v62 = vadd.f32 %v1076_v49, %v1071_v55  ;;  %v3921_v49 = vld [vmem:[#allocation120_spill] sm:$0xff] }
 0x2a3   : > { %v1065_v29 = vadd.f32 %v2974_v51, %v1058_v36  ;;  %v1154_v24 = vadd.f32 %v3910_v9, %v1149_v5  ;;  %v911_v52 = vadd.f32 %v909_v44, %v906_v47  ;;  %v3911_v46 = vstv %s3669_s13  ;;  %915 = vrot.lane.b32.xlu1 %v912_v54, %s1756_s0  ;;  %v3916_v51 = vld [vmem:[#allocation145_spill] sm:$0xff]  ;;  %v3926_v36 = vld [vmem:[#allocation121_spill] sm:$0xff]  ;;  %s3929_s13 = sld [smem:[#allocation114_spill]]  ;;  %v3931_v54 = vld [vmem:[#allocation122_spill] sm:$0xff] }
 0x2a4   : > { %v1093_v30 = vmul.f32 %v3911_v46, %v3008_v27  ;;  %v3912_v23 = vmov %v3907_v31  ;;  %v1148_v39 = vadd.f32 %v3913_v19, %v2935_v11  ;;  %v1083_v56 = vadd.f32 %v1081_v37, %v1078_v62  ;;  %v3936_v19 = vld [vmem:[#allocation123_spill] sm:$0xff] }
 0x2a5   : > { %v1080_v16 = vmul.f32 %v3912_v23, %v2926_v60  ;;  %v1070_v4 = vadd.f32 %v3916_v51, %v1065_v29  ;;  %v1161_v43 = vadd.f32 %v2986_v61, %v1154_v24  ;;  %v3917_v10 = vstv %s3668_s21  ;;  %913 = vrot.lane.b32.xlu0 %v911_v52, %s1756_s0  ;;  %s1757_s21 = smov 112  }
 0x2a6   : > { %v1171_v57 = vmul.f32 %v3917_v10, %v2995_v14  ;;  %v3918_v26 = vmov %v3908_v28  ;;  %v3919_v11 = vmov %v3911_v46  ;;  %v1153_v35 = vadd.f32 %v3920_v34, %v1148_v39  ;;  %v3928_v28 = vld [vmem:[#allocation147_spill] sm:$0xff] }
 0x2a7   : > { %v1087_v32 = vmul.f32 %v3918_v26, %v3017_v63  ;;  %v1092_v1 = vmul.f32 %v3919_v11, %v3021_v41  ;;  %v1244_v7 = vadd.f32 %v3921_v49, %v2960_v2  ;;  %v1090_v58 = vadd.f32 %v1088_v3, %v1083_v56  ;;  %v3942_v49 = vld [vmem:[#allocation129_spill] sm:$0xff] }
 0x2a8   : > { %v1077_v61 = vadd.f32 %v1075_v59, %v1070_v4  ;;  %v1166_v25 = vadd.f32 %v3922_v6, %v1161_v43  ;;  %v3923_v38 = vstv %s3914_s10  ;;  %v3924_v44 = vstv %s3915_s27 }
 0x2a9   : > { %v1176_v21 = vmul.f32 %v3923_v38, %v2932_v42  ;;  %v1183_v45 = vmul.f32 %v3924_v44, %v3004_v12  ;;  %v1160_v53 = vadd.f32 %v2982_v33, %v1153_v35  ;;  %v3925_v55 = vmov %v3917_v10 }
 0x2aa   : > { %v1170_v0 = vmul.f32 %v3925_v55, %v3000_v50  ;;  %v1249_v13 = vadd.f32 %v3926_v36, %v1244_v7  ;;  %v1095_v2 = vadd.f32 %v1093_v30, %v1090_v58  ;;  %v1082_v5 = vadd.f32 %v1080_v16, %v1077_v61  ;;  %v3935_v16 = vld [vmem:[#allocation148_spill] sm:$0xff] }
 0x2ab   : > { %v1173_v47 = vadd.f32 %v1171_v57, %v1166_v25  ;;  %v3927_v31 = vstv %s2459_s16  ;;  %v1165_v3 = vadd.f32 %v3928_v28, %v1160_v53  ;;  %v3930_v33 = vstv %s2453_s30  ;;  %s3939_s16 = sld [smem:[#allocation124_spill]]  ;;  %v3947_v53 = vld [vmem:[#allocation137_spill] sm:$0xff]  ;;  %s1758_s30 = smov 96  }
 0x2ac   : > { %v1188_v37 = vmul.f32 %v3927_v31, %v3008_v27  ;;  %v1256_v20 = vadd.f32 %v3013_v17, %v1249_v13  ;;  %v1266_v59 = vmul.f32 %v3930_v33, %v2995_v14  ;;  %v1243_v62 = vadd.f32 %v3931_v54, %v2957_v18  ;;  %1098 = vrot.lane.b32.xlu1 %v1095_v2, %s1757_s21 }
 0x2ad   : > { %v1089_v29 = vadd.f32 %v1087_v32, %v1082_v5  ;;  %v1178_v9 = vadd.f32 %v1176_v21, %v1173_v47  ;;  %v3932_v24 = vmov %v3923_v38  ;;  %v3933_v46 = vmov %v3924_v44 }
 0x2ae   : > { %v1175_v52 = vmul.f32 %v3932_v24, %v2926_v60  ;;  %v1182_v17 = vmul.f32 %v3933_v46, %v3017_v63  ;;  %v1172_v30 = vadd.f32 %v1170_v0, %v1165_v3  ;;  %v3934_v23 = vmov %v3927_v31 }
 0x2af   : > { %v1187_v14 = vmul.f32 %v3934_v23, %v3021_v41  ;;  %v1261_v18 = vadd.f32 %v3935_v16, %v1256_v20  ;;  %v1248_v39 = vadd.f32 %v3936_v19, %v1243_v62  ;;  %v1094_v56 = vadd.f32 %v1092_v1, %v1089_v29 }
 0x2b0   : > { %v1185_v51 = vadd.f32 %v1183_v45, %v1178_v9  ;;  %v3937_v4 = vstv %s3929_s13  ;;  %v3938_v10 = vstv %s2465_s1  ;;  %v1177_v26 = vadd.f32 %v1175_v52, %v1172_v30  ;;  %v3946_v45 = vld [vmem:[#allocation149_spill] sm:$0xff]  ;;  %s1759_s1 = smov 80  }
 0x2b1   : > { %v1271_v43 = vmul.f32 %v3937_v4, %v2932_v42  ;;  %v1278_v57 = vmul.f32 %v3938_v10, %v3004_v12  ;;  %v1268_v32 = vadd.f32 %v1266_v59, %v1261_v18  ;;  %v1255_v11 = vadd.f32 %v2990_v40, %v1248_v39  ;;  %1096 = vrot.lane.b32.xlu0 %v1094_v56, %s1757_s21 }
 0x2b2   : > { %v3940_v34 = vmov %v3930_v33  ;;  %v3943_v1 = vstv %s3702_s22  ;;  %v3944_v58 = vstv %s3893_s29  ;;  %v1190_v6 = vadd.f32 %v1188_v37, %v1185_v51  ;;  %s3961_s22 = sld [smem:[#allocation20_spill]] }
 0x2b3   : > { %v1265_v35 = vmul.f32 %v3940_v34, %v3000_v50  ;;  %v980_v7 = vmul.f32 %v3943_v1, %v3942_v49  ;;  %v987_v61 = vmul.f32 %v3944_v58, %v3000_v50  ;;  %v3945_v25 = vstv %s2472_s5  ;;  %s3960_s5 = sld [smem:[#allocation15_spill]] }
 0x2b4   : > { %v1283_v38 = vmul.f32 %v3945_v25, %v3008_v27  ;;  %v1184_v21 = vadd.f32 %v1182_v17, %v1177_v26  ;;  %v1273_v44 = vadd.f32 %v1271_v43, %v1268_v32  ;;  %v1260_v40 = vadd.f32 %v3946_v45, %v1255_v11  ;;  %1193 = vrot.lane.b32.xlu1 %v1190_v6, %s1758_s30 }
 0x2b5   : > { %v983_v55 = vadd.f32 %v3947_v53, %v2970_v22  ;;  %v3949_v0 = vmov %v3937_v4  ;;  %v3950_v50 = vmov %v3938_v10  ;;  %v3951_v2 = vstv %s3939_s16 }
 0x2b6   : > { %v1270_v36 = vmul.f32 %v3949_v0, %v2926_v60  ;;  %v1277_v13 = vmul.f32 %v3950_v50, %v3017_v63  ;;  %v993_v5 = vmul.f32 %v3951_v2, %v2932_v42  ;;  %v3952_v47 = vstv %s3941_s19 }
 0x2b7   : > { %v1000_v31 = vmul.f32 %v3952_v47, %v3004_v12  ;;  %v1189_v37 = vadd.f32 %v1187_v14, %v1184_v21  ;;  %v1280_v28 = vadd.f32 %v1278_v57, %v1273_v44  ;;  %v1267_v22 = vadd.f32 %v1265_v35, %v1260_v40 }
 0x2b8   : > { %v990_v3 = vadd.f32 %v3124_v15, %v983_v55  ;;  %v3953_v20 = vmov %v3945_v25  ;;  %v982_v59 = vadd.f32 %v980_v7, %v2968_v8  ;;  %v3954_v42 = vstv %s3948_s6  ;;  %v3959_v25 = vld [vmem:[#allocation21_spill] sm:$0xff]  ;;  %s3963_s9 = sshll.u32 %s3961_s22, 5  ;;  %s1326_s28 = scalar_lea.sflag [#allocation4], %s3961_s22 }
 0x2b9   : > { %v1282_v33 = vmul.f32 %v3953_v20, %v3021_v41  ;;  %1191 = vrot.lane.b32.xlu0 %v1189_v37, %s1758_s30  ;;  %v1285_v54 = vadd.f32 %v1283_v38, %v1280_v28  ;;  %v1272_v62 = vadd.f32 %v1270_v36, %v1267_v22  ;;  %v1005_v9 = vmul.f32 %v3954_v42, %v3008_v27  ;;  %s1538_s23 = sshll.u32 %s3960_s5, 9  ;;  %s229_s11 = scalar_lea.vmem [#allocation7], %s3963_s9 }
 0x2ba   : > { %v995_v29 = vadd.f32 %v993_v5, %v990_v3  ;;  %v989_v24 = vadd.f32 %v987_v61, %v982_v59  ;;  %v3955_v12 = vmov %v3951_v2  ;;  %v3956_v46 = vmov %v3952_v47  ;;  %s1339_s8 = sshll.u32 %s229_s11, 4  ;;  %s3294_s18 = scalar_lea.hbm %s3967_s3, %s1538_s23  ;;  %s3298_s8 = int_to_ptr.vmem [resolvable:$true] %s1339_s8 }
 0x2bb   : > { %v992_v52 = vmul.f32 %v3955_v12, %v2926_v60  ;;  %v999_v15 = vmul.f32 %v3956_v46, %v3017_v63  ;;  %1288 = vrot.lane.b32.xlu1 %v1285_v54, %s1759_s1  ;;  %v1279_v17 = vadd.f32 %v1277_v13, %v1272_v62  ;;  %v3957_v8 = vmov %v3954_v42  ;;  %s1672_s14 = scalar_lea.vmem %s3298_s8, 512  ;;  %p1679_p8 = scmp.lt.s32.totalorder %s3298_s8, %s1677_s15 }
 0x2bc   : > { %v1002_v30 = vadd.f32 %v1000_v31, %v995_v29  ;;  %v1004_v14 = vmul.f32 %v3957_v8, %v3021_v41  ;;  %v3958_v63 = vmov 0.0   ;;  %vm472_vm15 = vcmp.lt.s32.totalorder %v3959_v25, 208  ;;  %p1673_p12 = scmp.ne.s32.totalorder %s3298_s8, %s1672_s14  ;;  %p1680_p9 = scmp.lt.s32.totalorder %s1678_s26, %s1672_s14 }
 0x2bd   : > { %v994_v23 = vadd.f32 %v992_v52, %v989_v24  ;;  %v1284_v16 = vadd.f32 %v1282_v33, %v1279_v17  ;;  %v437_v4 = vsel %vm339_vm2, 1.0, %v3958_v63  ;;  %v431_v57 = vsel %vm345_vm4, 1.0, %v3958_v63 }
 0x2be   : > { %v1007_v18 = vadd.f32 %v1005_v9, %v1002_v30  ;;  %v443_v32 = vsel %vm335_vm1, 1.0, %v3958_v63  ;;  %vm456_vm2 = vcmp.lt.s32.totalorder %v3959_v25, 240  ;;  %vm1100_vm4 = vcmp.lt.s32.totalorder %v1956_v48, 112  ;;  %p1674_p2 = pnand %p1673_p12, %p3970_p0  ;;  %p1681_p10 = por %p1680_p9, %p1679_p8 }
 0x2bf   : > { %v1001_v19 = vadd.f32 %v999_v15, %v994_v23  ;;  %1286 = vrot.lane.b32.xlu0 %v1284_v16, %s1759_s1  ;;  %vm464_vm1 = vcmp.lt.s32.totalorder %v3959_v25, 224  ;;  %v460_v53 = vsel %vm456_vm2, 1.0, %v3958_v63  ;;  %v476_v3 = vsel %vm472_vm15, 1.0, %v3958_v63 }
 0x2c0   : > { %v468_v13 = vsel %vm464_vm1, 1.0, %v3958_v63  ;;  %v3962_v8 = vlaneseq  ;;  %p1675_p7 = pneg %p1674_p2 }
 0x2c1   : > { %v1006_v27 = vadd.f32 %v1004_v14, %v1001_v19 }
 0x2c2   : > { %v1310_v14 = vshrl.u32 %v3962_v8, 7  ;;  %p1682_p1 = pnand %p1681_p10, %p1675_p7 }
 0x2c4   : > { %v1311_v16 = vsub.s32 0, %v1310_v14 }
 0x30b   : > { %v726_v39 = vpop.permute.xlu1 %725 }
 0x30c   : > { %v724_v56 = vpop.permute.xlu0 %723 }
 0x30d   : > { %v729_v26 = vsel %vm727_vm12, %v726_v39, %v724_v56  ;;  %v728_v38 = vsel %vm727_vm12, %v724_v56, %v726_v39  ;;  %v3965_v56 = vld [vmem:[#allocation24_spill] sm:$0xff] }
 0x30e   : > { %v730_v35 = vmul.f32 %v729_v26, %v431_v57 }
 0x310   : > { %v821_v51 = vpop.permute.xlu1 %820 }
 0x312   : > { %v819_v60 = vpop.permute.xlu0 %818 }
 0x313   : > { %v824_v41 = vsel %vm822_vm11, %v821_v51, %v819_v60  ;;  %v823_v61 = vsel %vm822_vm11, %v819_v60, %v821_v51  ;;  %v3966_v60 = vld [vmem:[#allocation22_spill] sm:$0xff] }
 0x314   : > { %v825_v34 = vmul.f32 %v824_v41, %v437_v4  ;;  %v828_v44 = vadd.f32 %v823_v61, %v728_v38  ;;  %v3968_v4 = vld [vmem:[#allocation25_spill] sm:$0xff] }
 0x315   : > { %v916_v43 = vpop.permute.xlu1 %915 }
 0x316   : > { %v827_v1 = vadd.f32 %v825_v34, %v730_v35 }
 0x317   : > { %v914_v10 = vpop.permute.xlu0 %913 }
 0x318   : > { %v919_v11 = vsel %vm917_vm13, %v916_v43, %v914_v10  ;;  %v918_v21 = vsel %vm917_vm13, %v914_v10, %v916_v43  ;;  %v3969_v43 = vld [vmem:[#allocation23_spill] sm:$0xff] }
 0x319   : > { %v920_v49 = vmul.f32 %v919_v11, %v443_v32  ;;  %v923_v0 = vadd.f32 %v918_v21, %v828_v44 }
 0x31b   : > { %v922_v58 = vadd.f32 %v920_v49, %v827_v1  ;;  %v1011_v37 = vadd.f32 %v1007_v18, %v923_v0 }
 0x31d   : > { %v1010_v45 = vadd.f32 %v1006_v27, %v922_v58 }
 0x31e   : > { %v1099_v7 = vpop.permute.xlu1 %1098 }
 0x323   : > { %v1097_v6 = vpop.permute.xlu0 %1096 }
 0x324   : > { %v1102_v55 = vsel %vm1100_vm4, %v1099_v7, %v1097_v6  ;;  %v1101_v50 = vsel %vm1100_vm4, %v1097_v6, %v1099_v7 }
 0x325   : > { %v1104_v5 = vmul.f32 %v1102_v55, %v460_v53  ;;  %v1105_v47 = vadd.f32 %v1101_v50, %v1010_v45 }
 0x326   : > { %v1194_v40 = vpop.permute.xlu1 %1193 }
 0x327   : > { %v1106_v20 = vadd.f32 %v1104_v5, %v1011_v37 }
 0x32b   : > { %v1192_v36 = vpop.permute.xlu0 %1191 }
 0x32c   : > { %v1197_v2 = vsel %vm1195_vm14, %v1194_v40, %v1192_v36  ;;  %v1196_v31 = vsel %vm1195_vm14, %v1192_v36, %v1194_v40 }
 0x32d   : > { %v1199_v28 = vmul.f32 %v1197_v2, %v468_v13  ;;  %v1289_v22 = vpop.permute.xlu1 %1288  ;;  %v1200_v33 = vadd.f32 %v1196_v31, %v1105_v47 }
 0x32f   : > { %v1201_v29 = vadd.f32 %v1199_v28, %v1106_v20 }
 0x331   : > { %v1287_v59 = vpop.permute.xlu0 %1286 }
 0x332   : > { %v1291_v54 = vsel %vm1290_vm0, %v1287_v59, %v1289_v22  ;;  %v1292_v62 = vsel %vm1290_vm0, %v1289_v22, %v1287_v59 }
 0x333   : > { %v1294_v42 = vmul.f32 %v1292_v62, %v476_v3  ;;  %v1295_v9 = vadd.f32 %v1291_v54, %v1200_v33 }
 0x335   : > { %v1296_v24 = vadd.f32 %v1294_v42, %v1201_v29  ;;  %v1297_v12 = vsub.f32 0.0, %v1295_v9 }
 0x337   : > { %v1298_v52 = vsub.f32 0.0, %v1296_v24  ;;  %v1299_v46 = vmul.f32 1.442695, %v1297_v12 }
 0x339   : > { %1621 = vpow2.f32 %v1299_v46  ;;  %v1301_v15 = vmul.f32 1.442695, %v1298_v52 }
 0x33b   : > { %1623 = vpow2.f32 %v1301_v15 }
 0x346   : > { %v1622_v48 = vpop.eup %1621 }
 0x347   : > { %v1303_v17 = vadd.f32 1.0, %v1622_v48 }
 0x348   : > { %v1624_v30 = vpop.eup %1623 }
 0x349   : > { %v1304_v23 = vadd.f32 1.0, %v1624_v30  ;;  %1625 = vrcp.f32 %v1303_v17 }
 0x34b   : > { %1627 = vrcp.f32 %v1304_v23 }
 0x356   : > { %v1626_v18 = vpop.eup %1625 }
 0x357   : > { %v1312_v19 = vrot.slane %v1626_v18, %v1311_v16 }
 0x358   : > { %v1628_v27 = vpop.eup %1627 }
 0x359   : > { %v1316_v39 = vrot.slane %v1628_v27, %v1311_v16  ;;  %v1317_v51 = vmul.f32 %v1312_v19, %v3965_v56  ;;  %v1319_v63 = vmul.f32 %v1312_v19, %v3966_v60 }
 0x35b   : > { %v1318_v41 = vmul.f32 %v1316_v39, %v3968_v4  ;;  %v1320_v10 = vmul.f32 %v1316_v39, %v3969_v43  ;;  %1321 = vst [vmem:[%s229_s11] sm:$0xff] %v1317_v51  ;;  %1323 = vst [vmem:[%s229_s11 + $0x10] sm:$0xff] %v1319_v63 }
 0x35d   : > { %1322 = vst [vmem:[%s229_s11 + $0x8] sm:$0xff] %v1318_v41  ;;  %1324 = vst [vmem:[%s229_s11 + $0x18] sm:$0xff] %v1320_v10 }
 0x35e   : > { %1685 = shalt.err (!%p1682_p1)
}
 0x35f   : > { %s1686_s29 = scalar_lea.hbm %s3294_s18, 512  ;;  %s1690_s12 = scalar_lea.hbm %s3967_s3, 1024 }
 0x360   : > { %p1687_p4 = scmp.ne.s32.totalorder %s3294_s18, %s1686_s29  ;;  %p1691_p6 = scmp.lt.s32.totalorder %s3294_s18, %s3967_s3 }
 0x361   : > { %p1692_p13 = scmp.lt.s32.totalorder %s1690_s12, %s1686_s29 }
 0x362   : > { %p1688_p11 = pnand %p1687_p4, %p3970_p0 }
 0x363   : > { %p1693_p3 = por %p1692_p13, %p1691_p6 }
 0x364   : > { %p1689_p5 = pneg %p1688_p11 }
 0x366   : > { %p1694_p12 = pnand %p1693_p3, %p1689_p5 }
 0x368   : > { %1697 = shalt.err (!%p1694_p12)
}
 0x369   : > { %s1761_s27 = smov 256  }
 0x36a   : > { %1545 = dma.vmem_to_hbm [thread:$0]  (%p3970_p0), %s3298_s8, 512, %s3294_s18, %s1326_s28, %s1761_s27, %s1761_s27, %s1756_s0  }
 0x36b PF: > { %s3971_s13 = sld [smem:[#allocation11_spill]] }
 0x36c   : > { %s3972_s21 = sld [smem:[#allocation19_spill]] }
 0x36d   : > { %s3973_s16 = sld [smem:[#allocation14_spill]] }
 0x371   : > { %s1354_s19 = sand.u32 1, %s3971_s13  }
 0x372   : > { %p3974_p2 = scmp.ne.s32.totalorder %s3972_s21, 0  ;;  %s1355_s30 = scalar_lea.sflag [#allocation4], %s1354_s19 }
 0x373   : > { %p3975_p7 = scmp.ge.s32.totalorder %s3973_s16, 2 }
 0x375   : > { %p1556_p8 = pnand %p3975_p7, %p3974_p2 }
 0x377   : > { %p1557_p9 = pneg %p1556_p8 }
 0x379   : > { %1723 = dma.done.wait (%p1557_p9), %s1355_s30, 512  }
 0x37a   : > { %1725 = vsyncadd (%p1557_p9), %s1355_s30, 4294966784  ;;  %s3976_s18 = sld [smem:[#allocation16_spill]] }
 0x37b   : > { %s3977_s15 = sld [smem:[#allocation12_spill]] }
 0x37c   : > { %s3978_s16 = sld [smem:[#allocation13_spill]] }
 0x37d   : > { %s3979_s17 = sld [smem:[#allocation17_spill]] }
 0x380   : > { %p18_p10 = scmp.ge.s32.totalorder %s3976_s18, 4  }
 0x382   :  { %20 = sbr.rel (!%p18_p10) target bundleno = 12 (0xc), region = 86 }
 0x387   :  { %1360 = vsyncpa [#allocation3], 1 }
 0x388   :  { %1362 = vsyncpa [#allocation3 + $0x1], 1 }
 0x389   :  { %1363 = vsyncpa [#allocation4], 1 }
 0x38a   :  { %1365 = vsyncpa [#allocation4 + $0x1], 1 }
 0x38b   :  { %1366 = vsyncpa [#allocation5], 1 }
 0x38c   :  { %1368 = vsyncpa [#allocation5 + $0x1], 1 }

</bundles_post_ra>
